<compile_context>
chip_gen: v5e
topology: v5e:2x2
jax: 0.10.0
libtpu: 0.0.40
codegen_flags: <defaults>
</compile_context>

<pallas_src>
import functools

import numpy as np
import jax
import jax.numpy as jnp
from jax import lax
from jax.experimental import pallas as pl
from jax.experimental.pallas import tpu as pltpu

NUM_GROUPS = 32        # torch GroupNorm(num_groups=32, eps=1e-6, affine=True)
GN_EPS = 1e-6
_VMEM_LIMIT = 64 * 1024 * 1024
_ROW_TARGET = 4096     # target flattened-spatial rows per kernel step
_LANE = 128


def _cparams(sem):
    return pltpu.CompilerParams(dimension_semantics=sem, vmem_limit_bytes=_VMEM_LIMIT)


def _round_up(v, m):
    return ((v + m - 1) // m) * m


def _tile_h(h, wpad, target=_ROW_TARGET):
    """Largest even divisor of h whose (tile_h * wpad) row count fits the target."""
    assert h % 2 == 0, "spatial height must be even"
    cands = [d for d in range(2, h + 1, 2) if h % d == 0]
    fit = [d for d in cands if d * wpad <= target]
    return max(fit) if fit else min(cands)


def _tile_rows(n, target=_ROW_TARGET):
    """Largest divisor of n that is a multiple of 8 and <= target (or n itself)."""
    if n <= target:
        return n
    best = None
    for d in range(8, target + 1, 8):
        if n % d == 0:
            best = d
    return best if best is not None else n


@functools.lru_cache(maxsize=None)
def _pad_mask(hp, wpad, wv):
    """(hp*wpad, 1) f32 mask: 1 at valid image positions, 0 at zero-pad positions."""
    m = np.zeros((hp, wpad, 1), np.float32)
    m[1:hp - 1, 1:wv + 1, :] = 1.0
    return jnp.asarray(m.reshape(hp * wpad, 1))


# --------------------------- 3x3 conv (stride=1, pad=1), optional fused GN(+Swish) ---------------------------
def _conv3x3_kernel(*refs, th, wpad, wv, cin, cout, extra, has_norm, swish, has_res):
    it = iter(refs)
    xm_ref = next(it)                    # (th*wpad, cin)   main rows of padded image
    xh_ref = next(it)                    # (2*wpad, cin)    halo rows (next 2 padded rows)
    mm_ref = mh_ref = sc_ref = sh_ref = r_ref = None
    if has_norm:
        mm_ref = next(it)                # (th*wpad, 1)
        mh_ref = next(it)                # (2*wpad, 1)
        sc_ref = next(it)                # (1, cin)  per-batch GN scale
        sh_ref = next(it)                # (1, cin)  per-batch GN shift
    w_ref = next(it)                     # (3, 3, cin, cout)
    b_ref = next(it)                     # (1, cout) f32
    if has_res:
        r_ref = next(it)                 # (th, wv, cout)
    o_ref = next(it)                     # (th, wv, cout)
    xs_ref = next(it)                    # scratch: (th*wpad + 2*wpad + extra, cin)

    rows = th * wpad

    def prep(xraw, m_ref):
        if not has_norm:
            return xraw
        xf = xraw.astype(jnp.float32) * sc_ref[...] + sh_ref[...]
        if swish:
            xf = xf * jax.nn.sigmoid(xf)
        # Re-zero the conv's zero-padding positions (GN shift would make them nonzero).
        return (xf * m_ref[...]).astype(xraw.dtype)

    xs_ref[0:rows, :] = prep(xm_ref[...], mm_ref)
    xs_ref[rows:rows + 2 * wpad, :] = prep(xh_ref[...], mh_ref)
    # Tail rows only feed discarded (junk-column) outputs; zero for determinism.
    xs_ref[rows + 2 * wpad:rows + 2 * wpad + extra, :] = jnp.zeros(
        (extra, cin), jnp.bfloat16)

    acc = jnp.zeros((rows, cout), jnp.float32)
    for dy in range(3):
        for dx in range(3):
            s = dy * wpad + dx                        # static row offset per tap
            acc = acc + jnp.dot(xs_ref[s:s + rows, :], w_ref[dy, dx],
                                preferred_element_type=jnp.float32)
    acc = acc + b_ref[...]

    out = acc.reshape(th, wpad, cout)[:, :wv, :]      # drop padded / junk columns in-kernel
    if has_res:
        out = out + r_ref[...].astype(jnp.float32)
    o_ref[...] = out.astype(o_ref.dtype)


def conv3x3(x, w, b, *, norm=None, swish=False, residual=None):
    """x: (B,H,W,Cin) bf16; w: (3,3,Cin,Cout) bf16; b: (Cout,) f32.
    norm: optional (scale, shift) each (B,1,Cin) f32 -> fused GroupNorm(+Swish) prologue.
    residual: optional (B,H,W,Cout) bf16 added to the conv output in-kernel."""
    B, H, W, Cin = x.shape
    Cout = w.shape[-1]
    wpad = _round_up(W + 2, 8)
    th = _tile_h(H, wpad)
    nt = H // th
    hp = H + 2
    extra = 8

    xp = jnp.pad(x, ((0, 0), (1, 1), (1, wpad - W - 1), (0, 0))).reshape(B, hp * wpad, Cin)
    b2 = b.reshape(1, Cout).astype(jnp.float32)
    has_norm = norm is not None
    has_res = residual is not None

    in_specs = [
        pl.BlockSpec((None, th * wpad, Cin), lambda bi, ti: (bi, ti, 0)),
        pl.BlockSpec((None, 2 * wpad, Cin), lambda bi, ti: (bi, (ti + 1) * (th // 2), 0)),
    ]
    args = [xp, xp]
    if has_norm:
        sc, sh = norm
        mask = _pad_mask(hp, wpad, W)
        in_specs += [
            pl.BlockSpec((th * wpad, 1), lambda bi, ti: (ti, 0)),
            pl.BlockSpec((2 * wpad, 1), lambda bi, ti: ((ti + 1) * (th // 2), 0)),
            pl.BlockSpec((None, 1, Cin), lambda bi, ti: (bi, 0, 0)),
            pl.BlockSpec((None, 1, Cin), lambda bi, ti: (bi, 0, 0)),
        ]
        args += [mask, mask, sc, sh]
    in_specs += [
        pl.BlockSpec((3, 3, Cin, Cout), lambda bi, ti: (0, 0, 0, 0)),
        pl.BlockSpec((1, Cout), lambda bi, ti: (0, 0)),
    ]
    args += [w, b2]
    if has_res:
        in_specs.append(pl.BlockSpec((None, th, W, Cout), lambda bi, ti: (bi, ti, 0, 0)))
        args.append(residual)

    kernel = functools.partial(
        _conv3x3_kernel, th=th, wpad=wpad, wv=W, cin=Cin, cout=Cout, extra=extra,
        has_norm=has_norm, swish=swish, has_res=has_res)

    return pl.pallas_call(
        kernel,
        out_shape=jax.ShapeDtypeStruct((B, H, W, Cout), jnp.bfloat16),
        grid=(B, nt),
        in_specs=in_specs,
        out_specs=pl.BlockSpec((None, th, W, Cout), lambda bi, ti: (bi, ti, 0, 0)),
        scratch_shapes=[pltpu.VMEM((th * wpad + 2 * wpad + extra, Cin), jnp.bfloat16)],
        compiler_params=_cparams(("parallel", "parallel")),
    )(*args)


# --------------------------- 1x1 conv (matmul), optional fused GN prologue ---------------------------
def _conv1x1_kernel(*refs, has_norm, has_res):
    it = iter(refs)
    x_ref = next(it)
    sc_ref = sh_ref = r_ref = None
    if has_norm:
        sc_ref = next(it)
        sh_ref = next(it)
    w_ref = next(it)
    b_ref = next(it)
    if has_res:
        r_ref = next(it)
    o_ref = next(it)

    x = x_ref[...]
    if has_norm:
        x = (x.astype(jnp.float32) * sc_ref[...] + sh_ref[...]).astype(x.dtype)
    acc = jnp.dot(x, w_ref[...], preferred_element_type=jnp.float32) + b_ref[...]
    if has_res:
        acc = acc + r_ref[...].astype(jnp.float32)
    o_ref[...] = acc.astype(o_ref.dtype)


def conv1x1(x, w, b, *, norm=None, residual=None):
    """x: (B,N,Cin) bf16; w: (Cin,Cout) bf16; b: (Cout,) f32."""
    B, N, Cin = x.shape
    Cout = w.shape[-1]
    tr = _tile_rows(N)
    nt = N // tr
    b2 = b.reshape(1, Cout).astype(jnp.float32)
    has_norm = norm is not None
    has_res = residual is not None

    in_specs = [pl.BlockSpec((None, tr, Cin), lambda bi, ti: (bi, ti, 0))]
    args = [x]
    if has_norm:
        sc, sh = norm
        in_specs += [pl.BlockSpec((None, 1, Cin), lambda bi, ti: (bi, 0, 0))] * 2
        args += [sc, sh]
    in_specs += [pl.BlockSpec((Cin, Cout), lambda bi, ti: (0, 0)),
                 pl.BlockSpec((1, Cout), lambda bi, ti: (0, 0))]
    args += [w, b2]
    if has_res:
        in_specs.append(pl.BlockSpec((None, tr, Cout), lambda bi, ti: (bi, ti, 0)))
        args.append(residual)

    return pl.pallas_call(
        functools.partial(_conv1x1_kernel, has_norm=has_norm, has_res=has_res),
        out_shape=jax.ShapeDtypeStruct((B, N, Cout), jnp.bfloat16),
        grid=(B, nt),
        in_specs=in_specs,
        out_specs=pl.BlockSpec((None, tr, Cout), lambda bi, ti: (bi, ti, 0)),
        compiler_params=_cparams(("parallel", "parallel")),
    )(*args)


# --------------------------- GroupNorm statistics (tiled reduction) ---------------------------
def _gn_stats_kernel(x_ref, o_ref):
    x = x_ref[...].astype(jnp.float32)
    s1 = jnp.sum(x, axis=0, keepdims=True)
    s2 = jnp.sum(x * x, axis=0, keepdims=True)
    part = jnp.concatenate([s1, s2], axis=0)          # (2, C)

    @pl.when(pl.program_id(1) == 0)
    def _():
        o_ref[...] = part

    @pl.when(pl.program_id(1) != 0)
    def _():
        o_ref[...] = o_ref[...] + part


def group_norm_params(x, gamma, beta):
    """Per-batch, per-channel GroupNorm (scale, shift), each (B,1,C) f32."""
    B, H, W, C = x.shape
    assert C % NUM_GROUPS == 0
    N = H * W
    tr = _tile_rows(N)
    stats = pl.pallas_call(
        _gn_stats_kernel,
        out_shape=jax.ShapeDtypeStruct((B, 2, C), jnp.float32),
        grid=(B, N // tr),
        in_specs=[pl.BlockSpec((None, tr, C), lambda bi, ti: (bi, ti, 0))],
        out_specs=pl.BlockSpec((None, 2, C), lambda bi, ti: (bi, 0, 0)),
        compiler_params=_cparams(("parallel", "arbitrary")),
    )(x.reshape(B, N, C))

    # Tiny per-(batch, group) combine in plain JAX (O(B*C) work).
    s1, s2 = stats[:, 0, :], stats[:, 1, :]
    cg = C // NUM_GROUPS
    gs1 = s1.reshape(B, NUM_GROUPS, cg).sum(-1)
    gs2 = s2.reshape(B, NUM_GROUPS, cg).sum(-1)
    cnt = jnp.float32(N * cg)
    mean = gs1 / cnt
    var = gs2 / cnt - mean * mean                     # biased variance (torch GroupNorm)
    inv = lax.rsqrt(var + GN_EPS)
    mean_c = jnp.repeat(mean, cg, axis=1)
    inv_c = jnp.repeat(inv, cg, axis=1)
    scale = inv_c * gamma[None, :]
    shift = beta[None, :] - mean_c * scale
    return scale[:, None, :], shift[:, None, :]


# --------------------------- spatial self-attention (NonLocalBlock core) ---------------------------
def _attention_kernel(q_ref, k_ref, v_ref, o_ref, *, scale):
    q = q_ref[...]
    k = k_ref[...]
    v = v_ref[...]
    s = lax.dot_general(q, k, (((1,), (1,)), ((), ())),
                        preferred_element_type=jnp.float32) * scale    # (TQ, N)
    s = s - jnp.max(s, axis=-1, keepdims=True)
    p = jnp.exp(s)
    denom = jnp.sum(p, axis=-1, keepdims=True)
    p = (p * pl.reciprocal(denom, approx=True)).astype(v.dtype)
    o_ref[...] = jnp.dot(p, v, preferred_element_type=jnp.float32).astype(o_ref.dtype)


def spatial_attention(q, k, v):
    B, N, C = q.shape
    tq = _tile_rows(N, 128)
    q_spec = pl.BlockSpec((None, tq, C), lambda bi, ti: (bi, ti, 0))
    kv_spec = pl.BlockSpec((None, N, C), lambda bi, ti: (bi, 0, 0))
    return pl.pallas_call(
        functools.partial(_attention_kernel, scale=float(C) ** -0.5),
        out_shape=jax.ShapeDtypeStruct((B, N, C), jnp.bfloat16),
        grid=(B, N // tq),
        in_specs=[q_spec, kv_spec, kv_spec],
        out_specs=q_spec,
        compiler_params=_cparams(("parallel", "parallel")),
    )(q, k, v)


# --------------------------- blocks ---------------------------
def residual_block(x, p):
    sc1, sh1 = group_norm_params(x, p["gn1_g"], p["gn1_b"])
    h = conv3x3(x, p["w1"], p["b1"], norm=(sc1, sh1), swish=True)
    sc2, sh2 = group_norm_params(h, p["gn2_g"], p["gn2_b"])
    if "wcu" in p:                                    # channel_up 1x1 conv
        B, H, W, C = x.shape
        r = conv1x1(x.reshape(B, H * W, C), p["wcu"], p["bcu"]).reshape(B, H, W, -1)
    else:
        r = x
    return conv3x3(h, p["w2"], p["b2"], norm=(sc2, sh2), swish=True, residual=r)


def nonlocal_block(x, p):
    B, H, W, C = x.shape
    N = H * W
    sc, sh = group_norm_params(x, p["gn_g"], p["gn_b"])
    xf = x.reshape(B, N, C)
    q = conv1x1(xf, p["wq"], p["bq"], norm=(sc, sh))   # GN normalize fused into q/k/v convs
    k = conv1x1(xf, p["wk"], p["bk"], norm=(sc, sh))
    v = conv1x1(xf, p["wv"], p["bv"], norm=(sc, sh))
    a = spatial_attention(q, k, v)
    out = conv1x1(a, p["wp"], p["bp"], residual=xf)    # x + proj_out(A)
    return out.reshape(B, H, W, C)


def upsample_block(x, p):
    # TODO(synk): fuse the nearest-2x upsample into the following conv3x3's index_map
    # instead of materializing the 4x feature map in HBM.
    x = jnp.repeat(jnp.repeat(x, 2, axis=1), 2, axis=2)
    return conv3x3(x, p["w"], p["b"])


# --------------------------- deterministic parameter init ---------------------------
def _init_conv(key, kh, kw, cin, cout):
    kw_, kb_ = jax.random.split(key)
    fan = kh * kw * cin
    w = (jax.random.normal(kw_, (kh, kw, cin, cout), jnp.float32)
         / np.sqrt(fan)).astype(jnp.bfloat16)
    b = 0.01 * jax.random.normal(kb_, (cout,), jnp.float32)
    return w, b


def _init_conv1x1(key, cin, cout):
    w, b = _init_conv(key, 1, 1, cin, cout)
    return w.reshape(cin, cout), b


def _init_gn(c):
    return jnp.ones((c,), jnp.float32), jnp.zeros((c,), jnp.float32)


def _init_res(key, cin, cout):
    k1, k2, k3 = jax.random.split(key, 3)
    p = {}
    p["gn1_g"], p["gn1_b"] = _init_gn(cin)
    p["w1"], p["b1"] = _init_conv(k1, 3, 3, cin, cout)
    p["gn2_g"], p["gn2_b"] = _init_gn(cout)
    p["w2"], p["b2"] = _init_conv(k2, 3, 3, cout, cout)
    if cin != cout:
        p["wcu"], p["bcu"] = _init_conv1x1(k3, cin, cout)
    return p


def _init_attn(key, c):
    kq, kk, kv, kp = jax.random.split(key, 4)
    p = {}
    p["gn_g"], p["gn_b"] = _init_gn(c)
    p["wq"], p["bq"] = _init_conv1x1(kq, c, c)
    p["wk"], p["bk"] = _init_conv1x1(kk, c, c)
    p["wv"], p["bv"] = _init_conv1x1(kv, c, c)
    p["wp"], p["bp"] = _init_conv1x1(kp, c, c)
    return p


def init_decoder_params(key, latent_dim, image_channels, is_mask=False):
    attn_resolutions = [16]
    ch_mult = [128, 128, 256, 256, 512]
    num_resolutions = len(ch_mult)
    block_in = ch_mult[num_resolutions - 1]
    curr_res = 256 // 2 ** (num_resolutions - 1)

    keys = list(jax.random.split(key, 128))
    it = iter(keys)
    nk = lambda: next(it)

    layers = []
    w, b = _init_conv(nk(), 3, 3, latent_dim, block_in)
    layers.append(("conv", {"w": w, "b": b}))
    layers.append(("res", _init_res(nk(), block_in, block_in)))
    layers.append(("attn", _init_attn(nk(), block_in)))
    layers.append(("res", _init_res(nk(), block_in, block_in)))
    for i in reversed(range(num_resolutions)):
        block_out = ch_mult[i]
        for _ in range(3):
            layers.append(("res", _init_res(nk(), block_in, block_out)))
            block_in = block_out
            if curr_res in attn_resolutions:
                layers.append(("attn", _init_attn(nk(), block_in)))
        if i != 0:
            w, b = _init_conv(nk(), 3, 3, block_in, block_in)
            layers.append(("up", {"w": w, "b": b}))
            curr_res = curr_res * 2

    g, gb = _init_gn(block_in)
    out_ch = image_channels if not is_mask else 4
    w, b = _init_conv(nk(), 3, 3, block_in, out_ch)
    if out_ch < _LANE:   # lane-dense final conv: pad Cout with zero columns, slice in wrapper
        w = jnp.pad(w, ((0, 0), (0, 0), (0, 0), (0, _LANE - out_ch)))
        b = jnp.pad(b, ((0, _LANE - out_ch),))
    layers.append(("final", {"g": g, "bg": gb, "w": w, "b": b,
                             "swish": not is_mask, "out_ch": out_ch}))
    return layers


# --------------------------- forward ---------------------------
def decoder_forward(x_nchw, layers):
    # layout: NCHW (PyTorch) -> NHWC bf16 internally -> NCHW f32 out
    x = jnp.transpose(x_nchw, (0, 2, 3, 1)).astype(jnp.bfloat16)
    out_ch = None
    for kind, p in layers:
        if kind == "conv":
            x = conv3x3(x, p["w"], p["b"])
        elif kind == "res":
            x = residual_block(x, p)
        elif kind == "attn":
            x = nonlocal_block(x, p)
        elif kind == "up":
            x = upsample_block(x, p)
        elif kind == "final":
            sc, sh = group_norm_params(x, p["g"], p["bg"])
            x = conv3x3(x, p["w"], p["b"], norm=(sc, sh), swish=p["swish"])
            out_ch = p["out_ch"]
        else:
            raise ValueError(kind)
    y = x[..., :out_ch]
    return jnp.transpose(y, (0, 3, 1, 2)).astype(jnp.float32)


if __name__ == "__main__":
    key = jax.random.PRNGKey(0)
    kx, kp = jax.random.split(key)

    # Small latent consistent with the decoder: (B, latent_dim, h, w); 4 upsamples -> 16x spatial.
    B, latent_dim, Hl, Wl = 2, 128, 4, 4
    image_channels = 3

    x = jax.random.normal(kx, (B, latent_dim, Hl, Wl), jnp.float32)
    layers = init_decoder_params(kp, latent_dim, image_channels, is_mask=False)

    y = decoder_forward(x, layers)
    y = jax.block_until_ready(y)

    assert y.shape == (B, image_channels, Hl * 16, Wl * 16), y.shape
    assert bool(jnp.all(jnp.isfinite(y)))
    print("KERNEL_OK")
</pallas_src>

<mosaic_0001>
module attributes {stable_mosaic.version = 11 : i64} {
  func.func @_conv3x3_kernel(%arg0: i32, %arg1: i32, %arg2: memref<1x32x128xbf16, #tpu.memory_space<vmem>>, %arg3: memref<1x16x128xbf16, #tpu.memory_space<vmem>>, %arg4: memref<3x3x128x512xbf16, #tpu.memory_space<vmem>>, %arg5: memref<1x512xf32, #tpu.memory_space<vmem>>, %arg6: memref<1x4x4x512xbf16, #tpu.memory_space<vmem>>, %arg7: memref<56x128xbf16, #tpu.memory_space<vmem>>) attributes {dimension_semantics = [#tpu.dimension_semantics<parallel>, #tpu.dimension_semantics<parallel>], iteration_bounds = array<i64: 2, 1>, scalar_prefetch = 0 : i64, scratch_operands = 1 : i64, tpu.core_type = #tpu.core_type<tc>, window_params = [{transform_indices = @transform_0, window_bounds = array<i64: 1, 32, 128>}, {transform_indices = @transform_1, window_bounds = array<i64: 1, 16, 128>}, {pipeline_mode = #tpu.pipeline_mode<synchronous>, transform_indices = @transform_2, window_bounds = array<i64: 3, 3, 128, 512>}, {pipeline_mode = #tpu.pipeline_mode<synchronous>, transform_indices = @transform_3, window_bounds = array<i64: 1, 512>}, {transform_indices = @transform_4, window_bounds = array<i64: 1, 4, 4, 512>}]} {
    %c0 = arith.constant 0 : index
    %c0_0 = arith.constant 0 : index
    %c0_1 = arith.constant 0 : index
    %0 = vector.load %arg2[%c0, %c0_0, %c0_1] : memref<1x32x128xbf16, #tpu.memory_space<vmem>>, vector<1x32x128xbf16>
    %1 = vector.shape_cast %0 : vector<1x32x128xbf16> to vector<32x128xbf16>
    %c0_2 = arith.constant 0 : index
    %c0_3 = arith.constant 0 : index
    %2 = vector.load %arg7[%c0_2, %c0_3] : memref<56x128xbf16, #tpu.memory_space<vmem>>, vector<32x128xbf16>
    tpu.vector_store %arg7[%c0_2, %c0_3], %1 {strides = array<i32>} : memref<56x128xbf16, #tpu.memory_space<vmem>>, vector<32x128xbf16>,
    %c0_4 = arith.constant 0 : index
    %c0_5 = arith.constant 0 : index
    %c0_6 = arith.constant 0 : index
    %3 = vector.load %arg3[%c0_4, %c0_5, %c0_6] : memref<1x16x128xbf16, #tpu.memory_space<vmem>>, vector<1x16x128xbf16>
    %4 = vector.shape_cast %3 : vector<1x16x128xbf16> to vector<16x128xbf16>
    %c32 = arith.constant 32 : index
    %c0_7 = arith.constant 0 : index
    %5 = vector.load %arg7[%c32, %c0_7] : memref<56x128xbf16, #tpu.memory_space<vmem>>, vector<16x128xbf16>
    tpu.vector_store %arg7[%c32, %c0_7], %4 {strides = array<i32>} : memref<56x128xbf16, #tpu.memory_space<vmem>>, vector<16x128xbf16>,
    %cst = arith.constant 0.000000e+00 : bf16
    %6 = vector.broadcast %cst : bf16 to vector<8x128xbf16>
    %c48 = arith.constant 48 : index
    %c0_8 = arith.constant 0 : index
    %7 = vector.load %arg7[%c48, %c0_8] : memref<56x128xbf16, #tpu.memory_space<vmem>>, vector<8x128xbf16>
    tpu.vector_store %arg7[%c48, %c0_8], %6 {strides = array<i32>} : memref<56x128xbf16, #tpu.memory_space<vmem>>, vector<8x128xbf16>,
    %cst_9 = arith.constant 0.000000e+00 : f32
    %8 = vector.broadcast %cst_9 : f32 to vector<32x512xf32>
    %c0_10 = arith.constant 0 : index
    %c0_11 = arith.constant 0 : index
    %9 = vector.load %arg7[%c0_10, %c0_11] : memref<56x128xbf16, #tpu.memory_space<vmem>>, vector<32x128xbf16>
    %c0_12 = arith.constant 0 : index
    %c0_13 = arith.constant 0 : index
    %c0_14 = arith.constant 0 : index
    %c0_15 = arith.constant 0 : index
    %10 = vector.load %arg4[%c0_12, %c0_13, %c0_14, %c0_15] : memref<3x3x128x512xbf16, #tpu.memory_space<vmem>>, vector<1x1x128x512xbf16>
    %11 = vector.shape_cast %10 : vector<1x1x128x512xbf16> to vector<128x512xbf16>
    %cst_16 = arith.constant dense<0.000000e+00> : vector<32x512xf32>
    %12 = tpu.matmul %9, %11, %cst_16 {dimension_numbers = #tpu.dot_dimension_numbers<[1], [0], [0], [1], [0, 0, 1, 1], [], []>} : vector<32x128xbf16>, vector<128x512xbf16>, vector<32x512xf32> -> vector<32x512xf32>
    %13 = arith.addf %8, %12 : vector<32x512xf32>
    %c1 = arith.constant 1 : index
    %c0_17 = arith.constant 0 : index
    %14 = vector.load %arg7[%c1, %c0_17] : memref<56x128xbf16, #tpu.memory_space<vmem>>, vector<32x128xbf16>
    %c0_18 = arith.constant 0 : index
    %c1_19 = arith.constant 1 : index
    %c0_20 = arith.constant 0 : index
    %c0_21 = arith.constant 0 : index
    %15 = vector.load %arg4[%c0_18, %c1_19, %c0_20, %c0_21] : memref<3x3x128x512xbf16, #tpu.memory_space<vmem>>, vector<1x1x128x512xbf16>
    %16 = vector.shape_cast %15 : vector<1x1x128x512xbf16> to vector<128x512xbf16>
    %cst_22 = arith.constant dense<0.000000e+00> : vector<32x512xf32>
    %17 = tpu.matmul %14, %16, %cst_22 {dimension_numbers = #tpu.dot_dimension_numbers<[1], [0], [0], [1], [0, 0, 1, 1], [], []>} : vector<32x128xbf16>, vector<128x512xbf16>, vector<32x512xf32> -> vector<32x512xf32>
    %18 = arith.addf %13, %17 : vector<32x512xf32>
    %c2 = arith.constant 2 : index
    %c0_23 = arith.constant 0 : index
    %19 = vector.load %arg7[%c2, %c0_23] : memref<56x128xbf16, #tpu.memory_space<vmem>>, vector<32x128xbf16>
    %c0_24 = arith.constant 0 : index
    %c2_25 = arith.constant 2 : index
    %c0_26 = arith.constant 0 : index
    %c0_27 = arith.constant 0 : index
    %20 = vector.load %arg4[%c0_24, %c2_25, %c0_26, %c0_27] : memref<3x3x128x512xbf16, #tpu.memory_space<vmem>>, vector<1x1x128x512xbf16>
    %21 = vector.shape_cast %20 : vector<1x1x128x512xbf16> to vector<128x512xbf16>
    %cst_28 = arith.constant dense<0.000000e+00> : vector<32x512xf32>
    %22 = tpu.matmul %19, %21, %cst_28 {dimension_numbers = #tpu.dot_dimension_numbers<[1], [0], [0], [1], [0, 0, 1, 1], [], []>} : vector<32x128xbf16>, vector<128x512xbf16>, vector<32x512xf32> -> vector<32x512xf32>
    %23 = arith.addf %18, %22 : vector<32x512xf32>
    %c8 = arith.constant 8 : index
    %c0_29 = arith.constant 0 : index
    %24 = vector.load %arg7[%c8, %c0_29] : memref<56x128xbf16, #tpu.memory_space<vmem>>, vector<32x128xbf16>
    %c1_30 = arith.constant 1 : index
    %c0_31 = arith.constant 0 : index
    %c0_32 = arith.constant 0 : index
    %c0_33 = arith.constant 0 : index
    %25 = vector.load %arg4[%c1_30, %c0_31, %c0_32, %c0_33] : memref<3x3x128x512xbf16, #tpu.memory_space<vmem>>, vector<1x1x128x512xbf16>
    %26 = vector.shape_cast %25 : vector<1x1x128x512xbf16> to vector<128x512xbf16>
    %cst_34 = arith.constant dense<0.000000e+00> : vector<32x512xf32>
    %27 = tpu.matmul %24, %26, %cst_34 {dimension_numbers = #tpu.dot_dimension_numbers<[1], [0], [0], [1], [0, 0, 1, 1], [], []>} : vector<32x128xbf16>, vector<128x512xbf16>, vector<32x512xf32> -> vector<32x512xf32>
    %28 = arith.addf %23, %27 : vector<32x512xf32>
    %c9 = arith.constant 9 : index
    %c0_35 = arith.constant 0 : index
    %29 = vector.load %arg7[%c9, %c0_35] : memref<56x128xbf16, #tpu.memory_space<vmem>>, vector<32x128xbf16>
    %c1_36 = arith.constant 1 : index
    %c1_37 = arith.constant 1 : index
    %c0_38 = arith.constant 0 : index
    %c0_39 = arith.constant 0 : index
    %30 = vector.load %arg4[%c1_36, %c1_37, %c0_38, %c0_39] : memref<3x3x128x512xbf16, #tpu.memory_space<vmem>>, vector<1x1x128x512xbf16>
    %31 = vector.shape_cast %30 : vector<1x1x128x512xbf16> to vector<128x512xbf16>
    %cst_40 = arith.constant dense<0.000000e+00> : vector<32x512xf32>
    %32 = tpu.matmul %29, %31, %cst_40 {dimension_numbers = #tpu.dot_dimension_numbers<[1], [0], [0], [1], [0, 0, 1, 1], [], []>} : vector<32x128xbf16>, vector<128x512xbf16>, vector<32x512xf32> -> vector<32x512xf32>
    %33 = arith.addf %28, %32 : vector<32x512xf32>
    %c10 = arith.constant 10 : index
    %c0_41 = arith.constant 0 : index
    %34 = vector.load %arg7[%c10, %c0_41] : memref<56x128xbf16, #tpu.memory_space<vmem>>, vector<32x128xbf16>
    %c1_42 = arith.constant 1 : index
    %c2_43 = arith.constant 2 : index
    %c0_44 = arith.constant 0 : index
    %c0_45 = arith.constant 0 : index
    %35 = vector.load %arg4[%c1_42, %c2_43, %c0_44, %c0_45] : memref<3x3x128x512xbf16, #tpu.memory_space<vmem>>, vector<1x1x128x512xbf16>
    %36 = vector.shape_cast %35 : vector<1x1x128x512xbf16> to vector<128x512xbf16>
    %cst_46 = arith.constant dense<0.000000e+00> : vector<32x512xf32>
    %37 = tpu.matmul %34, %36, %cst_46 {dimension_numbers = #tpu.dot_dimension_numbers<[1], [0], [0], [1], [0, 0, 1, 1], [], []>} : vector<32x128xbf16>, vector<128x512xbf16>, vector<32x512xf32> -> vector<32x512xf32>
    %38 = arith.addf %33, %37 : vector<32x512xf32>
    %c16 = arith.constant 16 : index
    %c0_47 = arith.constant 0 : index
    %39 = vector.load %arg7[%c16, %c0_47] : memref<56x128xbf16, #tpu.memory_space<vmem>>, vector<32x128xbf16>
    %c2_48 = arith.constant 2 : index
    %c0_49 = arith.constant 0 : index
    %c0_50 = arith.constant 0 : index
    %c0_51 = arith.constant 0 : index
    %40 = vector.load %arg4[%c2_48, %c0_49, %c0_50, %c0_51] : memref<3x3x128x512xbf16, #tpu.memory_space<vmem>>, vector<1x1x128x512xbf16>
    %41 = vector.shape_cast %40 : vector<1x1x128x512xbf16> to vector<128x512xbf16>
    %cst_52 = arith.constant dense<0.000000e+00> : vector<32x512xf32>
    %42 = tpu.matmul %39, %41, %cst_52 {dimension_numbers = #tpu.dot_dimension_numbers<[1], [0], [0], [1], [0, 0, 1, 1], [], []>} : vector<32x128xbf16>, vector<128x512xbf16>, vector<32x512xf32> -> vector<32x512xf32>
    %43 = arith.addf %38, %42 : vector<32x512xf32>
    %c17 = arith.constant 17 : index
    %c0_53 = arith.constant 0 : index
    %44 = vector.load %arg7[%c17, %c0_53] : memref<56x128xbf16, #tpu.memory_space<vmem>>, vector<32x128xbf16>
    %c2_54 = arith.constant 2 : index
    %c1_55 = arith.constant 1 : index
    %c0_56 = arith.constant 0 : index
    %c0_57 = arith.constant 0 : index
    %45 = vector.load %arg4[%c2_54, %c1_55, %c0_56, %c0_57] : memref<3x3x128x512xbf16, #tpu.memory_space<vmem>>, vector<1x1x128x512xbf16>
    %46 = vector.shape_cast %45 : vector<1x1x128x512xbf16> to vector<128x512xbf16>
    %cst_58 = arith.constant dense<0.000000e+00> : vector<32x512xf32>
    %47 = tpu.matmul %44, %46, %cst_58 {dimension_numbers = #tpu.dot_dimension_numbers<[1], [0], [0], [1], [0, 0, 1, 1], [], []>} : vector<32x128xbf16>, vector<128x512xbf16>, vector<32x512xf32> -> vector<32x512xf32>
    %48 = arith.addf %43, %47 : vector<32x512xf32>
    %c18 = arith.constant 18 : index
    %c0_59 = arith.constant 0 : index
    %49 = vector.load %arg7[%c18, %c0_59] : memref<56x128xbf16, #tpu.memory_space<vmem>>, vector<32x128xbf16>
    %c2_60 = arith.constant 2 : index
    %c2_61 = arith.constant 2 : index
    %c0_62 = arith.constant 0 : index
    %c0_63 = arith.constant 0 : index
    %50 = vector.load %arg4[%c2_60, %c2_61, %c0_62, %c0_63] : memref<3x3x128x512xbf16, #tpu.memory_space<vmem>>, vector<1x1x128x512xbf16>
    %51 = vector.shape_cast %50 : vector<1x1x128x512xbf16> to vector<128x512xbf16>
    %cst_64 = arith.constant dense<0.000000e+00> : vector<32x512xf32>
    %52 = tpu.matmul %49, %51, %cst_64 {dimension_numbers = #tpu.dot_dimension_numbers<[1], [0], [0], [1], [0, 0, 1, 1], [], []>} : vector<32x128xbf16>, vector<128x512xbf16>, vector<32x512xf32> -> vector<32x512xf32>
    %53 = arith.addf %48, %52 : vector<32x512xf32>
    %c0_65 = arith.constant 0 : index
    %c0_66 = arith.constant 0 : index
    %54 = vector.load %arg5[%c0_65, %c0_66] : memref<1x512xf32, #tpu.memory_space<vmem>>, vector<1x512xf32>
    %55 = vector.broadcast %54 : vector<1x512xf32> to vector<32x512xf32>
    %56 = arith.addf %53, %55 : vector<32x512xf32>
    %57 = vector.shape_cast %56 : vector<32x512xf32> to vector<4x8x512xf32>
    %58 = vector.extract_strided_slice %57 {offsets = [0, 0, 0], sizes = [4, 4, 512], strides = [1, 1, 1]} : vector<4x8x512xf32> to vector<4x4x512xf32>
    %59 = arith.truncf %58 : vector<4x4x512xf32> to vector<4x4x512xbf16>
    %c0_67 = arith.constant 0 : index
    %c0_68 = arith.constant 0 : index
    %c0_69 = arith.constant 0 : index
    %c0_70 = arith.constant 0 : index
    %60 = vector.load %arg6[%c0_67, %c0_68, %c0_69, %c0_70] : memref<1x4x4x512xbf16, #tpu.memory_space<vmem>>, vector<1x4x4x512xbf16>
    %61 = vector.shape_cast %60 : vector<1x4x4x512xbf16> to vector<4x4x512xbf16>
    %62 = vector.shape_cast %59 : vector<4x4x512xbf16> to vector<1x4x4x512xbf16>
    tpu.vector_store %arg6[%c0_67, %c0_68, %c0_69, %c0_70], %62 {strides = array<i32>} : memref<1x4x4x512xbf16, #tpu.memory_space<vmem>>, vector<1x4x4x512xbf16>,
    return
  }
  func.func @transform_0(%arg0: i32, %arg1: i32) -> (i32, i32, i32) {
    %c0_i32 = arith.constant 0 : i32
    %c0_i32_0 = arith.constant 0 : i32
    return %arg0, %arg1, %c0_i32 : i32, i32, i32
  }
  func.func @transform_1(%arg0: i32, %arg1: i32) -> (i32, i32, i32) {
    %c1_i32 = arith.constant 1 : i32
    %0 = arith.addi %arg1, %c1_i32 : i32
    %c2_i32 = arith.constant 2 : i32
    %1 = arith.muli %0, %c2_i32 : i32
    %c0_i32 = arith.constant 0 : i32
    %c0_i32_0 = arith.constant 0 : i32
    return %arg0, %1, %c0_i32 : i32, i32, i32
  }
  func.func @transform_2(%arg0: i32, %arg1: i32) -> (i32, i32, i32, i32) {
    %c0_i32 = arith.constant 0 : i32
    %c0_i32_0 = arith.constant 0 : i32
    %c0_i32_1 = arith.constant 0 : i32
    %c0_i32_2 = arith.constant 0 : i32
    %c0_i32_3 = arith.constant 0 : i32
    return %c0_i32, %c0_i32_0, %c0_i32_1, %c0_i32_2 : i32, i32, i32, i32
  }
  func.func @transform_3(%arg0: i32, %arg1: i32) -> (i32, i32) {
    %c0_i32 = arith.constant 0 : i32
    %c0_i32_0 = arith.constant 0 : i32
    %c0_i32_1 = arith.constant 0 : i32
    return %c0_i32, %c0_i32_0 : i32, i32
  }
  func.func @transform_4(%arg0: i32, %arg1: i32) -> (i32, i32, i32, i32) {
    %c0_i32 = arith.constant 0 : i32
    %c0_i32_0 = arith.constant 0 : i32
    %c0_i32_1 = arith.constant 0 : i32
    return %arg0, %arg1, %c0_i32, %c0_i32_0 : i32, i32, i32, i32
  }
}

</mosaic_0001>

<bundles_post_ra>
// kernel: tpu_custom_call.1
= control target key start
LH: loop header
LB: loop body
LE: loop exit
PB: predicated region body
PF: predicated region fallthrough
CT: control target
= control target key end

     0   :  { %s5715_s0 = inlined_call_operand.hbm [shape: bf16[2,48,128], index: 0, kind: input, shape index: {}]   ;;  %s5716_s1 = inlined_call_operand.hbm [shape: bf16[2,48,128], index: 1, kind: input, shape index: {}]   ;;  %s5717_s2 = inlined_call_operand.hbm [shape: bf16[3,3,128,512], index: 2, kind: input, shape index: {}]   ;;  %s5718_s3 = inlined_call_operand.hbm [shape: f32[1,512], index: 3, kind: input, shape index: {}]   ;;  %s5719_s4 = inlined_call_operand.hbm [shape: bf16[2,4,4,512], index: 4, kind: output, shape index: {}]  }
   0x1   :  { %5722 = sst [smem:[#allocation19_spill]] %s5715_s0 }
   0x2   :  { %5723 = sst [smem:[#allocation20_spill]] %s5717_s2 }
   0x3   :  { %5724 = sst [smem:[#allocation21_spill]] %s5718_s3 }
   0x4   :  { %9 = vsyncpa [#allocation4], 0 }
   0x5   :  { %11 = vsyncpa [#allocation4 + $0x1], 0 }
   0x6   :  { %12 = vsyncpa [#allocation7], 0 }
   0x7   :  { %14 = vsyncpa [#allocation7 + $0x1], 0 }
   0x8   :  { %15 = vsyncpa [#allocation10], 0 }
   0x9   :  { %16 = vsyncpa [#allocation5], 0 }
   0xa   :  { %18 = vsyncpa [#allocation5 + $0x1], 0  ;;  %s5139_s15 = smov 0   ;;  %s5141_s16 = smov 0  }
   0xb   :  { %s5143_s17 = smov 0   ;;  %s5145_s18 = smov 0  }
   0xc   :  { %s5147_s19 = smov 0   ;;  %s5149_s20 = smov 0  }
   0xd LB: > { %5725 = sst [smem:[#allocation17_spill]] %s5099_s19  ;;  %s5170_s21 = sadd.s32 4294967295, %s5103_s20   ;;  %s5103_s20 = sphi %s5149_s20, %s24_s20   ;;  %s5099_s19 = sphi %s5147_s19, %s5737_s19   ;;  %s5095_s18 = sphi %s5145_s18, %s5736_s18   ;;  %s5091_s17 = sphi %s5143_s17, %s5740_s17   ;;  %s5087_s16 = sphi %s5141_s16, %s5739_s16   ;;  %s5083_s15 = sphi %s5139_s15, %s5738_s15  }
   0xe   : > { %s3298_s22 = sadd.s32 4294967294, %s5103_s20   ;;  %p58_p0 = scmp.ne.s32.totalorder %s5087_s16, %s5083_s15 }
   0xf   : > { %p59_p1 = scmp.eq.s32.totalorder %s5170_s21, 0  ;;  %p158_p2 = scmp.eq.s32.totalorder %s5170_s21, 1 }
  0x10   : > { %p164_p3 = scmp.eq.s32.totalorder %s3298_s22, 1  ;;  %p3299_p5 = scmp.ge.s32.totalorder %s5103_s20, 1 }
  0x11   : > { %p5179_p4 = por %p59_p1, %p58_p0  ;;  %p171_p7 = scmp.lt.s32.totalorder %s5103_s20, 3 }
  0x12   : > { %p5184_p6 = por %p164_p3, %p58_p0  ;;  %s5728_s2 = sld [smem:[#allocation20_spill]] }
  0x13   : > { %p5192_p8 = pnand %p3299_p5, %p171_p7  ;;  %s5105_s29 = smov [#allocation8]  }
  0x14   : > { %s184_s30 = sshll.u32 %s5105_s29, 4  ;;  %p3302_p11 = scmp.ge.s32.totalorder %s5103_s20, 2  ;;  %s185_s30 = int_to_ptr.vmem [resolvable:$true] %s184_s30 }
  0x15   : > { %p4808_p9 = pneg %p5192_p8  ;;  %s5730_s3 = sld [smem:[#allocation21_spill]] }
  0x16   : > { %s5106_s8 = smov 256   ;;  %s5107_s9 = smov 16  }
  0x17   : > { %p4809_p10 = pnand %p4808_p9, %p59_p1  ;;  %s5108_s10 = smov [#allocation9]  }
  0x18   : > { %s182_s27 = sshll.u32 %s5728_s2, 4  ;;  %s199_s11 = sshll.u32 %s5108_s10, 4  ;;  %s183_s27 = int_to_ptr.hbm [resolvable:$true] %s182_s27  ;;  %s200_s11 = int_to_ptr.vmem [resolvable:$true] %s199_s11 }
  0x19   : > { %4811 = dma.hbm_to_vmem [thread:$0]  (!%p4809_p10), %s183_s27, 36864, %s185_s30, [#allocation7], %s5106_s8, %s5106_s8, %s5107_s9  }
  0x1a   : > { %s36_s12 = sadd.s32 1, %s5099_s19  ;;  %s45_s13 = sadd.s32 1, %s5091_s17 }
  0x1b   : > { %s197_s7 = sshll.u32 %s5730_s3, 4  ;;  %p38_p12 = scmp.ge.s32.totalorder %s36_s12, 2  ;;  %s198_s7 = int_to_ptr.hbm [resolvable:$true] %s197_s7 }
  0x1c   : > { %4814 = dma.hbm_to_vmem [thread:$0]  (!%p4809_p10), %s198_s7, 64, %s200_s11, [#allocation10]  }
  0x1d   : > { %p52_p13 = scmp.ne.s32.totalorder %s5091_s17, %s5087_s16  ;;  %p53_p0 = scmp.eq.s32.totalorder %s5103_s20, 0 }
  0x1e   : > { %p4828_p3 = scmp.lt.s32.totalorder %s5103_s20, 2  ;;  %s5742_s12 = smov (%p38_p12, %s36_s12), 0 }
  0x1f   : > { %5731 = sst [smem:[#allocation18_spill]] %s5742_s12  ;;  %p5212_p5 = por %p53_p0, %p52_p13 }
  0x20   : > { %p5218_p7 = por %p158_p2, %p52_p13  ;;  %s40_s25 = ssub.s32 %s5099_s19, %s5742_s12 }
  0x21   : > { %s210_s26 = sand.u32 1, %s5091_s17   ;;  %p43_p9 = scmp.eq.s32.totalorder %s40_s25, 0 }
  0x22   : > { %s3303_s27 = sshll.u32 %s210_s26, 4  ;;  %s4793_s29 = smul.u32 24, %s5099_s19 }
  0x23   : > { %s5227_s30 = scalar_select %p43_p9, %s5091_s17, %s45_s13  }
  0x24   : > { %s5734_s0 = sld [smem:[#allocation19_spill]]  ;;  %s214_s9 = scalar_lea.vmem [#allocation3], %s3303_s27 }
  0x25   : > { %s231_s10 = sshll.u32 %s214_s9, 4  ;;  %p5236_p2 = pnand %p4828_p3, %p5212_p5  ;;  %s232_s10 = int_to_ptr.vmem [resolvable:$true] %s231_s10 }
  0x26   : > { %s241_s25 = sand.u32 1, %s5103_s20   ;;  %s211_s13 = scalar_lea.sflag [#allocation4], %s210_s26 }
  0x27   : > { %s5109_s2 = smov 64   ;;  %s5110_s3 = smov 4  }
  0x28   : > { %s3305_s5 = sshll.u32 %s210_s26, 3  ;;  %s242_s19 = scalar_lea.sflag [#allocation7], %s241_s25 }
  0x2a   : > { %s227_s7 = scalar_lea.hbm %s5734_s0, %s4793_s29  ;;  %s245_s0 = scalar_lea.vmem [#allocation6], %s3305_s5 }
  0x2b   : > { %s229_s8 = sshll.u32 %s227_s7, 4  ;;  %s3210_s7 = scalar_lea.hbm %s5716_s1, %s4793_s29  ;;  %s230_s8 = int_to_ptr.hbm [resolvable:$true] %s229_s8 }
  0x2c   : > { %4818 = dma.hbm_to_vmem [thread:$0]  (!%p5236_p2), %s230_s8, 256, %s232_s10, %s211_s13, %s5109_s2, %s5109_s2, %s5110_s3  }
  0x2d   : > { %s3211_s9 = scalar_lea.hbm %s3210_s7, 16  ;;  %s257_s12 = sshll.u32 %s245_s0, 4  ;;  %s258_s12 = int_to_ptr.vmem [resolvable:$true] %s257_s12 }
  0x2e   : > { %s255_s14 = sshll.u32 %s3211_s9, 4  ;;  %269 = sbr.rel (%p5192_p8) target bundleno = 523 (0x20b), region = 36  ;;  %s256_s14 = int_to_ptr.hbm [resolvable:$true] %s255_s14 }
  0x2f   : > { %4821 = dma.hbm_to_vmem [thread:$0]  (!%p5236_p2), %s256_s14, 128, %s258_s12, %s242_s19, %s5109_s2, %s5109_s2, %s5110_s3  }
  0x30   : > { %s5251_s8 = sand.u32 (!%p5192_p8), 1, %s5087_s16  }
  0x31   : > { %s3308_s26 = sshll.u32 (!%p5192_p8), %s5251_s8, 4  ;;  %s272_s29 = scalar_lea.sflag (!%p5192_p8), [#allocation4], %s5251_s8 }
  0x32   : > { %s5255_s10 = scalar_lea.vmem (!%p5192_p8), [#allocation3], %s3308_s26 }
  0x33   : > { %5062 = dma.done.wait (%p5179_p4), %s272_s29, 256  }
  0x34   : > { %5064 = vsyncadd (%p5179_p4), %s272_s29, 4294967040  ;;  %s281_s0 = sand.u32 1, %s5170_s21   ;;  %s3309_s2 = sshll.u32 %s5251_s8, 3 }
  0x35   : > { %s282_s3 = scalar_lea.sflag [#allocation7], %s281_s0  ;;  %s5263_s19 = scalar_lea.vmem [#allocation6], %s3309_s2 }
  0x36   : > { %5066 = dma.done.wait (%p5179_p4), %s282_s3, 128  }
  0x37   : > { %5068 = vsyncadd (%p5179_p4), %s282_s3, 4294967168 }
  0x38   : > { %5070 = dma.done.wait (%p59_p1), [#allocation7], 36864  }
  0x39   : > { %5072 = vsyncadd (%p59_p1), [#allocation7], 4294930432 }
  0x3a   : > { %5074 = dma.done.wait (%p59_p1), [#allocation10], 64  }
  0x3b   : > { %5076 = vsyncadd (%p59_p1), [#allocation10], 4294967232  ;;  %v3427_v0 = vld [vmem:[#allocation8 + $0x1e0] sm:$0xf]  ;;  %v4536_v1 = vld [vmem:[#allocation8 + $0x1ec] sm:$0xf0] }
  0x3c   : > { %v4534_v2 = vld [vmem:[#allocation8 + $0x1e4] sm:$0xf]  ;;  %v3428_v3 = vor.u32 %v4536_v1, %v3427_v0  ;;  %v3429_v4 = vld [vmem:[#allocation8 + $0x1f0] sm:$0xf0]  ;;  %v3435_v5 = vld [vmem:[#allocation8 + $0x1e8] sm:$0xf] }
  0x3d   : > { %v4537_v6 = vld [vmem:[#allocation8 + $0x1f4] sm:$0xf0]  ;;  %v3432_v7 = vor.u32 %v4534_v2, %v3429_v4  ;;  %v4535_v9 = vld [vmem:[#allocation8 + $0x1ec] sm:$0xf]  ;;  %v3437_v10 = vld [vmem:[#allocation8 + $0x1f8] sm:$0xf0] }
  0x3e   : > { %v3436_v8 = vor.u32 %v4537_v6, %v3435_v5  ;;  %v3411_v11 = vld [vmem:[#allocation8 + $0x1c0] sm:$0xf]  ;;  %615 = vmatpush.bf16.msra.mxu0 %v3428_v3  ;;  %v3440_v12 = vor.u32 %v4535_v9, %v3437_v10  ;;  %v4532_v13 = vld [vmem:[#allocation8 + $0x1cc] sm:$0xf0]  ;;  %v4530_v14 = vld [vmem:[#allocation8 + $0x1c4] sm:$0xf] }
  0x3f   : > { %v3413_v15 = vld [vmem:[#allocation8 + $0x1d0] sm:$0xf0]  ;;  %634 = vmatpush.bf16.msra.mxu1 %v3432_v7  ;;  %v3412_v16 = vor.u32 %v4532_v13, %v3411_v11  ;;  %v3419_v18 = vld [vmem:[#allocation8 + $0x1c8] sm:$0xf]  ;;  %v4533_v19 = vld [vmem:[#allocation8 + $0x1d4] sm:$0xf0] }
  0x40   : > { %653 = vmatpush.bf16.msra.mxu2 %v3436_v8  ;;  %v3416_v17 = vor.u32 %v4530_v14, %v3413_v15  ;;  %v4531_v20 = vld [vmem:[#allocation8 + $0x1cc] sm:$0xf]  ;;  %672 = vmatpush.bf16.msra.mxu3 %v3440_v12  ;;  %v3420_v21 = vor.u32 %v4533_v19, %v3419_v18  ;;  %v3421_v22 = vld [vmem:[#allocation8 + $0x1d8] sm:$0xf0]  ;;  %v3395_v23 = vld [vmem:[#allocation8 + $0x1a0] sm:$0xf] }
  0x41   : > { %v4528_v24 = vld [vmem:[#allocation8 + $0x1ac] sm:$0xf0]  ;;  %v3424_v25 = vor.u32 %v4531_v20, %v3421_v22  ;;  %v4526_v26 = vld [vmem:[#allocation8 + $0x1a4] sm:$0xf]  ;;  %v3397_v27 = vld [vmem:[#allocation8 + $0x1b0] sm:$0xf0] }
  0x42   : > { %v3403_v28 = vld [vmem:[#allocation8 + $0x1a8] sm:$0xf]  ;;  %616 = vmatpush.bf16.msra.mxu0 %v3412_v16  ;;  %v3396_v29 = vor.u32 %v4528_v24, %v3395_v23  ;;  %v4529_v30 = vld [vmem:[#allocation8 + $0x1b4] sm:$0xf0]  ;;  %v4527_v31 = vld [vmem:[#allocation8 + $0x1ac] sm:$0xf]  ;;  %v3400_v33 = vor.u32 %v4526_v26, %v3397_v27 }
  0x43   : > { %v3405_v32 = vld [vmem:[#allocation8 + $0x1b8] sm:$0xf0]  ;;  %635 = vmatpush.bf16.msra.mxu1 %v3416_v17  ;;  %v3404_v34 = vor.u32 %v4529_v30, %v3403_v28  ;;  %v3379_v35 = vld [vmem:[#allocation8 + $0x180] sm:$0xf]  ;;  %v4524_v36 = vld [vmem:[#allocation8 + $0x18c] sm:$0xf0] }
  0x44   : > { %654 = vmatpush.bf16.msra.mxu2 %v3420_v21  ;;  %v4522_v37 = vld [vmem:[#allocation8 + $0x184] sm:$0xf]  ;;  %673 = vmatpush.bf16.msra.mxu3 %v3424_v25  ;;  %v3408_v38 = vor.u32 %v4527_v31, %v3405_v32  ;;  %v3381_v39 = vld [vmem:[#allocation8 + $0x190] sm:$0xf0]  ;;  %v3387_v40 = vld [vmem:[#allocation8 + $0x188] sm:$0xf]  ;;  %v3380_v44 = vor.u32 %v4524_v36, %v3379_v35 }
  0x45   : > { %v4525_v41 = vld [vmem:[#allocation8 + $0x194] sm:$0xf0]  ;;  %v4523_v42 = vld [vmem:[#allocation8 + $0x18c] sm:$0xf]  ;;  %v3389_v43 = vld [vmem:[#allocation8 + $0x198] sm:$0xf0]  ;;  %v3384_v45 = vor.u32 %v4522_v37, %v3381_v39 }
  0x46   : > { %617 = vmatpush.bf16.msra.mxu0 %v3396_v29  ;;  %v3388_v46 = vor.u32 %v4525_v41, %v3387_v40  ;;  %v3363_v47 = vld [vmem:[#allocation8 + $0x160] sm:$0xf]  ;;  %v4520_v48 = vld [vmem:[#allocation8 + $0x16c] sm:$0xf0]  ;;  %v4518_v49 = vld [vmem:[#allocation8 + $0x164] sm:$0xf]  ;;  %v3392_v50 = vor.u32 %v4523_v42, %v3389_v43 }
  0x47   : > { %636 = vmatpush.bf16.msra.mxu1 %v3400_v33  ;;  %v3365_v51 = vld [vmem:[#allocation8 + $0x170] sm:$0xf0]  ;;  %v3371_v52 = vld [vmem:[#allocation8 + $0x168] sm:$0xf]  ;;  %v4521_v53 = vld [vmem:[#allocation8 + $0x174] sm:$0xf0]  ;;  %v3364_v56 = vor.u32 %v4520_v48, %v3363_v47 }
  0x48   : > { %655 = vmatpush.bf16.msra.mxu2 %v3404_v34  ;;  %674 = vmatpush.bf16.msra.mxu3 %v3408_v38  ;;  %v4519_v54 = vld [vmem:[#allocation8 + $0x16c] sm:$0xf]  ;;  %v3373_v55 = vld [vmem:[#allocation8 + $0x178] sm:$0xf0]  ;;  %v3368_v57 = vor.u32 %v4518_v49, %v3365_v51  ;;  %v3372_v58 = vor.u32 %v4521_v53, %v3371_v52  ;;  %v3347_v59 = vld [vmem:[#allocation8 + $0x140] sm:$0xf] }
  0x49   : > { %v4516_v60 = vld [vmem:[#allocation8 + $0x14c] sm:$0xf0]  ;;  %v4514_v61 = vld [vmem:[#allocation8 + $0x144] sm:$0xf]  ;;  %v3376_v62 = vor.u32 %v4519_v54, %v3373_v55  ;;  %v3349_v63 = vld [vmem:[#allocation8 + $0x150] sm:$0xf0] }
  0x4a   : > { %618 = vmatpush.bf16.msra.mxu0 %v3380_v44  ;;  %v3355_v0 = vld [vmem:[#allocation8 + $0x148] sm:$0xf]  ;;  %v4517_v1 = vld [vmem:[#allocation8 + $0x154] sm:$0xf0]  ;;  %v4515_v2 = vld [vmem:[#allocation8 + $0x14c] sm:$0xf]  ;;  %v3348_v4 = vor.u32 %v4516_v60, %v3347_v59  ;;  %v3352_v7 = vor.u32 %v4514_v61, %v3349_v63 }
  0x4b   : > { %637 = vmatpush.bf16.msra.mxu1 %v3384_v45  ;;  %v3357_v3 = vld [vmem:[#allocation8 + $0x158] sm:$0xf0]  ;;  %v3331_v5 = vld [vmem:[#allocation8 + $0x120] sm:$0xf]  ;;  %v4512_v6 = vld [vmem:[#allocation8 + $0x12c] sm:$0xf0]  ;;  %v3356_v8 = vor.u32 %v4517_v1, %v3355_v0 }
  0x4c   : > { %656 = vmatpush.bf16.msra.mxu2 %v3388_v46  ;;  %675 = vmatpush.bf16.msra.mxu3 %v3392_v50  ;;  %v4510_v9 = vld [vmem:[#allocation8 + $0x124] sm:$0xf]  ;;  %v3333_v10 = vld [vmem:[#allocation8 + $0x130] sm:$0xf0]  ;;  %v3339_v11 = vld [vmem:[#allocation8 + $0x128] sm:$0xf]  ;;  %v3360_v12 = vor.u32 %v4515_v2, %v3357_v3  ;;  %v3332_v18 = vor.u32 %v4512_v6, %v3331_v5 }
  0x4d   : > { %v4513_v13 = vld [vmem:[#allocation8 + $0x134] sm:$0xf0]  ;;  %v336_v14 = vld [vmem:[%s5255_s10] sm:$0xff]   ;;  %v4511_v16 = vld [vmem:[#allocation8 + $0x12c] sm:$0xf]  ;;  %v3336_v21 = vor.u32 %v4510_v9, %v3333_v10  ;;  %vm966_vm1 = vcmask 1046528  }
  0x4e   : > { %619 = vmatpush.bf16.msra.mxu0 %v3364_v56  ;;  %v338_v15 = vld [vmem:[%s5255_s10 + $0x8] sm:$0xff]   ;;  %340 = vst [vmem:[#allocation2] sm:$0xff] %v336_v14   ;;  %v3315_v19 = vld [vmem:[#allocation8 + $0x100] sm:$0xf]  ;;  %v4508_v20 = vld [vmem:[#allocation8 + $0x10c] sm:$0xf0]  ;;  %v3340_v22 = vor.u32 %v4513_v13, %v3339_v11 }
  0x4f   : > { %638 = vmatpush.bf16.msra.mxu1 %v3368_v57  ;;  %v3341_v17 = vld [vmem:[#allocation8 + $0x138] sm:$0xf0]  ;;  %342 = vst [vmem:[#allocation2 + $0x8] sm:$0xff] %v338_v15   ;;  %v4506_v23 = vld [vmem:[#allocation8 + $0x104] sm:$0xf]  ;;  %v3316_v33 = vor.u32 %v4508_v20, %v3315_v19  ;;  %s3312_s21 = sshll.u32 %s5251_s8, 5 }
  0x50   : > { %657 = vmatpush.bf16.msra.mxu2 %v3372_v58  ;;  %676 = vmatpush.bf16.msra.mxu3 %v3376_v62  ;;  %v3317_v24 = vld [vmem:[#allocation8 + $0x110] sm:$0xf0]  ;;  %v3323_v25 = vld [vmem:[#allocation8 + $0x108] sm:$0xf]  ;;  %v3344_v26 = vor.u32 %v4511_v16, %v3341_v17  ;;  %v4509_v27 = vld [vmem:[#allocation8 + $0x114] sm:$0xf0] }
  0x51   : > { %v4507_v28 = vld [vmem:[#allocation8 + $0x10c] sm:$0xf]  ;;  %v3325_v29 = vld [vmem:[#allocation8 + $0x118] sm:$0xf0]  ;;  %v3563_v30 = vld [vmem:[#allocation8 + $0xe8] sm:$0xf]  ;;  %v3320_v37 = vor.u32 %v4506_v23, %v3317_v24  ;;  %v3324_v38 = vor.u32 %v4509_v27, %v3323_v25 }
  0x52   : > { %620 = vmatpush.bf16.msra.mxu0 %v3348_v4  ;;  %v4505_v31 = vld [vmem:[#allocation8 + $0xf4] sm:$0xf0]  ;;  %v4503_v32 = vld [vmem:[#allocation8 + $0xec] sm:$0xf]  ;;  %v3565_v34 = vld [vmem:[#allocation8 + $0xf8] sm:$0xf0]  ;;  %v3328_v41 = vor.u32 %v4507_v28, %v3325_v29 }
  0x53   : > { %639 = vmatpush.bf16.msra.mxu1 %v3352_v7  ;;  %v3555_v35 = vld [vmem:[#allocation8 + $0xe0] sm:$0xf]  ;;  %v4504_v36 = vld [vmem:[#allocation8 + $0xec] sm:$0xf0]  ;;  %v4502_v39 = vld [vmem:[#allocation8 + $0xe4] sm:$0xf]  ;;  %v3564_v43 = vor.u32 %v4505_v31, %v3563_v30  ;;  %v3568_v47 = vor.u32 %v4503_v32, %v3565_v34 }
  0x54   : > { %658 = vmatpush.bf16.msra.mxu2 %v3356_v8  ;;  %677 = vmatpush.bf16.msra.mxu3 %v3360_v12  ;;  %v3557_v40 = vld [vmem:[#allocation8 + $0xf0] sm:$0xf0]  ;;  %vm432_vm0 = vsmask.f32 7424  ;;  %v3556_v48 = vor.u32 %v4504_v36, %v3555_v35  ;;  %v3547_v49 = vld [vmem:[#allocation8 + $0xc8] sm:$0xf] }
  0x55   : > { %v5279_v42 = vld [vmem:[#allocation2] sm:$0xff]   ;;  %v3560_v52 = vor.u32 %v4502_v39, %v3557_v40  ;;  %v4499_v53 = vld [vmem:[#allocation8 + $0xcc] sm:$0xf]  ;;  %v3549_v54 = vld [vmem:[#allocation8 + $0xd8] sm:$0xf0]  ;;  %vm3106_vm2 = vcmask 1041408  }
  0x56   : > { %621 = vmatpush.bf16.msra.mxu0 %v3332_v18  ;;  %v5281_v44 = vld [vmem:[#allocation2 + $0x8] sm:$0xff]   ;;  %v434_v45 = vshrl.u32 %v5279_v42, 16  ;;  %v436_v46 = vshll.u32 %v5279_v42, 16  ;;  %v4501_v50 = vld [vmem:[#allocation8 + $0xd4] sm:$0xf0]  ;;  %v3552_v0 = vor.u32 %v4499_v53, %v3549_v54  ;;  %vm3110_vm3 = vcmask 1045508  }
  0x57   : > { %640 = vmatpush.bf16.msra.mxu1 %v3336_v21  ;;  %v441_v51 = vshll.u32 %v5281_v44, 16  ;;  %v3539_v56 = vld [vmem:[#allocation8 + $0xc0] sm:$0xf]  ;;  %v4500_v57 = vld [vmem:[#allocation8 + $0xcc] sm:$0xf0]  ;;  %v3548_v63 = vor.u32 %v4501_v50, %v3547_v49  ;;  %v445_v24 = vshrl.u32 %v5281_v44, 16 }
  0x58   : > { %659 = vmatpush.bf16.msra.mxu2 %v3340_v22  ;;  %678 = vmatpush.bf16.msra.mxu3 %v3344_v26  ;;  %v438_v55 = vrot.slane %v436_v46, 1  ;;  %v4498_v59 = vld [vmem:[#allocation8 + $0xc4] sm:$0xf]  ;;  %v3541_v60 = vld [vmem:[#allocation8 + $0xd0] sm:$0xf0]  ;;  %v3540_v5 = vor.u32 %v4500_v57, %v3539_v56  ;;  %vm3114_vm4 = vcmask 1043456  }
  0x59   : > { %v5286_v58 = vrot.slane %v441_v51, 1  ;;  %v3531_v62 = vld [vmem:[#allocation8 + $0xa8] sm:$0xf]  ;;  %v4497_v1 = vld [vmem:[#allocation8 + $0xb4] sm:$0xf0]  ;;  %v3544_v6 = vor.u32 %v4498_v59, %v3541_v60  ;;  %s5633_s23 = scalar_lea.vmem [#allocation11], %s3312_s21 }
  0x5a   : > { %622 = vmatpush.bf16.msra.mxu0 %v3316_v33  ;;  %v439_v61 = vor.u32 %v438_v55, %v434_v45  ;;  %v4495_v2 = vld [vmem:[#allocation8 + $0xac] sm:$0xf]  ;;  %v344_v3 = vld [vmem:[%s5263_s19] sm:$0xf]  ;;  %v3533_v7 = vld [vmem:[#allocation8 + $0xb8] sm:$0xf0]  ;;  %v3532_v12 = vor.u32 %v4497_v1, %v3531_v62 }
  0x5b   : > { %641 = vmatpush.bf16.msra.mxu1 %v3320_v37  ;;  %v3523_v8 = vld [vmem:[#allocation8 + $0xa0] sm:$0xf]  ;;  %346 = vst [vmem:[#allocation2 + $0x10] sm:$0xf] %v344_v3  ;;  %v4496_v9 = vld [vmem:[#allocation8 + $0xac] sm:$0xf0]  ;;  %v3536_v13 = vor.u32 %v4495_v2, %v3533_v7 }
  0x5c   : > { %660 = vmatpush.bf16.msra.mxu2 %v3324_v38  ;;  %679 = vmatpush.bf16.msra.mxu3 %v3328_v41  ;;  %v444_v4 = vsel %vm432_vm0, %v439_v61, %v5286_v58  ;;  %v4494_v10 = vld [vmem:[#allocation8 + $0xa4] sm:$0xf]  ;;  %v3525_v11 = vld [vmem:[#allocation8 + $0xb0] sm:$0xf0]  ;;  %v3515_v14 = vld [vmem:[#allocation8 + $0x88] sm:$0xf]  ;;  %v3524_v16 = vor.u32 %v4496_v9, %v3523_v8 }
  0x5d   : > { %623 = vmatmul.bf16.vlgmr.msra.gmra.mxu0 %v444_v4  ;;  %v4493_v15 = vld [vmem:[#allocation8 + $0x94] sm:$0xf0]  ;;  %v3528_v17 = vor.u32 %v4494_v10, %v3525_v11  ;;  %v4491_v18 = vld [vmem:[#allocation8 + $0x8c] sm:$0xf]  ;;  %v3517_v19 = vld [vmem:[#allocation8 + $0x98] sm:$0xf0] }
  0x5e   : > { %853 = vmatpush.bf16.msrb.mxu0 %v3556_v48  ;;  %642 = vmatmul.bf16.vlgmr.msra.gmra.mxu1 %v444_v4  ;;  %v3507_v20 = vld [vmem:[#allocation8 + $0x80] sm:$0xf]  ;;  %v4492_v21 = vld [vmem:[#allocation8 + $0x8c] sm:$0xf0]  ;;  %v4490_v22 = vld [vmem:[#allocation8 + $0x84] sm:$0xf]  ;;  %v3516_v25 = vor.u32 %v4493_v15, %v3515_v14  ;;  %v3520_v26 = vor.u32 %v4491_v18, %v3517_v19 }
  0x5f   : > { %872 = vmatpush.bf16.msrb.mxu1 %v3560_v52  ;;  %661 = vmatmul.bf16.vlgmr.msra.gmra.mxu2 %v444_v4  ;;  %v3509_v23 = vld [vmem:[#allocation8 + $0x90] sm:$0xf0]  ;;  %v3499_v28 = vld [vmem:[#allocation8 + $0x68] sm:$0xf]  ;;  %v4489_v29 = vld [vmem:[#allocation8 + $0x74] sm:$0xf0]  ;;  %v3508_v30 = vor.u32 %v4492_v21, %v3507_v20 }
  0x60   : > { %891 = vmatpush.bf16.msrb.mxu2 %v3564_v43  ;;  %910 = vmatpush.bf16.msrb.mxu3 %v3568_v47  ;;  %v3512_v31 = vor.u32 %v4490_v22, %v3509_v23  ;;  %v4487_v33 = vld [vmem:[#allocation8 + $0x6c] sm:$0xf]  ;;  %v3501_v34 = vld [vmem:[#allocation8 + $0x78] sm:$0xf0]  ;;  %v3491_v35 = vld [vmem:[#allocation8 + $0x60] sm:$0xf]  ;;  %v3500_v40 = vor.u32 %v4489_v29, %v3499_v28  ;;  %v447_v47 = vor.u32 %v445_v24, %v5286_v58 }
  0x61   : > { %680 = vmatmul.bf16.vlgmr.msra.gmra.mxu3 %v444_v4  ;;  %v4488_v36 = vld [vmem:[#allocation8 + $0x6c] sm:$0xf0]  ;;  %v4486_v37 = vld [vmem:[#allocation8 + $0x64] sm:$0xf]  ;;  %v3493_v38 = vld [vmem:[#allocation8 + $0x70] sm:$0xf0]  ;;  %v3504_v41 = vor.u32 %v4487_v33, %v3501_v34 }
  0x62   : > { %854 = vmatpush.bf16.msrb.mxu0 %v3540_v5  ;;  %v385_v27 = vld [vmem:[#allocation2 + $0x10] sm:$0x1]  ;;  %v3483_v43 = vld [vmem:[#allocation8 + $0x48] sm:$0xf]  ;;  %v4485_v45 = vld [vmem:[#allocation8 + $0x54] sm:$0xf0]  ;;  %v3492_v49 = vor.u32 %v4488_v36, %v3491_v35  ;;  %v3496_v50 = vor.u32 %v4486_v37, %v3493_v38 }
  0x63   : > { %873 = vmatpush.bf16.msrb.mxu1 %v3544_v6  ;;  %v428_v32 = vunpack.c.l.b16 %v385_v27  ;;  %v4483_v46 = vld [vmem:[#allocation8 + $0x4c] sm:$0xf]  ;;  %v3485_v51 = vld [vmem:[#allocation8 + $0x58] sm:$0xf0]  ;;  %v3475_v52 = vld [vmem:[#allocation8 + $0x40] sm:$0xf]  ;;  %v3484_v57 = vor.u32 %v4485_v45, %v3483_v43 }
  0x64   : > { %892 = vmatpush.bf16.msrb.mxu2 %v3548_v63  ;;  %911 = vmatpush.bf16.msrb.mxu3 %v3552_v0  ;;  %v4484_v53 = vld [vmem:[#allocation8 + $0x4c] sm:$0xf0]  ;;  %v4482_v54 = vld [vmem:[#allocation8 + $0x44] sm:$0xf]  ;;  %v3477_v55 = vld [vmem:[#allocation8 + $0x50] sm:$0xf0]  ;;  %v3488_v59 = vor.u32 %v4483_v46, %v3485_v51 }
  0x65   : > { %v5292_v39 = vpack.c.b16 %v428_v32, %v428_v32  ;;  %v3467_v60 = vld [vmem:[#allocation8 + $0x28] sm:$0xf]  ;;  %v4481_v61 = vld [vmem:[#allocation8 + $0x34] sm:$0xf0]  ;;  %v3476_v58 = vor.u32 %v4484_v53, %v3475_v52  ;;  %v3480_v63 = vor.u32 %v4482_v54, %v3477_v55  ;;  %v4479_v0 = vld [vmem:[#allocation8 + $0x2c] sm:$0xf] }
  0x66   : > { %855 = vmatpush.bf16.msrb.mxu0 %v3524_v16  ;;  %v3469_v1 = vld [vmem:[#allocation8 + $0x38] sm:$0xf0]  ;;  %v3459_v2 = vld [vmem:[#allocation8 + $0x20] sm:$0xf]  ;;  %v4480_v3 = vld [vmem:[#allocation8 + $0x2c] sm:$0xf0]  ;;  %v3468_v7 = vor.u32 %v4481_v61, %v3467_v60 }
  0x67   : > { %874 = vmatpush.bf16.msrb.mxu1 %v3528_v17  ;;  %v449_v48 = vshll.u32 %v5292_v39, 16  ;;  %v4478_v4 = vld [vmem:[#allocation8 + $0x24] sm:$0xf]  ;;  %v3461_v5 = vld [vmem:[#allocation8 + $0x30] sm:$0xf0]  ;;  %v3472_v8 = vor.u32 %v4479_v0, %v3469_v1  ;;  %s4763_s28 = sshll.u32 %s5095_s18, 5 }
  0x68   : > { %893 = vmatpush.bf16.msrb.mxu2 %v3532_v12  ;;  %912 = vmatpush.bf16.msrb.mxu3 %v3536_v13  ;;  %v3451_v6 = vld [vmem:[#allocation8 + $0x8] sm:$0xf]  ;;  %v4477_v9 = vld [vmem:[#allocation8 + $0x14] sm:$0xf0]  ;;  %v4475_v10 = vld [vmem:[#allocation8 + $0xc] sm:$0xf]  ;;  %v3460_v12 = vor.u32 %v4480_v3, %v3459_v2  ;;  %v3464_v13 = vor.u32 %v4478_v4, %v3461_v5  ;;  %s3160_s25 = scalar_lea.hbm %s5719_s4, %s4763_s28 }
  0x69   : > { %v451_v56 = vrot.slane %v449_v48, 1  ;;  %v3453_v11 = vld [vmem:[#allocation8 + $0x18] sm:$0xf0]  ;;  %v3443_v14 = vld [vmem:[#allocation8] sm:$0xf]  ;;  %v3452_v23 = vor.u32 %v4477_v9, %v3451_v6  ;;  %s3161_s18 = sshll.u32 %s5633_s23, 4  ;;  %s3162_s18 = int_to_ptr.vmem [resolvable:$true] %s3161_s18 }
  0x6a   : > { %856 = vmatpush.bf16.msrb.mxu0 %v3508_v30  ;;  %v4476_v15 = vld [vmem:[#allocation8 + $0xc] sm:$0xf0]  ;;  %v4474_v16 = vld [vmem:[#allocation8 + $0x4] sm:$0xf]  ;;  %v3445_v17 = vld [vmem:[#allocation8 + $0x10] sm:$0xf0]  ;;  %v3456_v24 = vor.u32 %v4475_v10, %v3453_v11 }
  0x6b   : > { %875 = vmatpush.bf16.msrb.mxu1 %v3512_v31  ;;  %v452_v62 = vsel %vm432_vm0, %v447_v47, %v451_v56  ;;  %v3691_v18 = vld [vmem:[#allocation8 + $0x2e8] sm:$0xf]  ;;  %v4569_v19 = vld [vmem:[#allocation8 + $0x2f4] sm:$0xf0]  ;;  %v4567_v20 = vld [vmem:[#allocation8 + $0x2ec] sm:$0xf]  ;;  %v3444_v28 = vor.u32 %v4476_v15, %v3443_v14  ;;  %v3448_v29 = vor.u32 %v4474_v16, %v3445_v17 }
  0x6c   : > { %894 = vmatpush.bf16.msrb.mxu2 %v3516_v25  ;;  %913 = vmatpush.bf16.msrb.mxu3 %v3520_v26  ;;  %v3693_v21 = vld [vmem:[#allocation8 + $0x2f8] sm:$0xf0]  ;;  %v3683_v22 = vld [vmem:[#allocation8 + $0x2e0] sm:$0xf]  ;;  %v4568_v25 = vld [vmem:[#allocation8 + $0x2ec] sm:$0xf0]  ;;  %v3692_v30 = vor.u32 %v4569_v19, %v3691_v18 }
  0x6d   : > { %628 = vmatmul.bf16.gmra.mxu0 %v452_v62  ;;  %v4566_v26 = vld [vmem:[#allocation8 + $0x2e4] sm:$0xf]  ;;  %v3685_v27 = vld [vmem:[#allocation8 + $0x2f0] sm:$0xf0]  ;;  %v3696_v31 = vor.u32 %v4567_v20, %v3693_v21  ;;  %v3684_v32 = vor.u32 %v4568_v25, %v3683_v22  ;;  %v3675_v34 = vld [vmem:[#allocation8 + $0x2c8] sm:$0xf] }
  0x6e   : > { %857 = vmatpush.bf16.msrb.mxu0 %v3492_v49  ;;  %647 = vmatmul.bf16.gmra.mxu1 %v452_v62  ;;  %v3688_v33 = vor.u32 %v4566_v26, %v3685_v27  ;;  %v4565_v35 = vld [vmem:[#allocation8 + $0x2d4] sm:$0xf0]  ;;  %v4563_v36 = vld [vmem:[#allocation8 + $0x2cc] sm:$0xf]  ;;  %v3677_v37 = vld [vmem:[#allocation8 + $0x2d8] sm:$0xf0] }
  0x6f   : > { %876 = vmatpush.bf16.msrb.mxu1 %v3496_v50  ;;  %666 = vmatmul.bf16.gmra.mxu2 %v452_v62  ;;  %v3667_v38 = vld [vmem:[#allocation8 + $0x2c0] sm:$0xf]  ;;  %v3669_v43 = vld [vmem:[#allocation8 + $0x2d0] sm:$0xf0]  ;;  %v3676_v45 = vor.u32 %v4565_v35, %v3675_v34  ;;  %v3680_v46 = vor.u32 %v4563_v36, %v3677_v37  ;;  %v3659_v47 = vld [vmem:[#allocation8 + $0x2a8] sm:$0xf] }
  0x70   : > { %895 = vmatpush.bf16.msrb.mxu2 %v3500_v40  ;;  %914 = vmatpush.bf16.msrb.mxu3 %v3504_v41  ;;  %v4564_v40 = vld [vmem:[#allocation8 + $0x2cc] sm:$0xf0]  ;;  %v4562_v41 = vld [vmem:[#allocation8 + $0x2c4] sm:$0xf]  ;;  %v4561_v48 = vld [vmem:[#allocation8 + $0x2b4] sm:$0xf0] }
  0x71   : > { %685 = vmatmul.bf16.gmra.mxu3 %v452_v62  ;;  %v3668_v49 = vor.u32 %v4564_v40, %v3667_v38  ;;  %v3672_v50 = vor.u32 %v4562_v41, %v3669_v43  ;;  %v4559_v51 = vld [vmem:[#allocation8 + $0x2ac] sm:$0xf]  ;;  %v3661_v52 = vld [vmem:[#allocation8 + $0x2b8] sm:$0xf0]  ;;  %v3651_v53 = vld [vmem:[#allocation8 + $0x2a0] sm:$0xf] }
  0x72   : > { %858 = vmatpush.bf16.msrb.mxu0 %v3476_v58  ;;  %v4560_v54 = vld [vmem:[#allocation8 + $0x2ac] sm:$0xf0]  ;;  %v4558_v55 = vld [vmem:[#allocation8 + $0x2a4] sm:$0xf]  ;;  %v3653_v56 = vld [vmem:[#allocation8 + $0x2b0] sm:$0xf0] }
  0x73   : > { %877 = vmatpush.bf16.msrb.mxu1 %v3480_v63  ;;  %v3643_v60 = vld [vmem:[#allocation8 + $0x288] sm:$0xf]  ;;  %v4557_v61 = vld [vmem:[#allocation8 + $0x294] sm:$0xf0]  ;;  %v3652_v62 = vor.u32 %v4560_v54, %v3651_v53  ;;  %v3656_v58 = vor.u32 %v4558_v55, %v3653_v56  ;;  %v4555_v63 = vld [vmem:[#allocation8 + $0x28c] sm:$0xf] }
  0x74   : > { %896 = vmatpush.bf16.msrb.mxu2 %v3484_v57  ;;  %915 = vmatpush.bf16.msrb.mxu3 %v3488_v59  ;;  %v3660_v57 = vor.u32 %v4561_v48, %v3659_v47  ;;  %v3664_v59 = vor.u32 %v4559_v51, %v3661_v52  ;;  %v3645_v0 = vld [vmem:[#allocation8 + $0x298] sm:$0xf0]  ;;  %v3635_v1 = vld [vmem:[#allocation8 + $0x280] sm:$0xf]  ;;  %v4556_v2 = vld [vmem:[#allocation8 + $0x28c] sm:$0xf0]  ;;  %v3644_v5 = vor.u32 %v4557_v61, %v3643_v60 }
  0x75   : > { %v4554_v3 = vld [vmem:[#allocation8 + $0x284] sm:$0xf]  ;;  %v3637_v4 = vld [vmem:[#allocation8 + $0x290] sm:$0xf0]  ;;  %v3648_v6 = vor.u32 %v4555_v63, %v3645_v0  ;;  %v3636_v9 = vor.u32 %v4556_v2, %v3635_v1  ;;  %v4551_v11 = vld [vmem:[#allocation8 + $0x26c] sm:$0xf] }
  0x76   : > { %859 = vmatpush.bf16.msrb.mxu0 %v3460_v12  ;;  %v3640_v10 = vor.u32 %v4554_v3, %v3637_v4  ;;  %v3629_v12 = vld [vmem:[#allocation8 + $0x278] sm:$0xf0]  ;;  %v4552_v14 = vld [vmem:[#allocation8 + $0x26c] sm:$0xf0]  ;;  %v4550_v15 = vld [vmem:[#allocation8 + $0x264] sm:$0xf] }
  0x77   : > { %878 = vmatpush.bf16.msrb.mxu1 %v3464_v13  ;;  %v3619_v13 = vld [vmem:[#allocation8 + $0x260] sm:$0xf]  ;;  %v3621_v16 = vld [vmem:[#allocation8 + $0x270] sm:$0xf0]  ;;  %v3632_v18 = vor.u32 %v4551_v11, %v3629_v12  ;;  %v3611_v19 = vld [vmem:[#allocation8 + $0x248] sm:$0xf] }
  0x78   : > { %897 = vmatpush.bf16.msrb.mxu2 %v3468_v7  ;;  %916 = vmatpush.bf16.msrb.mxu3 %v3472_v8  ;;  %v3627_v7 = vld [vmem:[#allocation8 + $0x268] sm:$0xf]  ;;  %v4553_v8 = vld [vmem:[#allocation8 + $0x274] sm:$0xf0]  ;;  %v3620_v21 = vor.u32 %v4552_v14, %v3619_v13  ;;  %v3624_v22 = vor.u32 %v4550_v15, %v3621_v16  ;;  %v3603_v25 = vld [vmem:[#allocation8 + $0x240] sm:$0xf] }
  0x79   : > { %v3628_v17 = vor.u32 %v4553_v8, %v3627_v7  ;;  %v4549_v20 = vld [vmem:[#allocation8 + $0x254] sm:$0xf0]  ;;  %v4548_v26 = vld [vmem:[#allocation8 + $0x24c] sm:$0xf0]  ;;  %v4546_v27 = vld [vmem:[#allocation8 + $0x244] sm:$0xf] }
  0x7a   : > { %860 = vmatpush.bf16.msrb.mxu0 %v3444_v28  ;;  %v3605_v28 = vld [vmem:[#allocation8 + $0x250] sm:$0xf0]  ;;  %v3604_v34 = vor.u32 %v4548_v26, %v3603_v25  ;;  %v4543_v36 = vld [vmem:[#allocation8 + $0x22c] sm:$0xf]  ;;  %v3597_v37 = vld [vmem:[#allocation8 + $0x238] sm:$0xf0] }
  0x7b   : > { %879 = vmatpush.bf16.msrb.mxu1 %v3448_v29  ;;  %v3612_v29 = vor.u32 %v4549_v20, %v3611_v19  ;;  %v3608_v35 = vor.u32 %v4546_v27, %v3605_v28  ;;  %v3587_v38 = vld [vmem:[#allocation8 + $0x220] sm:$0xf]  ;;  %v4544_v40 = vld [vmem:[#allocation8 + $0x22c] sm:$0xf0]  ;;  %v4542_v41 = vld [vmem:[#allocation8 + $0x224] sm:$0xf] }
  0x7c   : > { %898 = vmatpush.bf16.msrb.mxu2 %v3452_v23  ;;  %917 = vmatpush.bf16.msrb.mxu3 %v3456_v24  ;;  %v4547_v23 = vld [vmem:[#allocation8 + $0x24c] sm:$0xf]  ;;  %v3613_v24 = vld [vmem:[#allocation8 + $0x258] sm:$0xf0]  ;;  %v3589_v43 = vld [vmem:[#allocation8 + $0x230] sm:$0xf0]  ;;  %v3588_v53 = vor.u32 %v4544_v40, %v3587_v38 }
  0x7d   : > { %861 = vmatmul.bf16.vlgmr.msrb.gmra.mxu0 %v5279_v42  ;;  %v4539_v51 = vld [vmem:[#allocation8 + $0x20c] sm:$0xf]  ;;  %v3581_v52 = vld [vmem:[#allocation8 + $0x218] sm:$0xf0]  ;;  %v3592_v54 = vor.u32 %v4542_v41, %v3589_v43  ;;  %v3571_v55 = vld [vmem:[#allocation8 + $0x200] sm:$0xf] }
  0x7e   : > { %1134 = vmatpush.bf16.msra.mxu0 %v3684_v32  ;;  %880 = vmatmul.bf16.vlgmr.msrb.gmra.mxu1 %v5279_v42  ;;  %v4545_v32 = vld [vmem:[#allocation8 + $0x234] sm:$0xf0]  ;;  %v4540_v56 = vld [vmem:[#allocation8 + $0x20c] sm:$0xf0]  ;;  %v3819_v60 = vld [vmem:[#allocation8 + $0x3e8] sm:$0xf]  ;;  %v3584_v2 = vor.u32 %v4539_v51, %v3581_v52 }
  0x7f   : > { %1153 = vmatpush.bf16.msra.mxu1 %v3688_v33  ;;  %899 = vmatmul.bf16.vlgmr.msrb.gmra.mxu2 %v5279_v42  ;;  %v929_v33 = vld [vmem:[#allocation2] sm:$0xe]  ;;  %v4601_v61 = vld [vmem:[#allocation8 + $0x3f4] sm:$0xf0]  ;;  %v3821_v63 = vld [vmem:[#allocation8 + $0x3f8] sm:$0xf0] }
  0x80   : > { %1172 = vmatpush.bf16.msra.mxu2 %v3692_v30  ;;  %1191 = vmatpush.bf16.msra.mxu3 %v3696_v31  ;;  %v3616_v30 = vor.u32 %v4547_v23, %v3613_v24  ;;  %v3595_v31 = vld [vmem:[#allocation8 + $0x228] sm:$0xf]  ;;  %v964_v47 = vunpack.c.l.b16 %v929_v33  ;;  %v3811_v0 = vld [vmem:[#allocation8 + $0x3e0] sm:$0xf]  ;;  %v4600_v3 = vld [vmem:[#allocation8 + $0x3ec] sm:$0xf0]  ;;  %v3820_v8 = vor.u32 %v4601_v61, %v3819_v60 }
  0x81   : > { %918 = vmatmul.bf16.vlgmr.msrb.gmra.mxu3 %v5279_v42  ;;  %v3596_v48 = vor.u32 %v4545_v32, %v3595_v31  ;;  %v4598_v4 = vld [vmem:[#allocation8 + $0x3e4] sm:$0xf]  ;;  %v968_v11 = vrot.slane %v5281_v44, 1  ;;  %v3812_v12 = vor.u32 %v4600_v3, %v3811_v0  ;;  %v3803_v14 = vld [vmem:[#allocation8 + $0x3c8] sm:$0xf]  ;;  %s3163_s13 = sshll.u32 %s3160_s25, 4  ;;  %s3164_s13 = int_to_ptr.hbm [resolvable:$true] %s3163_s13 }
  0x82   : > { %1135 = vmatpush.bf16.msra.mxu0 %v3668_v49  ;;  %v3600_v49 = vor.u32 %v4543_v36, %v3597_v37  ;;  %v4597_v15 = vld [vmem:[#allocation8 + $0x3d4] sm:$0xf0]  ;;  %v4595_v16 = vld [vmem:[#allocation8 + $0x3cc] sm:$0xf]  ;;  %v4596_v19 = vld [vmem:[#allocation8 + $0x3cc] sm:$0xf0] }
  0x83   : > { %1154 = vmatpush.bf16.msra.mxu1 %v3672_v50  ;;  %v4541_v50 = vld [vmem:[#allocation8 + $0x214] sm:$0xf0]  ;;  %v4594_v20 = vld [vmem:[#allocation8 + $0x3c4] sm:$0xf]  ;;  %v3804_v23 = vor.u32 %v4597_v15, %v3803_v14  ;;  %v3787_v25 = vld [vmem:[#allocation8 + $0x3a8] sm:$0xf] }
  0x84   : > { %1173 = vmatpush.bf16.msra.mxu2 %v3676_v45  ;;  %1192 = vmatpush.bf16.msra.mxu3 %v3680_v46  ;;  %v3579_v45 = vld [vmem:[#allocation8 + $0x208] sm:$0xf]  ;;  %v4767_v46 = vunpack.c.h.b16 %v5279_v42  ;;  %v4593_v26 = vld [vmem:[#allocation8 + $0x3b4] sm:$0xf0]  ;;  %v3779_v31 = vld [vmem:[#allocation8 + $0x3a0] sm:$0xf] }
  0x85   : > { %v3580_v1 = vor.u32 %v4541_v50, %v3579_v45  ;;  %v4592_v32 = vld [vmem:[#allocation8 + $0x3ac] sm:$0xf0]  ;;  %v4590_v33 = vld [vmem:[#allocation8 + $0x3a4] sm:$0xf]  ;;  %v3771_v37 = vld [vmem:[#allocation8 + $0x388] sm:$0xf] }
  0x86   : > { %1136 = vmatpush.bf16.msra.mxu0 %v3652_v62  ;;  %v965_v62 = vpack.c.b16 %v4767_v46, %v964_v47  ;;  %v4589_v38 = vld [vmem:[#allocation8 + $0x394] sm:$0xf0]  ;;  %v3780_v40 = vor.u32 %v4592_v32, %v3779_v31  ;;  %v4587_v43 = vld [vmem:[#allocation8 + $0x38c] sm:$0xf]  ;;  %v3773_v45 = vld [vmem:[#allocation8 + $0x398] sm:$0xf0] }
  0x87   : > { %1155 = vmatpush.bf16.msra.mxu1 %v3656_v58  ;;  %v4599_v58 = vld [vmem:[#allocation8 + $0x3ec] sm:$0xf]  ;;  %v3763_v47 = vld [vmem:[#allocation8 + $0x380] sm:$0xf]  ;;  %v3765_v50 = vld [vmem:[#allocation8 + $0x390] sm:$0xf0]  ;;  %v3772_v51 = vor.u32 %v4589_v38, %v3771_v37  ;;  %v3776_v52 = vor.u32 %v4587_v43, %v3773_v45 }
  0x88   : > { %1174 = vmatpush.bf16.msra.mxu2 %v3660_v57  ;;  %1193 = vmatpush.bf16.msra.mxu3 %v3664_v59  ;;  %v4538_v57 = vld [vmem:[#allocation8 + $0x204] sm:$0xf]  ;;  %v3573_v59 = vld [vmem:[#allocation8 + $0x210] sm:$0xf0]  ;;  %v3747_v60 = vld [vmem:[#allocation8 + $0x360] sm:$0xf] }
  0x89   : > { %v3576_v7 = vor.u32 %v4538_v57, %v3573_v59  ;;  %v4583_v57 = vld [vmem:[#allocation8 + $0x36c] sm:$0xf]  ;;  %v3757_v59 = vld [vmem:[#allocation8 + $0x378] sm:$0xf0]  ;;  %v4584_v61 = vld [vmem:[#allocation8 + $0x36c] sm:$0xf0] }
  0x8a   : > { %1137 = vmatpush.bf16.msra.mxu0 %v3636_v9  ;;  %v3824_v9 = vor.u32 %v4599_v58, %v3821_v63  ;;  %v3749_v58 = vld [vmem:[#allocation8 + $0x370] sm:$0xf0]  ;;  %v970_v63 = vrot.slane %v5292_v39, 1  ;;  %v4581_v3 = vld [vmem:[#allocation8 + $0x354] sm:$0xf0]  ;;  %s3146_s5 = scalar_lea.sflag [#allocation5], %s5251_s8 }
  0x8b   : > { %1156 = vmatpush.bf16.msra.mxu1 %v3640_v10  ;;  %v967_v10 = vrot.slane %v965_v62, 1  ;;  %v4582_v62 = vld [vmem:[#allocation8 + $0x364] sm:$0xf]  ;;  %v3723_v15 = vld [vmem:[#allocation8 + $0x328] sm:$0xf]  ;;  %s5023_s6 = sshra.s32 %s3164_s13, 4  ;;  %s5024_s6 = int_to_ptr.hbm [resolvable:$true] %s5023_s6 }
  0x8c   : > { %1175 = vmatpush.bf16.msra.mxu2 %v3644_v5  ;;  %1194 = vmatpush.bf16.msra.mxu3 %v3648_v6  ;;  %v3813_v5 = vld [vmem:[#allocation8 + $0x3f0] sm:$0xf0]  ;;  %v3572_v6 = vor.u32 %v4540_v56, %v3571_v55  ;;  %v971_v39 = vsel %vm966_vm1, %v968_v11, %v970_v63  ;;  %v3699_v32 = vld [vmem:[#allocation8 + $0x300] sm:$0xf]  ;;  %v4633_v37 = vld [vmem:[#allocation8 + $0x4f4] sm:$0xf0]  ;;  %p5030_p10 = scmp.lt.s32.totalorder %s5024_s6, %s5719_s4 }
  0x8d   : > { %866 = vmatmul.bf16.gmra.mxu0 %v5281_v44  ;;  %v3816_v13 = vor.u32 %v4598_v4, %v3813_v5  ;;  %v3748_v4 = vor.u32 %v4584_v61, %v3747_v60  ;;  %v3752_v5 = vor.u32 %v4582_v62, %v3749_v58  ;;  %v4631_v38 = vld [vmem:[#allocation8 + $0x4ec] sm:$0xf]  ;;  %v3933_v61 = vld [vmem:[#allocation8 + $0x4d8] sm:$0xf0]  ;;  %v3923_v62 = vld [vmem:[#allocation8 + $0x4c0] sm:$0xf] }
  0x8e   : > { %1138 = vmatpush.bf16.msra.mxu0 %v3620_v21  ;;  %885 = vmatmul.bf16.gmra.mxu1 %v5281_v44  ;;  %v3797_v21 = vld [vmem:[#allocation8 + $0x3d0] sm:$0xf0]  ;;  %v4627_v60 = vld [vmem:[#allocation8 + $0x4cc] sm:$0xf]  ;;  %v4628_v63 = vld [vmem:[#allocation8 + $0x4cc] sm:$0xf0] }
  0x8f   : > { %1157 = vmatpush.bf16.msra.mxu1 %v3624_v22  ;;  %904 = vmatmul.bf16.gmra.mxu2 %v5281_v44  ;;  %v969_v22 = vsel %vm966_vm1, %v967_v10, %v968_v11  ;;  %v3800_v28 = vor.u32 %v4594_v20, %v3797_v21  ;;  %v4578_v10 = vld [vmem:[#allocation8 + $0x344] sm:$0xf]  ;;  %v3725_v20 = vld [vmem:[#allocation8 + $0x338] sm:$0xf0]  ;;  %v3715_v21 = vld [vmem:[#allocation8 + $0x320] sm:$0xf] }
  0x90   : > { %1176 = vmatpush.bf16.msra.mxu2 %v3628_v17  ;;  %1195 = vmatpush.bf16.msra.mxu3 %v3632_v18  ;;  %v3805_v17 = vld [vmem:[#allocation8 + $0x3d8] sm:$0xf0]  ;;  %v3795_v18 = vld [vmem:[#allocation8 + $0x3c0] sm:$0xf]  ;;  %v3707_v11 = vld [vmem:[#allocation8 + $0x308] sm:$0xf] }
  0x91   : > { %923 = vmatmul.bf16.gmra.mxu3 %v5281_v44  ;;  %v3808_v24 = vor.u32 %v4595_v16, %v3805_v17  ;;  %v3796_v27 = vor.u32 %v4596_v19, %v3795_v18  ;;  %v4577_v16 = vld [vmem:[#allocation8 + $0x334] sm:$0xf0]  ;;  %v4575_v19 = vld [vmem:[#allocation8 + $0x32c] sm:$0xf]  ;;  %v4624_v42 = vld [vmem:[#allocation8 + $0x4ac] sm:$0xf0] }
  0x92   : > { %1139 = vmatpush.bf16.msra.mxu0 %v3604_v34  ;;  %v3781_v34 = vld [vmem:[#allocation8 + $0x3b0] sm:$0xf0]  ;;  %s5025_s27 = scalar_lea.hbm %s5024_s6, 32  ;;  %s5029_s14 = scalar_lea.hbm %s5719_s4, 64 }
  0x93   : > { %1158 = vmatpush.bf16.msra.mxu1 %v3608_v35  ;;  %v3788_v35 = vor.u32 %v4593_v26, %v3787_v25  ;;  %v3784_v41 = vor.u32 %v4590_v33, %v3781_v34  ;;  %v3724_v25 = vor.u32 %v4577_v16, %v3723_v15  ;;  %v3728_v26 = vor.u32 %v4575_v19, %v3725_v20  ;;  %v4572_v33 = vld [vmem:[#allocation8 + $0x30c] sm:$0xf0]  ;;  %v4570_v34 = vld [vmem:[#allocation8 + $0x304] sm:$0xf]  ;;  %v3891_v19 = vld [vmem:[#allocation8 + $0x480] sm:$0xf]  ;;  %p5026_p1 = scmp.ne.s32.totalorder %s5024_s6, %s5025_s27  ;;  %p5031_p12 = scmp.lt.s32.totalorder %s5029_s14, %s5025_s27 }
  0x94   : > { %1177 = vmatpush.bf16.msra.mxu2 %v3612_v29  ;;  %1196 = vmatpush.bf16.msra.mxu3 %v3616_v30  ;;  %v4591_v29 = vld [vmem:[#allocation8 + $0x3ac] sm:$0xf]  ;;  %v3789_v30 = vld [vmem:[#allocation8 + $0x3b8] sm:$0xf0]  ;;  %v4620_v20 = vld [vmem:[#allocation8 + $0x48c] sm:$0xf0] }
  0x95   : > { %v3792_v36 = vor.u32 %v4591_v29, %v3789_v30  ;;  %v3709_v29 = vld [vmem:[#allocation8 + $0x318] sm:$0xf0]  ;;  %p5027_p4 = pnand %p5026_p1, %p5218_p7  ;;  %p5032_p13 = por %p5031_p12, %p5030_p10 }
  0x96   : > { %1140 = vmatpush.bf16.msra.mxu0 %v3588_v53  ;;  %v3755_v53 = vld [vmem:[#allocation8 + $0x368] sm:$0xf] }
  0x97   : > { %1159 = vmatpush.bf16.msra.mxu1 %v3592_v54  ;;  %v4585_v54 = vld [vmem:[#allocation8 + $0x374] sm:$0xf0]  ;;  %p5028_p8 = pneg %p5027_p4 }
  0x98   : > { %1178 = vmatpush.bf16.msra.mxu2 %v3596_v48  ;;  %1197 = vmatpush.bf16.msra.mxu3 %v3600_v49  ;;  %v4588_v48 = vld [vmem:[#allocation8 + $0x38c] sm:$0xf0]  ;;  %v4586_v49 = vld [vmem:[#allocation8 + $0x384] sm:$0xf]  ;;  %v3756_v0 = vor.u32 %v4585_v54, %v3755_v53 }
  0x99   : > { %v3764_v55 = vor.u32 %v4588_v48, %v3763_v47  ;;  %v3768_v56 = vor.u32 %v4586_v49, %v3765_v50  ;;  %v4632_v47 = vld [vmem:[#allocation8 + $0x4ec] sm:$0xf0]  ;;  %v4630_v48 = vld [vmem:[#allocation8 + $0x4e4] sm:$0xf]  ;;  %v3941_v49 = vld [vmem:[#allocation8 + $0x4f0] sm:$0xf0]  ;;  %v3700_v50 = vor.u32 %v4572_v33, %v3699_v32  ;;  %p5033_p0 = pnand %p5032_p13, %p5028_p8 }
  0x9a   : > { %1141 = vmatpush.bf16.msra.mxu0 %v3572_v6  ;;  %v4579_v6 = vld [vmem:[#allocation8 + $0x34c] sm:$0xf]  ;;  %v3885_v32 = vld [vmem:[#allocation8 + $0x478] sm:$0xf0]  ;;  %v3875_v33 = vld [vmem:[#allocation8 + $0x460] sm:$0xf] }
  0x9b   : > { %1160 = vmatpush.bf16.msra.mxu1 %v3576_v7  ;;  %v3741_v7 = vld [vmem:[#allocation8 + $0x358] sm:$0xf0] }
  0x9c   : > { %1179 = vmatpush.bf16.msra.mxu2 %v3580_v1  ;;  %1198 = vmatpush.bf16.msra.mxu3 %v3584_v2  ;;  %v3760_v1 = vor.u32 %v4583_v57, %v3757_v59  ;;  %v3739_v2 = vld [vmem:[#allocation8 + $0x348] sm:$0xf]  ;;  %v3744_v14 = vor.u32 %v4579_v6, %v3741_v7  ;;  %v4629_v59 = vld [vmem:[#allocation8 + $0x4d4] sm:$0xf0]  ;;  %v4623_v7 = vld [vmem:[#allocation8 + $0x4ac] sm:$0xf] }
  0x9d   : > { %1142 = vmatmul.bf16.vlgmr.msra.gmra.mxu0 %v969_v22  ;;  %v3931_v57 = vld [vmem:[#allocation8 + $0x4c8] sm:$0xf] }
  0x9e   : > { %1426 = vmatpush.bf16.msrb.mxu0 %v3812_v12  ;;  %1161 = vmatmul.bf16.vlgmr.msra.gmra.mxu1 %v969_v22  ;;  %v3733_v12 = vld [vmem:[#allocation8 + $0x350] sm:$0xf0] }
  0x9f   : > { %1445 = vmatpush.bf16.msrb.mxu1 %v3816_v13  ;;  %1180 = vmatmul.bf16.vlgmr.msra.gmra.mxu2 %v969_v22  ;;  %v3740_v13 = vor.u32 %v4581_v3, %v3739_v2  ;;  %v3736_v18 = vor.u32 %v4578_v10, %v3733_v12  ;;  %v3936_v2 = vor.u32 %v4627_v60, %v3933_v61  ;;  %v3915_v3 = vld [vmem:[#allocation8 + $0x4a8] sm:$0xf]  ;;  %v3909_v10 = vld [vmem:[#allocation8 + $0x4b0] sm:$0xf0] }
  0xa0   : > { %1464 = vmatpush.bf16.msrb.mxu2 %v3820_v8  ;;  %1483 = vmatpush.bf16.msrb.mxu3 %v3824_v9  ;;  %v3731_v8 = vld [vmem:[#allocation8 + $0x340] sm:$0xf]  ;;  %v4580_v9 = vld [vmem:[#allocation8 + $0x34c] sm:$0xf0] }
  0xa1   : > { %1199 = vmatmul.bf16.vlgmr.msra.gmra.mxu3 %v969_v22  ;;  %v3732_v17 = vor.u32 %v4580_v9, %v3731_v8  ;;  %v4576_v22 = vld [vmem:[#allocation8 + $0x32c] sm:$0xf0]  ;;  %v3917_v8 = vld [vmem:[#allocation8 + $0x4b8] sm:$0xf0]  ;;  %v3907_v9 = vld [vmem:[#allocation8 + $0x4a0] sm:$0xf] }
  0xa2   : > { %1427 = vmatpush.bf16.msrb.mxu0 %v3796_v27  ;;  %v4573_v27 = vld [vmem:[#allocation8 + $0x314] sm:$0xf0]  ;;  %v3716_v30 = vor.u32 %v4576_v22, %v3715_v21  ;;  %v3908_v15 = vor.u32 %v4624_v42, %v3907_v9  ;;  %v4618_v21 = vld [vmem:[#allocation8 + $0x484] sm:$0xf]  ;;  %v3893_v22 = vld [vmem:[#allocation8 + $0x490] sm:$0xf0] }
  0xa3   : > { %1446 = vmatpush.bf16.msrb.mxu1 %v3800_v28  ;;  %v4571_v28 = vld [vmem:[#allocation8 + $0x30c] sm:$0xf]  ;;  %v3708_v43 = vor.u32 %v4573_v27, %v3707_v11  ;;  %v345_v11 = vld [vmem:[%s5263_s19 + $0x4] sm:$0xf]  ;;  %v3883_v27 = vld [vmem:[#allocation8 + $0x468] sm:$0xf] }
  0xa4   : > { %1465 = vmatpush.bf16.msrb.mxu2 %v3804_v23  ;;  %1484 = vmatpush.bf16.msrb.mxu3 %v3808_v24  ;;  %v4574_v23 = vld [vmem:[#allocation8 + $0x324] sm:$0xf]  ;;  %v3717_v24 = vld [vmem:[#allocation8 + $0x330] sm:$0xf0]  ;;  %v3712_v45 = vor.u32 %v4571_v28, %v3709_v29  ;;  %v4617_v28 = vld [vmem:[#allocation8 + $0x474] sm:$0xf0] }
  0xa5   : > { %v3720_v31 = vor.u32 %v4574_v23, %v3717_v24  ;;  %v1518_v23 = vld [vmem:[#allocation2 + $0x4] sm:$0xf]  ;;  %v5319_v24 = vld [vmem:[#allocation2 + $0x8] sm:$0xff]   ;;  %v4615_v29 = vld [vmem:[#allocation8 + $0x46c] sm:$0xf] }
  0xa6   : > { %1428 = vmatpush.bf16.msrb.mxu0 %v3780_v40  ;;  %v3949_v40 = vld [vmem:[#allocation8 + $0x4f8] sm:$0xf0]  ;;  %347 = vst [vmem:[#allocation2 + $0x14] sm:$0xf] %v345_v11  ;;  %v3835_v9 = vld [vmem:[#allocation8 + $0x408] sm:$0xf] }
  0xa7   : > { %1447 = vmatpush.bf16.msrb.mxu1 %v3784_v41  ;;  %v3939_v41 = vld [vmem:[#allocation8 + $0x4e0] sm:$0xf]  ;;  %v3952_v54 = vor.u32 %v4631_v38, %v3949_v40  ;;  %v1561_v38 = vunpack.c.l.b16 %v1518_v23  ;;  %v5323_v40 = vld [vmem:[#allocation2 + $0x10] sm:$0xf]  ;;  %v4605_v42 = vld [vmem:[#allocation8 + $0x414] sm:$0xf0] }
  0xa8   : > { %1466 = vmatpush.bf16.msrb.mxu2 %v3788_v35  ;;  %1485 = vmatpush.bf16.msrb.mxu3 %v3792_v36  ;;  %v3701_v35 = vld [vmem:[#allocation8 + $0x310] sm:$0xf0]  ;;  %v3947_v36 = vld [vmem:[#allocation8 + $0x4e8] sm:$0xf]  ;;  %v4665_v23 = vld [vmem:[#allocation8 + $0x5f4] sm:$0xf0] }
  0xa9   : > { %v3948_v53 = vor.u32 %v4633_v37, %v3947_v36  ;;  %v3877_v36 = vld [vmem:[#allocation8 + $0x470] sm:$0xf0]  ;;  %v4774_v37 = vunpack.c.l.b16 %v5319_v24  ;;  %v4663_v11 = vld [vmem:[#allocation8 + $0x5ec] sm:$0xf] }
  0xaa   : > { %1429 = vmatpush.bf16.msrb.mxu0 %v3764_v55  ;;  %v3940_v55 = vor.u32 %v4632_v47, %v3939_v41  ;;  %v4792_v41 = vld [vmem:[#allocation2 + $0xc] sm:$0xff]  ;;  %v3867_v47 = vld [vmem:[#allocation8 + $0x448] sm:$0xf] }
  0xab   : > { %1448 = vmatpush.bf16.msrb.mxu1 %v3768_v56  ;;  %v3944_v56 = vor.u32 %v4630_v48, %v3941_v49  ;;  %v4613_v48 = vld [vmem:[#allocation8 + $0x454] sm:$0xf0]  ;;  %v1566_v60 = vpack.c.b16 %v4774_v37, %v1561_v38 }
  0xac   : > { %1467 = vmatpush.bf16.msrb.mxu2 %v3772_v51  ;;  %1486 = vmatpush.bf16.msrb.mxu3 %v3776_v52  ;;  %v3704_v51 = vor.u32 %v4570_v34, %v3701_v35  ;;  %v4770_v52 = vunpack.c.l.b16 %v5281_v44  ;;  %v4626_v44 = vld [vmem:[#allocation8 + $0x4c4] sm:$0xf]  ;;  %v4616_v34 = vld [vmem:[#allocation8 + $0x46c] sm:$0xf0]  ;;  %v3868_v61 = vor.u32 %v4613_v48, %v3867_v47  ;;  %v4661_v47 = vld [vmem:[#allocation8 + $0x5d4] sm:$0xf0] }
  0xad   : > { %1147 = vmatmul.bf16.gmra.mxu0 %v971_v39  ;;  %v4614_v35 = vld [vmem:[#allocation8 + $0x464] sm:$0xf]  ;;  %v3876_v49 = vor.u32 %v4616_v34, %v3875_v33  ;;  %v1522_v48 = vld [vmem:[#allocation2 + $0x14] sm:$0x1] }
  0xae   : > { %1430 = vmatpush.bf16.msrb.mxu0 %v3748_v4  ;;  %1166 = vmatmul.bf16.gmra.mxu1 %v971_v39  ;;  %v1262_v58 = vpack.c.b16 %v4770_v52, %v4767_v46  ;;  %v4625_v4 = vld [vmem:[#allocation8 + $0x4b4] sm:$0xf0]  ;;  %v4622_v46 = vld [vmem:[#allocation8 + $0x4a4] sm:$0xf]  ;;  %v3869_v52 = vld [vmem:[#allocation8 + $0x458] sm:$0xf0] }
  0xaf   : > { %1449 = vmatpush.bf16.msrb.mxu1 %v3752_v5  ;;  %1185 = vmatmul.bf16.gmra.mxu2 %v971_v39  ;;  %v3924_v5 = vor.u32 %v4628_v63, %v3923_v62  ;;  %v3916_v12 = vor.u32 %v4625_v4, %v3915_v3  ;;  %v3912_v16 = vor.u32 %v4622_v46, %v3909_v10  ;;  %v4609_v63 = vld [vmem:[#allocation8 + $0x434] sm:$0xf0]  ;;  %v3843_v3 = vld [vmem:[#allocation8 + $0x420] sm:$0xf]  ;;  %v4608_v4 = vld [vmem:[#allocation8 + $0x42c] sm:$0xf0] }
  0xb0   : > { %1468 = vmatpush.bf16.msrb.mxu2 %v3756_v0  ;;  %1487 = vmatpush.bf16.msrb.mxu3 %v3760_v1  ;;  %v3925_v0 = vld [vmem:[#allocation8 + $0x4d0] sm:$0xf0]  ;;  %v3932_v1 = vor.u32 %v4629_v59, %v3931_v57  ;;  %v4775_v57 = vunpack.c.h.b16 %v5319_v24  ;;  %v1564_v59 = vunpack.c.l.b16 %v5323_v40  ;;  %v4603_v46 = vld [vmem:[#allocation8 + $0x40c] sm:$0xf] }
  0xb1   : > { %1204 = vmatmul.bf16.gmra.mxu3 %v971_v39  ;;  %v3928_v6 = vor.u32 %v4626_v44, %v3925_v0  ;;  %v3920_v39 = vor.u32 %v4623_v7, %v3917_v8  ;;  %v4607_v44 = vld [vmem:[#allocation8 + $0x42c] sm:$0xf]  ;;  %v1572_v8 = vshll.u32 %v1566_v60, 16 }
  0xb2   : > { %1431 = vmatpush.bf16.msrb.mxu0 %v3732_v17  ;;  %v4619_v17 = vld [vmem:[#allocation8 + $0x48c] sm:$0xf]  ;;  %v5331_v7 = vpack.c.b16 %v1564_v59, %v4775_v57 }
  0xb3   : > { %1450 = vmatpush.bf16.msrb.mxu1 %v3736_v18  ;;  %v3901_v18 = vld [vmem:[#allocation8 + $0x498] sm:$0xf0] }
  0xb4   : > { %1469 = vmatpush.bf16.msrb.mxu2 %v3740_v13  ;;  %1488 = vmatpush.bf16.msrb.mxu3 %v3744_v14  ;;  %v3899_v13 = vld [vmem:[#allocation8 + $0x488] sm:$0xf]  ;;  %v4621_v14 = vld [vmem:[#allocation8 + $0x494] sm:$0xf0] }
  0xb6   : > { %1432 = vmatpush.bf16.msrb.mxu0 %v3716_v30  ;;  %v3892_v30 = vor.u32 %v4620_v20, %v3891_v19  ;;  %v1570_v19 = vshrl.u32 %v1566_v60, 16  ;;  %v1574_v20 = vrot.slane %v1572_v8, 1  ;;  %v1565_v60 = vunpack.c.l.b16 %v1522_v48  ;;  %v3995_v48 = vld [vmem:[#allocation8 + $0x548] sm:$0xf] }
  0xb7   : > { %1451 = vmatpush.bf16.msrb.mxu1 %v3720_v31  ;;  %v3896_v31 = vor.u32 %v4618_v21, %v3893_v22  ;;  %v1577_v21 = vshll.u32 %v5331_v7, 16  ;;  %v4075_v22 = vld [vmem:[#allocation8 + $0x5e8] sm:$0xf] }
  0xb8   : > { %1470 = vmatpush.bf16.msrb.mxu2 %v3724_v25  ;;  %1489 = vmatpush.bf16.msrb.mxu3 %v3728_v26  ;;  %v3900_v25 = vor.u32 %v4621_v14, %v3899_v13  ;;  %v3904_v26 = vor.u32 %v4619_v17, %v3901_v18  ;;  %v3827_v13 = vld [vmem:[#allocation8 + $0x400] sm:$0xf]  ;;  %v4604_v14 = vld [vmem:[#allocation8 + $0x40c] sm:$0xf0]  ;;  %v4602_v17 = vld [vmem:[#allocation8 + $0x404] sm:$0xf]  ;;  %v4076_v34 = vor.u32 %v4665_v23, %v4075_v22 }
  0xb9   : > { %v3829_v18 = vld [vmem:[#allocation8 + $0x410] sm:$0xf0]  ;;  %v5334_v38 = vrot.slane %v1577_v21, 1  ;;  %v5342_v8 = vpack.c.b16 %v1565_v60, %v1565_v60  ;;  %v1581_v23 = vshrl.u32 %v5331_v7, 16 }
  0xba   : > { %1433 = vmatpush.bf16.msrb.mxu0 %v3700_v50  ;;  %v3880_v50 = vor.u32 %v4614_v35, %v3877_v36  ;;  %v3832_v33 = vor.u32 %v4602_v17, %v3829_v18  ;;  %v1575_v36 = vor.u32 %v1574_v20, %v1570_v19  ;;  %v4652_v18 = vld [vmem:[#allocation8 + $0x58c] sm:$0xf0]  ;;  %v4650_v19 = vld [vmem:[#allocation8 + $0x584] sm:$0xf]  ;;  %v4021_v20 = vld [vmem:[#allocation8 + $0x590] sm:$0xf0] }
  0xbb   : > { %1452 = vmatpush.bf16.msrb.mxu1 %v3704_v51  ;;  %v4611_v51 = vld [vmem:[#allocation8 + $0x44c] sm:$0xf] }
  0xbc   : > { %1471 = vmatpush.bf16.msrb.mxu2 %v3708_v43  ;;  %1490 = vmatpush.bf16.msrb.mxu3 %v3712_v45  ;;  %v3884_v43 = vor.u32 %v4617_v28, %v3883_v27  ;;  %v3888_v45 = vor.u32 %v4615_v29, %v3885_v32  ;;  %v3872_v62 = vor.u32 %v4611_v51, %v3869_v52  ;;  %v4664_v29 = vld [vmem:[#allocation8 + $0x5ec] sm:$0xf0]  ;;  %v4051_v51 = vld [vmem:[#allocation8 + $0x5c0] sm:$0xf] }
  0xbd   : > { %1434 = vmatmul.bf16.vlgmr.msrb.gmra.mxu0 %v1262_v58  ;;  %v3836_v27 = vor.u32 %v4605_v42, %v3835_v9  ;;  %v3828_v32 = vor.u32 %v4604_v14, %v3827_v13  ;;  %v4660_v52 = vld [vmem:[#allocation8 + $0x5cc] sm:$0xf0]  ;;  %v1580_v57 = vsel %vm432_vm0, %v1575_v36, %v5334_v38  ;;  %v4651_v13 = vld [vmem:[#allocation8 + $0x58c] sm:$0xf]  ;;  %v4029_v14 = vld [vmem:[#allocation8 + $0x598] sm:$0xf0] }
  0xbe   : > { %1751 = vmatpush.bf16.msra.mxu0 %v3940_v55  ;;  %1453 = vmatmul.bf16.vlgmr.msrb.gmra.mxu1 %v1262_v58  ;;  %v4610_v55 = vld [vmem:[#allocation8 + $0x444] sm:$0xf]  ;;  %v4005_v36 = vld [vmem:[#allocation8 + $0x570] sm:$0xf0] }
  0xbf   : > { %1770 = vmatpush.bf16.msra.mxu1 %v3944_v56  ;;  %1472 = vmatmul.bf16.vlgmr.msrb.gmra.mxu2 %v1262_v58  ;;  %v3861_v56 = vld [vmem:[#allocation8 + $0x450] sm:$0xf0] }
  0xc0   : > { %1789 = vmatpush.bf16.msra.mxu2 %v3948_v53  ;;  %1808 = vmatpush.bf16.msra.mxu3 %v3952_v54  ;;  %v3859_v53 = vld [vmem:[#allocation8 + $0x440] sm:$0xf]  ;;  %v4612_v54 = vld [vmem:[#allocation8 + $0x44c] sm:$0xf0] }
  0xc1   : > { %1491 = vmatmul.bf16.vlgmr.msrb.gmra.mxu3 %v1262_v58  ;;  %v3851_v58 = vld [vmem:[#allocation8 + $0x428] sm:$0xf]  ;;  %v3860_v0 = vor.u32 %v4612_v54, %v3859_v53  ;;  %v4658_v53 = vld [vmem:[#allocation8 + $0x5c4] sm:$0xf]  ;;  %v4053_v54 = vld [vmem:[#allocation8 + $0x5d0] sm:$0xf0] }
  0xc2   : > { %1752 = vmatpush.bf16.msra.mxu0 %v3924_v5  ;;  %v4606_v5 = vld [vmem:[#allocation8 + $0x424] sm:$0xf]  ;;  %v3852_v10 = vor.u32 %v4609_v63, %v3851_v58  ;;  %v4043_v58 = vld [vmem:[#allocation8 + $0x5a8] sm:$0xf]  ;;  %v4657_v63 = vld [vmem:[#allocation8 + $0x5b4] sm:$0xf0] }
  0xc3   : > { %1771 = vmatpush.bf16.msra.mxu1 %v3928_v6  ;;  %v3845_v6 = vld [vmem:[#allocation8 + $0x430] sm:$0xf0]  ;;  %v4044_v9 = vor.u32 %v4657_v63, %v4043_v58 }
  0xc4   : > { %1790 = vmatpush.bf16.msra.mxu2 %v3932_v1  ;;  %1809 = vmatpush.bf16.msra.mxu3 %v3936_v2  ;;  %v3864_v1 = vor.u32 %v4610_v55, %v3861_v56  ;;  %v3853_v2 = vld [vmem:[#allocation8 + $0x438] sm:$0xf0] }
  0xc6   : > { %1753 = vmatpush.bf16.msra.mxu0 %v3908_v15  ;;  %v3844_v15 = vor.u32 %v4608_v4, %v3843_v3  ;;  %v4035_v3 = vld [vmem:[#allocation8 + $0x5a0] sm:$0xf]  ;;  %v4656_v4 = vld [vmem:[#allocation8 + $0x5ac] sm:$0xf0] }
  0xc7   : > { %1772 = vmatpush.bf16.msra.mxu1 %v3912_v16  ;;  %v3848_v16 = vor.u32 %v4606_v5, %v3845_v6  ;;  %v4654_v5 = vld [vmem:[#allocation8 + $0x5a4] sm:$0xf]  ;;  %v4037_v6 = vld [vmem:[#allocation8 + $0x5b0] sm:$0xf0] }
  0xc8   : > { %1791 = vmatpush.bf16.msra.mxu2 %v3916_v12  ;;  %1810 = vmatpush.bf16.msra.mxu3 %v3920_v39  ;;  %v3856_v12 = vor.u32 %v4607_v44, %v3853_v2  ;;  %v3837_v39 = vld [vmem:[#allocation8 + $0x418] sm:$0xf0]  ;;  %v4052_v44 = vor.u32 %v4660_v52, %v4051_v51  ;;  %v4643_v52 = vld [vmem:[#allocation8 + $0x54c] sm:$0xf] }
  0xc9   : > { %v3840_v28 = vor.u32 %v4603_v46, %v3837_v39  ;;  %v4045_v2 = vld [vmem:[#allocation8 + $0x5b8] sm:$0xf0]  ;;  %v4027_v46 = vld [vmem:[#allocation8 + $0x588] sm:$0xf]  ;;  %v4040_v39 = vor.u32 %v4654_v5, %v4037_v6 }
  0xca   : > { %1754 = vmatpush.bf16.msra.mxu0 %v3892_v30  ;;  %v4662_v30 = vld [vmem:[#allocation8 + $0x5e4] sm:$0xf] }
  0xcb   : > { %1773 = vmatpush.bf16.msra.mxu1 %v3896_v31  ;;  %v4069_v31 = vld [vmem:[#allocation8 + $0x5f0] sm:$0xf0] }
  0xcc   : > { %1792 = vmatpush.bf16.msra.mxu2 %v3900_v25  ;;  %1811 = vmatpush.bf16.msra.mxu3 %v3904_v26  ;;  %v4077_v25 = vld [vmem:[#allocation8 + $0x5f8] sm:$0xf0]  ;;  %v4067_v26 = vld [vmem:[#allocation8 + $0x5e0] sm:$0xf] }
  0xcd   : > { %1439 = vmatmul.bf16.gmra.mxu0 %v4792_v41  ;;  %v4080_v35 = vor.u32 %v4663_v11, %v4077_v25  ;;  %v1585_v11 = vshll.u32 %v5342_v8, 16 }
  0xce   : > { %1755 = vmatpush.bf16.msra.mxu0 %v3876_v49  ;;  %1458 = vmatmul.bf16.gmra.mxu1 %v4792_v41  ;;  %v4659_v49 = vld [vmem:[#allocation8 + $0x5cc] sm:$0xf] }
  0xcf   : > { %1774 = vmatpush.bf16.msra.mxu1 %v3880_v50  ;;  %1477 = vmatmul.bf16.gmra.mxu2 %v4792_v41  ;;  %v4061_v50 = vld [vmem:[#allocation8 + $0x5d8] sm:$0xf0] }
  0xd0   : > { %1793 = vmatpush.bf16.msra.mxu2 %v3884_v43  ;;  %1812 = vmatpush.bf16.msra.mxu3 %v3888_v45  ;;  %v4072_v43 = vor.u32 %v4662_v30, %v4069_v31  ;;  %v4059_v45 = vld [vmem:[#allocation8 + $0x5c8] sm:$0xf]  ;;  %v4024_v30 = vor.u32 %v4650_v19, %v4021_v20  ;;  %v4647_v31 = vld [vmem:[#allocation8 + $0x56c] sm:$0xf]  ;;  %v4637_v19 = vld [vmem:[#allocation8 + $0x514] sm:$0xf0] }
  0xd1   : > { %1496 = vmatmul.bf16.gmra.mxu3 %v4792_v41  ;;  %v4068_v41 = vor.u32 %v4664_v29, %v4067_v26  ;;  %v4032_v26 = vor.u32 %v4651_v13, %v4029_v14  ;;  %v3963_v13 = vld [vmem:[#allocation8 + $0x508] sm:$0xf]  ;;  %v4635_v20 = vld [vmem:[#allocation8 + $0x50c] sm:$0xf] }
  0xd2   : > { %1756 = vmatpush.bf16.msra.mxu0 %v3860_v0  ;;  %v4056_v0 = vor.u32 %v4658_v53, %v4053_v54  ;;  %v3997_v53 = vld [vmem:[#allocation8 + $0x558] sm:$0xf0]  ;;  %v3987_v54 = vld [vmem:[#allocation8 + $0x540] sm:$0xf] }
  0xd3   : > { %1775 = vmatpush.bf16.msra.mxu1 %v3864_v1  ;;  %v4655_v1 = vld [vmem:[#allocation8 + $0x5ac] sm:$0xf] }
  0xd4   : > { %1794 = vmatpush.bf16.msra.mxu2 %v3868_v61  ;;  %1813 = vmatpush.bf16.msra.mxu3 %v3872_v62  ;;  %v4060_v61 = vor.u32 %v4661_v47, %v4059_v45  ;;  %v4064_v62 = vor.u32 %v4659_v49, %v4061_v50  ;;  %v4048_v42 = vor.u32 %v4655_v1, %v4045_v2  ;;  %v4645_v49 = vld [vmem:[#allocation8 + $0x554] sm:$0xf0]  ;;  %v3979_v2 = vld [vmem:[#allocation8 + $0x528] sm:$0xf] }
  0xd5   : > { %v4000_v1 = vor.u32 %v4643_v52, %v3997_v53 }
  0xd6   : > { %1757 = vmatpush.bf16.msra.mxu0 %v3844_v15  ;;  %v4019_v15 = vld [vmem:[#allocation8 + $0x580] sm:$0xf] }
  0xd7   : > { %1776 = vmatpush.bf16.msra.mxu1 %v3848_v16  ;;  %v4020_v29 = vor.u32 %v4652_v18, %v4019_v15 }
  0xd8   : > { %1795 = vmatpush.bf16.msra.mxu2 %v3852_v10  ;;  %1814 = vmatpush.bf16.msra.mxu3 %v3856_v12  ;;  %v4653_v10 = vld [vmem:[#allocation8 + $0x594] sm:$0xf0]  ;;  %v4036_v12 = vor.u32 %v4656_v4, %v4035_v3 }
  0xd9   : > { %v4028_v25 = vor.u32 %v4653_v10, %v4027_v46  ;;  %v4641_v3 = vld [vmem:[#allocation8 + $0x534] sm:$0xf0]  ;;  %v3971_v46 = vld [vmem:[#allocation8 + $0x520] sm:$0xf]  ;;  %v4640_v10 = vld [vmem:[#allocation8 + $0x52c] sm:$0xf0] }
  0xda   : > { %1758 = vmatpush.bf16.msra.mxu0 %v3828_v32  ;;  %v5336_v55 = vpop.f32.mrf.mxu0  ;;  %v4013_v32 = vld [vmem:[#allocation8 + $0x578] sm:$0xf0]  ;;  %v1843_v4 = vld [vmem:[#allocation2 + $0x4] sm:$0xe]  ;;  %v3980_v15 = vor.u32 %v4641_v3, %v3979_v2  ;;  %v4691_v2 = vld [vmem:[#allocation8 + $0x6cc] sm:$0xf] }
  0xdb   : > { %1777 = vmatpush.bf16.msra.mxu1 %v3832_v33  ;;  %v5338_v56 = vpop.f32.mrf.mxu1  ;;  %v4003_v33 = vld [vmem:[#allocation8 + $0x560] sm:$0xf]  ;;  %v4016_v47 = vor.u32 %v4647_v31, %v4013_v32  ;;  %v1878_v14 = vunpack.c.l.b16 %v1843_v4  ;;  %v3957_v31 = vld [vmem:[#allocation8 + $0x510] sm:$0xf0]  ;;  %v4203_v32 = vld [vmem:[#allocation8 + $0x6e8] sm:$0xf] }
  0xdc   : > { %1796 = vmatpush.bf16.msra.mxu2 %v3836_v27  ;;  %1815 = vmatpush.bf16.msra.mxu3 %v3840_v28  ;;  %v4011_v27 = vld [vmem:[#allocation8 + $0x568] sm:$0xf]  ;;  %v4649_v28 = vld [vmem:[#allocation8 + $0x574] sm:$0xf0]  ;;  %v4189_v3 = vld [vmem:[#allocation8 + $0x6d8] sm:$0xf0] }
  0xdd   : > { %1759 = vmatmul.bf16.vlgmr.msra.gmra.mxu0 %v1580_v57  ;;  %v4012_v45 = vor.u32 %v4649_v28, %v4011_v27  ;;  %v4636_v27 = vld [vmem:[#allocation8 + $0x50c] sm:$0xf0]  ;;  %v4634_v28 = vld [vmem:[#allocation8 + $0x504] sm:$0xf]  ;;  %v4179_v4 = vld [vmem:[#allocation8 + $0x6c0] sm:$0xf] }
  0xde   : > { %2047 = vmatpush.bf16.msrb.mxu0 %v4068_v41  ;;  %1778 = vmatmul.bf16.vlgmr.msra.gmra.mxu1 %v1580_v57  ;;  %v1583_v41 = vor.u32 %v1581_v23, %v5334_v38  ;;  %v4642_v38 = vld [vmem:[#allocation8 + $0x544] sm:$0xf]  ;;  %v3965_v23 = vld [vmem:[#allocation8 + $0x518] sm:$0xf0]  ;;  %v3960_v53 = vor.u32 %v4634_v28, %v3957_v31  ;;  %v4688_v28 = vld [vmem:[#allocation8 + $0x6ac] sm:$0xf0] }
  0xdf   : > { %2066 = vmatpush.bf16.msrb.mxu1 %v4072_v43  ;;  %1797 = vmatmul.bf16.vlgmr.msra.gmra.mxu2 %v1580_v57  ;;  %v1587_v43 = vrot.slane %v1585_v11, 1  ;;  %v3972_v11 = vor.u32 %v4640_v10, %v3971_v46  ;;  %v4181_v46 = vld [vmem:[#allocation8 + $0x6d0] sm:$0xf0]  ;;  %v4686_v31 = vld [vmem:[#allocation8 + $0x6a4] sm:$0xf] }
  0xe0   : > { %2085 = vmatpush.bf16.msrb.mxu2 %v4076_v34  ;;  %2104 = vmatpush.bf16.msrb.mxu3 %v4080_v35  ;;  %v4648_v34 = vld [vmem:[#allocation8 + $0x56c] sm:$0xf0]  ;;  %v4646_v35 = vld [vmem:[#allocation8 + $0x564] sm:$0xf] }
  0xe1   : > { %1816 = vmatmul.bf16.vlgmr.msra.gmra.mxu3 %v1580_v57  ;;  %v4004_v50 = vor.u32 %v4648_v34, %v4003_v33  ;;  %v4008_v51 = vor.u32 %v4646_v35, %v4005_v36  ;;  %v4697_v33 = vld [vmem:[#allocation8 + $0x6f4] sm:$0xf0]  ;;  %v1879_v36 = vpack.c.b16 %v4774_v37, %v1878_v14 }
  0xe2   : > { %2048 = vmatpush.bf16.msrb.mxu0 %v4052_v44  ;;  %v5344_v16 = vpop.f32.mrf.mxu2  ;;  %v5348_v21 = vpop.f32.mrf.mxu0  ;;  %v1588_v44 = vsel %vm432_vm0, %v1583_v41, %v1587_v43  ;;  %v4695_v41 = vld [vmem:[#allocation8 + $0x6ec] sm:$0xf]  ;;  %v4205_v43 = vld [vmem:[#allocation8 + $0x6f8] sm:$0xf0] }
  0xe3   : > { %2067 = vmatpush.bf16.msrb.mxu1 %v4056_v0  ;;  %v5350_v22 = vpop.f32.mrf.mxu1  ;;  %v3996_v0 = vor.u32 %v4645_v49, %v3995_v48  ;;  %v3968_v48 = vor.u32 %v4635_v20, %v3965_v23  ;;  %v4696_v49 = vld [vmem:[#allocation8 + $0x6ec] sm:$0xf0]  ;;  %v4689_v20 = vld [vmem:[#allocation8 + $0x6b4] sm:$0xf0] }
  0xe4   : > { %2086 = vmatpush.bf16.msrb.mxu2 %v4060_v61  ;;  %2105 = vmatpush.bf16.msrb.mxu3 %v4064_v62  ;;  %v5346_v17 = vpop.f32.mrf.mxu3  ;;  %v4644_v61 = vld [vmem:[#allocation8 + $0x54c] sm:$0xf0]  ;;  %v3989_v62 = vld [vmem:[#allocation8 + $0x550] sm:$0xf0] }
  0xe5   : > { %v3988_v5 = vor.u32 %v4644_v61, %v3987_v54  ;;  %v3992_v6 = vor.u32 %v4642_v38, %v3989_v62  ;;  %v4204_v54 = vor.u32 %v4697_v33, %v4203_v32  ;;  %v4208_v61 = vor.u32 %v4695_v41, %v4205_v43  ;;  %v4165_v32 = vld [vmem:[#allocation8 + $0x6b0] sm:$0xf0]  ;;  %v4155_v33 = vld [vmem:[#allocation8 + $0x688] sm:$0xf] }
  0xe6   : > { %2049 = vmatpush.bf16.msrb.mxu0 %v4036_v12  ;;  %v4638_v12 = vld [vmem:[#allocation8 + $0x524] sm:$0xf]  ;;  %v1880_v38 = vrot.slane %v1879_v36, 1  ;;  %v1881_v62 = vrot.slane %v5331_v7, 1  ;;  %v4685_v36 = vld [vmem:[#allocation8 + $0x694] sm:$0xf0]  ;;  %v4168_v43 = vor.u32 %v4686_v31, %v4165_v32 }
  0xe7   : > { %2068 = vmatpush.bf16.msrb.mxu1 %v4040_v39  ;;  %v3973_v39 = vld [vmem:[#allocation8 + $0x530] sm:$0xf0]  ;;  %v4676_v31 = vld [vmem:[#allocation8 + $0x64c] sm:$0xf0]  ;;  %v4674_v32 = vld [vmem:[#allocation8 + $0x644] sm:$0xf] }
  0xe8   : > { %2087 = vmatpush.bf16.msrb.mxu2 %v4044_v9  ;;  %2106 = vmatpush.bf16.msrb.mxu3 %v4048_v42  ;;  %v4639_v9 = vld [vmem:[#allocation8 + $0x52c] sm:$0xf]  ;;  %v3981_v42 = vld [vmem:[#allocation8 + $0x538] sm:$0xf0] }
  0xe9   : > { %v3984_v18 = vor.u32 %v4639_v9, %v3981_v42  ;;  %v4692_v9 = vld [vmem:[#allocation8 + $0x6cc] sm:$0xf0]  ;;  %v4690_v42 = vld [vmem:[#allocation8 + $0x6c4] sm:$0xf]  ;;  %v4109_v7 = vld [vmem:[#allocation8 + $0x638] sm:$0xf0] }
  0xea   : > { %2050 = vmatpush.bf16.msrb.mxu0 %v4020_v29  ;;  %v5355_v57 = vpop.f32.mrf.mxu2  ;;  %v5359_v58 = vpop.f32.mrf.mxu0  ;;  %v4180_v23 = vor.u32 %v4692_v9, %v4179_v4  ;;  %v4681_v4 = vld [vmem:[#allocation8 + $0x674] sm:$0xf0] }
  0xeb   : > { %2069 = vmatpush.bf16.msrb.mxu1 %v4024_v30  ;;  %v5361_v63 = vpop.f32.mrf.mxu1 }
  0xec   : > { %2088 = vmatpush.bf16.msrb.mxu2 %v4028_v25  ;;  %2107 = vmatpush.bf16.msrb.mxu3 %v4032_v26  ;;  %v5357_v60 = vpop.f32.mrf.mxu3  ;;  %v3976_v25 = vor.u32 %v4638_v12, %v3973_v39  ;;  %v3955_v26 = vld [vmem:[#allocation8 + $0x500] sm:$0xf]  ;;  %v1882_v39 = vsel %vm966_vm1, %v1880_v38, %v1881_v62 }
  0xed   : > { %1764 = vmatmul.bf16.gmra.mxu0 %v1588_v44  ;;  %v3956_v52 = vor.u32 %v4636_v27, %v3955_v26  ;;  %v4173_v26 = vld [vmem:[#allocation8 + $0x6b8] sm:$0xf0]  ;;  %v4163_v27 = vld [vmem:[#allocation8 + $0x6a0] sm:$0xf] }
  0xee   : > { %2051 = vmatpush.bf16.msrb.mxu0 %v4004_v50  ;;  %1783 = vmatmul.bf16.gmra.mxu1 %v1588_v44  ;;  %v4694_v50 = vld [vmem:[#allocation8 + $0x6e4] sm:$0xf]  ;;  %v4164_v41 = vor.u32 %v4688_v28, %v4163_v27 }
  0xef   : > { %2070 = vmatpush.bf16.msrb.mxu1 %v4008_v51  ;;  %1802 = vmatmul.bf16.gmra.mxu2 %v1588_v44  ;;  %v4197_v51 = vld [vmem:[#allocation8 + $0x6f0] sm:$0xf0] }
  0xf0   : > { %2089 = vmatpush.bf16.msrb.mxu2 %v4012_v45  ;;  %2108 = vmatpush.bf16.msrb.mxu3 %v4016_v47  ;;  %v4195_v45 = vld [vmem:[#allocation8 + $0x6e0] sm:$0xf]  ;;  %v3964_v47 = vor.u32 %v4637_v19, %v3963_v13  ;;  %v4171_v19 = vld [vmem:[#allocation8 + $0x6a8] sm:$0xf] }
  0xf1   : > { %1821 = vmatmul.bf16.gmra.mxu3 %v1588_v44  ;;  %v4196_v37 = vor.u32 %v4696_v49, %v4195_v45  ;;  %v4200_v44 = vor.u32 %v4694_v50, %v4197_v51  ;;  %v4683_v45 = vld [vmem:[#allocation8 + $0x68c] sm:$0xf]  ;;  %v4684_v51 = vld [vmem:[#allocation8 + $0x68c] sm:$0xf0] }
  0xf2   : > { %2052 = vmatpush.bf16.msrb.mxu0 %v3988_v5  ;;  %v5364_v29 = vpop.f32.mrf.mxu2  ;;  %v5368_v34 = vpop.f32.mrf.mxu0 }
  0xf3   : > { %2071 = vmatpush.bf16.msrb.mxu1 %v3992_v6  ;;  %v5370_v35 = vpop.f32.mrf.mxu1 }
  0xf4   : > { %2090 = vmatpush.bf16.msrb.mxu2 %v3996_v0  ;;  %2109 = vmatpush.bf16.msrb.mxu3 %v4000_v1  ;;  %v5366_v30 = vpop.f32.mrf.mxu3  ;;  %v4187_v0 = vld [vmem:[#allocation8 + $0x6c8] sm:$0xf]  ;;  %v4693_v1 = vld [vmem:[#allocation8 + $0x6d4] sm:$0xf0] }
  0xf6   : > { %2053 = vmatpush.bf16.msrb.mxu0 %v3972_v11  ;;  %v4184_v11 = vor.u32 %v4690_v42, %v4181_v46  ;;  %v4141_v42 = vld [vmem:[#allocation8 + $0x678] sm:$0xf0]  ;;  %v4131_v46 = vld [vmem:[#allocation8 + $0x660] sm:$0xf] }
  0xf7   : > { %2072 = vmatpush.bf16.msrb.mxu1 %v3976_v25  ;;  %v4687_v25 = vld [vmem:[#allocation8 + $0x6ac] sm:$0xf] }
  0xf8   : > { %2091 = vmatpush.bf16.msrb.mxu2 %v3980_v15  ;;  %2110 = vmatpush.bf16.msrb.mxu3 %v3984_v18  ;;  %v4188_v15 = vor.u32 %v4693_v1, %v4187_v0  ;;  %v4192_v18 = vor.u32 %v4691_v2, %v4189_v3  ;;  %v4139_v3 = vld [vmem:[#allocation8 + $0x668] sm:$0xf] }
  0xfa   : > { %2054 = vmatpush.bf16.msrb.mxu0 %v3956_v52  ;;  %v5375_v5 = vpop.f32.mrf.mxu2  ;;  %v862_v10 = vpop.f32.mrf.mxu0  ;;  %v4682_v52 = vld [vmem:[#allocation8 + $0x684] sm:$0xf] }
  0xfb   : > { %2073 = vmatpush.bf16.msrb.mxu1 %v3960_v53  ;;  %v881_v12 = vpop.f32.mrf.mxu1  ;;  %v5383_v13 = vadd.f32 %v862_v10, %v5336_v55  ;;  %v4172_v55 = vor.u32 %v4689_v20, %v4171_v19  ;;  %v4149_v53 = vld [vmem:[#allocation8 + $0x690] sm:$0xf0]  ;;  %v4680_v10 = vld [vmem:[#allocation8 + $0x66c] sm:$0xf0]  ;;  %v4677_v19 = vld [vmem:[#allocation8 + $0x654] sm:$0xf0] }
  0xfc   : > { %2092 = vmatpush.bf16.msrb.mxu2 %v3964_v47  ;;  %2111 = vmatpush.bf16.msrb.mxu3 %v3968_v48  ;;  %v5377_v6 = vpop.f32.mrf.mxu3  ;;  %v5386_v14 = vadd.f32 %v881_v12, %v5338_v56  ;;  %v4176_v56 = vor.u32 %v4687_v25, %v4173_v26  ;;  %v4157_v47 = vld [vmem:[#allocation8 + $0x698] sm:$0xf0]  ;;  %v4147_v48 = vld [vmem:[#allocation8 + $0x680] sm:$0xf]  ;;  %v4152_v9 = vor.u32 %v4682_v52, %v4149_v53  ;;  %v4678_v12 = vld [vmem:[#allocation8 + $0x664] sm:$0xf] }
  0xfd   : > { %2055 = vmatmul.bf16.vlgmr.msrb.gmra.mxu0 %v1882_v39  ;;  %v4160_v2 = vor.u32 %v4683_v45, %v4157_v47  ;;  %v4132_v20 = vor.u32 %v4680_v10, %v4131_v46  ;;  %v4125_v25 = vld [vmem:[#allocation8 + $0x658] sm:$0xf0]  ;;  %v4115_v26 = vld [vmem:[#allocation8 + $0x640] sm:$0xf]  ;;  %v4101_v53 = vld [vmem:[#allocation8 + $0x630] sm:$0xf0] }
  0xfe   : > { %2339 = vmatpush.bf16.msra.mxu0 %v4196_v37  ;;  %2074 = vmatmul.bf16.vlgmr.msrb.gmra.mxu1 %v1882_v39  ;;  %v4099_v52 = vld [vmem:[#allocation8 + $0x620] sm:$0xf] }
  0xff   : > { %2358 = vmatpush.bf16.msra.mxu1 %v4200_v44  ;;  %2093 = vmatmul.bf16.vlgmr.msrb.gmra.mxu2 %v1882_v39  ;;  %v4156_v44 = vor.u32 %v4685_v36, %v4155_v33 }
 0x100   : > { %2377 = vmatpush.bf16.msra.mxu2 %v4204_v54  ;;  %2396 = vmatpush.bf16.msra.mxu3 %v4208_v61 }
 0x101   : > { %2112 = vmatmul.bf16.vlgmr.msrb.gmra.mxu3 %v1882_v39  ;;  %v4133_v39 = vld [vmem:[#allocation8 + $0x670] sm:$0xf0] }
 0x102   : > { %2340 = vmatpush.bf16.msra.mxu0 %v4180_v23  ;;  %v900_v49 = vpop.f32.mrf.mxu2  ;;  %v864_v38 = vpop.f32.mrf.mxu0  ;;  %v4136_v23 = vor.u32 %v4678_v12, %v4133_v39  ;;  %v4085_v12 = vld [vmem:[#allocation8 + $0x610] sm:$0xf0]  ;;  %v4335_v39 = vld [vmem:[#allocation8 + $0x7e8] sm:$0xf] }
 0x103   : > { %2359 = vmatpush.bf16.msra.mxu1 %v4184_v11  ;;  %v5389_v54 = vadd.f32 %v900_v49, %v5344_v16  ;;  %v883_v37 = vpop.f32.mrf.mxu1  ;;  %v5395_v0 = vadd.f32 %v864_v38, %v5348_v21  ;;  %v4148_v16 = vor.u32 %v4684_v51, %v4147_v48  ;;  %v1883_v21 = vrot.slane %v5342_v8, 1  ;;  %v4675_v11 = vld [vmem:[#allocation8 + $0x64c] sm:$0xf]  ;;  %v4107_v48 = vld [vmem:[#allocation8 + $0x628] sm:$0xf] }
 0x104   : > { %2378 = vmatpush.bf16.msra.mxu2 %v4188_v15  ;;  %2397 = vmatpush.bf16.msra.mxu3 %v4192_v18  ;;  %v919_v50 = vpop.f32.mrf.mxu3  ;;  %v5398_v1 = vadd.f32 %v883_v37, %v5350_v22  ;;  %v4140_v22 = vor.u32 %v4681_v4, %v4139_v3  ;;  %v4123_v18 = vld [vmem:[#allocation8 + $0x648] sm:$0xf]  ;;  %v4673_v49 = vld [vmem:[#allocation8 + $0x634] sm:$0xf0]  ;;  %v4671_v51 = vld [vmem:[#allocation8 + $0x62c] sm:$0xf] }
 0x105   : > { %v5392_v61 = vadd.f32 %v919_v50, %v5346_v17  ;;  %v4679_v17 = vld [vmem:[#allocation8 + $0x66c] sm:$0xf]  ;;  %v4108_v38 = vor.u32 %v4673_v49, %v4107_v48  ;;  %v4112_v37 = vor.u32 %v4671_v51, %v4109_v7  ;;  %v4093_v3 = vld [vmem:[#allocation8 + $0x618] sm:$0xf0]  ;;  %v4311_v49 = vld [vmem:[#allocation8 + $0x7c0] sm:$0xf] }
 0x106   : > { %2341 = vmatpush.bf16.msra.mxu0 %v4164_v41  ;;  %v4144_v15 = vor.u32 %v4679_v17, %v4141_v42  ;;  %v1884_v41 = vsel %vm966_vm1, %v1881_v62, %v1883_v21  ;;  %v4672_v62 = vld [vmem:[#allocation8 + $0x62c] sm:$0xf0]  ;;  %v4666_v42 = vld [vmem:[#allocation8 + $0x604] sm:$0xf]  ;;  %v4730_v21 = vld [vmem:[#allocation8 + $0x7f4] sm:$0xf0] }
 0x107   : > { %2360 = vmatpush.bf16.msra.mxu1 %v4168_v43  ;;  %v4124_v43 = vor.u32 %v4677_v19, %v4123_v18  ;;  %v4100_v4 = vor.u32 %v4672_v62, %v4099_v52  ;;  %v4668_v17 = vld [vmem:[#allocation8 + $0x60c] sm:$0xf0]  ;;  %v4321_v48 = vld [vmem:[#allocation8 + $0x7d8] sm:$0xf0]  ;;  %v4723_v7 = vld [vmem:[#allocation8 + $0x7c4] sm:$0xf] }
 0x108   : > { %2379 = vmatpush.bf16.msra.mxu2 %v4172_v55  ;;  %2398 = vmatpush.bf16.msra.mxu3 %v4176_v56  ;;  %v4117_v55 = vld [vmem:[#allocation8 + $0x650] sm:$0xf0]  ;;  %v4725_v51 = vld [vmem:[#allocation8 + $0x7cc] sm:$0xf0] }
 0x109   : > { %v4120_v50 = vor.u32 %v4674_v32, %v4117_v55  ;;  %v4329_v32 = vld [vmem:[#allocation8 + $0x7f0] sm:$0xf0]  ;;  %v4088_v55 = vor.u32 %v4666_v42, %v4085_v12  ;;  %v4721_v42 = vld [vmem:[#allocation8 + $0x7ac] sm:$0xf0]  ;;  %v4287_v12 = vld [vmem:[#allocation8 + $0x788] sm:$0xf] }
 0x10a   : > { %2342 = vmatpush.bf16.msra.mxu0 %v4148_v16  ;;  %v902_v27 = vpop.f32.mrf.mxu2  ;;  %v867_v33 = vpop.f32.mrf.mxu0  ;;  %v4313_v52 = vld [vmem:[#allocation8 + $0x7d0] sm:$0xf0] }
 0x10b   : > { %2361 = vmatpush.bf16.msra.mxu1 %v4152_v9  ;;  %v5402_v8 = vadd.f32 %v902_v27, %v5355_v57  ;;  %v886_v36 = vpop.f32.mrf.mxu1  ;;  %v5411_v45 = vadd.f32 %v867_v33, %v5359_v58  ;;  %v4128_v57 = vor.u32 %v4675_v11, %v4125_v25  ;;  %v4670_v58 = vld [vmem:[#allocation8 + $0x624] sm:$0xf]  ;;  %v4083_v9 = vld [vmem:[#allocation8 + $0x600] sm:$0xf]  ;;  %v4337_v11 = vld [vmem:[#allocation8 + $0x7f8] sm:$0xf0]  ;;  %v4336_v33 = vor.u32 %v4730_v21, %v4335_v39 }
 0x10c   : > { %2380 = vmatpush.bf16.msra.mxu2 %v4156_v44  ;;  %2399 = vmatpush.bf16.msra.mxu3 %v4160_v2  ;;  %v921_v28 = vpop.f32.mrf.mxu3  ;;  %v5414_v47 = vadd.f32 %v886_v36, %v5361_v63  ;;  %v4091_v63 = vld [vmem:[#allocation8 + $0x608] sm:$0xf]  ;;  %v4669_v44 = vld [vmem:[#allocation8 + $0x614] sm:$0xf0]  ;;  %v4667_v2 = vld [vmem:[#allocation8 + $0x60c] sm:$0xf]  ;;  %v4104_v16 = vor.u32 %v4670_v58, %v4101_v53 }
 0x10d   : > { %v5405_v56 = vadd.f32 %v921_v28, %v5357_v60  ;;  %v4116_v60 = vor.u32 %v4676_v31, %v4115_v26  ;;  %2060 = vmatmul.bf16.gmra.mxu0 %v1884_v41  ;;  %v4327_v25 = vld [vmem:[#allocation8 + $0x7e0] sm:$0xf]  ;;  %v4096_v28 = vor.u32 %v4667_v2, %v4093_v3  ;;  %v4727_v31 = vld [vmem:[#allocation8 + $0x7e4] sm:$0xf]  ;;  %v4303_v3 = vld [vmem:[#allocation8 + $0x7a8] sm:$0xf] }
 0x10e   : > { %2343 = vmatpush.bf16.msra.mxu0 %v4132_v20  ;;  %2079 = vmatmul.bf16.gmra.mxu1 %v1884_v41  ;;  %v4092_v20 = vor.u32 %v4669_v44, %v4091_v63  ;;  %v4718_v39 = vld [vmem:[#allocation8 + $0x794] sm:$0xf0]  ;;  %v5111_v21 = vmov 0  }
 0x10f   : > { %2362 = vmatpush.bf16.msra.mxu1 %v4136_v23  ;;  %2098 = vmatmul.bf16.gmra.mxu2 %v1884_v41  ;;  %v4728_v23 = vld [vmem:[#allocation8 + $0x7ec] sm:$0xf]  ;;  %348 = vst [vmem:[#allocation2 + $0x18] sm:$0xf] %v5111_v21 }
 0x110   : > { %2381 = vmatpush.bf16.msra.mxu2 %v4140_v22  ;;  %2400 = vmatpush.bf16.msra.mxu3 %v4144_v15  ;;  %v4340_v36 = vor.u32 %v4728_v23, %v4337_v11  ;;  %v4289_v23 = vld [vmem:[#allocation8 + $0x798] sm:$0xf0]  ;;  %v4279_v11 = vld [vmem:[#allocation8 + $0x780] sm:$0xf] }
 0x111   : > { %2117 = vmatmul.bf16.gmra.mxu3 %v1884_v41 }
 0x112   : > { %2344 = vmatpush.bf16.msra.mxu0 %v4116_v60  ;;  %v905_v46 = vpop.f32.mrf.mxu2  ;;  %v869_v18 = vpop.f32.mrf.mxu0 }
 0x113   : > { %2363 = vmatpush.bf16.msra.mxu1 %v4120_v50  ;;  %v5417_v22 = vadd.f32 %v905_v46, %v5364_v29  ;;  %v888_v19 = vpop.f32.mrf.mxu1  ;;  %v5423_v26 = vadd.f32 %v869_v18, %v5368_v34  ;;  %v4729_v29 = vld [vmem:[#allocation8 + $0x7ec] sm:$0xf0]  ;;  %v4319_v34 = vld [vmem:[#allocation8 + $0x7c8] sm:$0xf]  ;;  %v4719_v46 = vld [vmem:[#allocation8 + $0x7a4] sm:$0xf] }
 0x114   : > { %2382 = vmatpush.bf16.msra.mxu2 %v4124_v43  ;;  %2401 = vmatpush.bf16.msra.mxu3 %v4128_v57  ;;  %v924_v10 = vpop.f32.mrf.mxu3  ;;  %v5426_v27 = vadd.f32 %v888_v19, %v5370_v35  ;;  %v4328_v41 = vor.u32 %v4729_v29, %v4327_v25  ;;  %v4332_v43 = vor.u32 %v4727_v31, %v4329_v32  ;;  %v4726_v57 = vld [vmem:[#allocation8 + $0x7d4] sm:$0xf0]  ;;  %v4724_v35 = vld [vmem:[#allocation8 + $0x7cc] sm:$0xf]  ;;  %v4717_v29 = vld [vmem:[#allocation8 + $0x78c] sm:$0xf0] }
 0x115   : > { %v5420_v15 = vadd.f32 %v924_v10, %v5366_v30  ;;  %v4084_v30 = vor.u32 %v4668_v17, %v4083_v9  ;;  %v4320_v44 = vor.u32 %v4726_v57, %v4319_v34  ;;  %v4324_v2 = vor.u32 %v4724_v35, %v4321_v48  ;;  %v4720_v9 = vld [vmem:[#allocation8 + $0x7ac] sm:$0xf]  ;;  %v4305_v17 = vld [vmem:[#allocation8 + $0x7b8] sm:$0xf0]  ;;  %v4715_v31 = vld [vmem:[#allocation8 + $0x784] sm:$0xf] }
 0x116   : > { %2345 = vmatpush.bf16.msra.mxu0 %v4100_v4  ;;  %v4722_v4 = vld [vmem:[#allocation8 + $0x7b4] sm:$0xf0]  ;;  %v4308_v10 = vor.u32 %v4720_v9, %v4305_v17  ;;  %v4271_v35 = vld [vmem:[#allocation8 + $0x768] sm:$0xf] }
 0x117   : > { %2364 = vmatpush.bf16.msra.mxu1 %v4104_v16  ;;  %v4312_v16 = vor.u32 %v4725_v51, %v4311_v49  ;;  %v4714_v48 = vld [vmem:[#allocation8 + $0x774] sm:$0xf0]  ;;  %v4712_v49 = vld [vmem:[#allocation8 + $0x76c] sm:$0xf] }
 0x118   : > { %2383 = vmatpush.bf16.msra.mxu2 %v4108_v38  ;;  %2402 = vmatpush.bf16.msra.mxu3 %v4112_v37 }
 0x11a   : > { %2346 = vmatpush.bf16.msra.mxu0 %v4084_v30  ;;  %v907_v60 = vpop.f32.mrf.mxu2  ;;  %v1143_v53 = vpop.f32.mrf.mxu0 }
 0x11b   : > { %2365 = vmatpush.bf16.msra.mxu1 %v4088_v55  ;;  %v5429_v62 = vadd.f32 %v907_v60, %v5375_v5  ;;  %v1162_v63 = vpop.f32.mrf.mxu1  ;;  %v5435_v38 = vadd.f32 %v1143_v53, %v5383_v13  ;;  %v4316_v5 = vor.u32 %v4723_v7, %v4313_v52  ;;  %v4297_v13 = vld [vmem:[#allocation8 + $0x7b0] sm:$0xf0]  ;;  %v4273_v60 = vld [vmem:[#allocation8 + $0x778] sm:$0xf0]  ;;  %v4713_v7 = vld [vmem:[#allocation8 + $0x76c] sm:$0xf0] }
 0x11c   : > { %2384 = vmatpush.bf16.msra.mxu2 %v4092_v20  ;;  %2403 = vmatpush.bf16.msra.mxu3 %v4096_v28  ;;  %v926_v50 = vpop.f32.mrf.mxu3  ;;  %v5438_v37 = vadd.f32 %v1162_v63, %v5386_v14  ;;  %v4304_v14 = vor.u32 %v4722_v4, %v4303_v3  ;;  %v4300_v19 = vor.u32 %v4719_v46, %v4297_v13  ;;  %v4716_v20 = vld [vmem:[#allocation8 + $0x78c] sm:$0xf]  ;;  %v4711_v52 = vld [vmem:[#allocation8 + $0x764] sm:$0xf]  ;;  %v4255_v63 = vld [vmem:[#allocation8 + $0x748] sm:$0xf] }
 0x11d   : > { %v5432_v58 = vadd.f32 %v926_v50, %v5377_v6  ;;  %v4295_v6 = vld [vmem:[#allocation8 + $0x7a0] sm:$0xf]  ;;  %2347 = vmatmul.bf16.vlgmr.msra.gmra.mxu0 %v5319_v24  ;;  %v4292_v57 = vor.u32 %v4716_v20, %v4289_v23  ;;  %v4276_v53 = vor.u32 %v4712_v49, %v4273_v60  ;;  %v4708_v4 = vld [vmem:[#allocation8 + $0x74c] sm:$0xf]  ;;  %v4707_v46 = vld [vmem:[#allocation8 + $0x744] sm:$0xf] }
 0x11e   : > { %2664 = vmatpush.bf16.msrb.mxu0 %v4328_v41  ;;  %2366 = vmatmul.bf16.vlgmr.msra.gmra.mxu1 %v5319_v24  ;;  %v4296_v18 = vor.u32 %v4721_v42, %v4295_v6  ;;  %v2139_v41 = vld [vmem:[#allocation2 + $0x14] sm:$0xf]  ;;  %v4263_v50 = vld [vmem:[#allocation8 + $0x760] sm:$0xf]  ;;  %v4709_v42 = vld [vmem:[#allocation8 + $0x74c] sm:$0xf0] }
 0x11f   : > { %2683 = vmatpush.bf16.msrb.mxu1 %v4332_v43  ;;  %2385 = vmatmul.bf16.vlgmr.msra.gmra.mxu2 %v5319_v24  ;;  %v2174_v51 = vunpack.c.l.b16 %v2139_v41  ;;  %v4249_v13 = vld [vmem:[#allocation8 + $0x750] sm:$0xf0]  ;;  %v4239_v20 = vld [vmem:[#allocation8 + $0x728] sm:$0xf]  ;;  %v4704_v23 = vld [vmem:[#allocation8 + $0x72c] sm:$0xf] }
 0x120   : > { %2702 = vmatpush.bf16.msrb.mxu2 %v4336_v33  ;;  %2721 = vmatpush.bf16.msrb.mxu3 %v4340_v36  ;;  %v4288_v36 = vor.u32 %v4718_v39, %v4287_v12  ;;  %v4699_v60 = vld [vmem:[#allocation8 + $0x704] sm:$0xf] }
 0x121   : > { %2404 = vmatmul.bf16.vlgmr.msra.gmra.mxu3 %v5319_v24  ;;  %v4281_v24 = vld [vmem:[#allocation8 + $0x790] sm:$0xf0]  ;;  %v2176_v6 = vpack.c.b16 %v2174_v51, %v1564_v59 }
 0x122   : > { %2665 = vmatpush.bf16.msrb.mxu0 %v4312_v16  ;;  %v1181_v25 = vpop.f32.mrf.mxu2  ;;  %v1145_v55 = vpop.f32.mrf.mxu0  ;;  %v4257_v16 = vld [vmem:[#allocation8 + $0x758] sm:$0xf0] }
 0x123   : > { %2684 = vmatpush.bf16.msrb.mxu1 %v4316_v5  ;;  %v5445_v32 = vadd.f32 %v1181_v25, %v5389_v54  ;;  %v1164_v33 = vpop.f32.mrf.mxu1  ;;  %v5451_v43 = vadd.f32 %v1145_v55, %v5395_v0  ;;  %v4280_v54 = vor.u32 %v4717_v29, %v4279_v11  ;;  %v4265_v0 = vld [vmem:[#allocation8 + $0x770] sm:$0xf0]  ;;  %v4247_v5 = vld [vmem:[#allocation8 + $0x740] sm:$0xf]  ;;  %v4260_v59 = vor.u32 %v4708_v4, %v4257_v16  ;;  %v4241_v25 = vld [vmem:[#allocation8 + $0x738] sm:$0xf0] }
 0x124   : > { %2703 = vmatpush.bf16.msrb.mxu2 %v4320_v44  ;;  %2722 = vmatpush.bf16.msrb.mxu3 %v4324_v2  ;;  %v1200_v28 = vpop.f32.mrf.mxu3  ;;  %v5454_v34 = vadd.f32 %v1164_v33, %v5398_v1  ;;  %v4272_v1 = vor.u32 %v4714_v48, %v4271_v35  ;;  %v4710_v44 = vld [vmem:[#allocation8 + $0x754] sm:$0xf0]  ;;  %v4264_v2 = vor.u32 %v4713_v7, %v4263_v50  ;;  %v4705_v29 = vld [vmem:[#allocation8 + $0x72c] sm:$0xf0]  ;;  %v4223_v55 = vld [vmem:[#allocation8 + $0x708] sm:$0xf] }
 0x125   : > { %v5448_v30 = vadd.f32 %v1200_v28, %v5392_v61  ;;  %v4284_v61 = vor.u32 %v4715_v31, %v4281_v24  ;;  %v4268_v3 = vor.u32 %v4711_v52, %v4265_v0  ;;  %v4256_v21 = vor.u32 %v4710_v44, %v4255_v63  ;;  %v4231_v28 = vld [vmem:[#allocation8 + $0x720] sm:$0xf]  ;;  %v4233_v31 = vld [vmem:[#allocation8 + $0x730] sm:$0xf0]  ;;  %v5472_v24 = vld [vmem:[#allocation2 + $0x10] sm:$0xff] }
 0x126   : > { %2666 = vmatpush.bf16.msrb.mxu0 %v4296_v18  ;;  %v5464_v18 = vld [vmem:[#allocation2 + $0x8] sm:$0xff]   ;;  %v4252_v11 = vor.u32 %v4707_v46, %v4249_v13  ;;  %v4702_v33 = vld [vmem:[#allocation8 + $0x714] sm:$0xf0]  ;;  %v4217_v50 = vld [vmem:[#allocation8 + $0x710] sm:$0xf0] }
 0x127   : > { %2685 = vmatpush.bf16.msrb.mxu1 %v4300_v19  ;;  %v4225_v35 = vld [vmem:[#allocation8 + $0x718] sm:$0xf0]  ;;  %v4215_v48 = vld [vmem:[#allocation8 + $0x700] sm:$0xf]  ;;  %v2483_v51 = vshrl.u32 %v5464_v18, 16  ;;  %v4224_v16 = vor.u32 %v4702_v33, %v4223_v55 }
 0x128   : > { %2704 = vmatpush.bf16.msrb.mxu2 %v4304_v14  ;;  %2723 = vmatpush.bf16.msrb.mxu3 %v4308_v10  ;;  %v4762_v63 = vld [vmem:[#allocation8 + $0x8f4] sm:$0xf0]  ;;  %v4759_v13 = vld [vmem:[#allocation8 + $0x8e4] sm:$0xf]  ;;  %v4441_v55 = vld [vmem:[#allocation8 + $0x8d0] sm:$0xf0] }
 0x12a   : > { %2667 = vmatpush.bf16.msrb.mxu0 %v4280_v54  ;;  %v1183_v9 = vpop.f32.mrf.mxu2  ;;  %v1148_v12 = vpop.f32.mrf.mxu0  ;;  %v4701_v54 = vld [vmem:[#allocation8 + $0x70c] sm:$0xf0] }
 0x12b   : > { %2686 = vmatpush.bf16.msrb.mxu1 %v4284_v61  ;;  %v5459_v14 = vadd.f32 %v1183_v9, %v5402_v8  ;;  %v1167_v39 = vpop.f32.mrf.mxu1  ;;  %v5467_v19 = vadd.f32 %v1148_v12, %v5411_v45  ;;  %v4706_v8 = vld [vmem:[#allocation8 + $0x734] sm:$0xf0]  ;;  %v4703_v45 = vld [vmem:[#allocation8 + $0x724] sm:$0xf]  ;;  %v4232_v61 = vor.u32 %v4705_v29, %v4231_v28  ;;  %v4465_v9 = vld [vmem:[#allocation8 + $0x8f8] sm:$0xf0] }
 0x12c   : > { %2705 = vmatpush.bf16.msrb.mxu2 %v4288_v36  ;;  %2724 = vmatpush.bf16.msrb.mxu3 %v4292_v57  ;;  %v1202_v17 = vpop.f32.mrf.mxu3  ;;  %v5470_v40 = vadd.f32 %v1167_v39, %v5414_v47  ;;  %v2485_v47 = vshll.u32 %v5464_v18, 16  ;;  %v4700_v36 = vld [vmem:[#allocation8 + $0x70c] sm:$0xf]  ;;  %v4240_v41 = vor.u32 %v4706_v8, %v4239_v20  ;;  %v4244_v57 = vor.u32 %v4704_v23, %v4241_v25  ;;  %v4457_v12 = vld [vmem:[#allocation8 + $0x8f0] sm:$0xf0] }
 0x12d   : > { %v5462_v10 = vadd.f32 %v1202_v17, %v5405_v56  ;;  %v4248_v56 = vor.u32 %v4709_v42, %v4247_v5  ;;  %2352 = vmatmul.bf16.gmra.mxu0 %v2176_v6  ;;  %v4236_v49 = vor.u32 %v4703_v45, %v4233_v31  ;;  %v4760_v5 = vld [vmem:[#allocation8 + $0x8ec] sm:$0xf]  ;;  %v4455_v17 = vld [vmem:[#allocation8 + $0x8e0] sm:$0xf]  ;;  %v4228_v46 = vor.u32 %v4700_v36, %v4225_v35  ;;  %v4758_v23 = vld [vmem:[#allocation8 + $0x8d4] sm:$0xf0] }
 0x12e   : > { %2668 = vmatpush.bf16.msrb.mxu0 %v4264_v2  ;;  %2371 = vmatmul.bf16.gmra.mxu1 %v2176_v6  ;;  %v2487_v0 = vrot.slane %v2485_v47, 1  ;;  %v4220_v39 = vor.u32 %v4699_v60, %v4217_v50  ;;  %v4468_v18 = vor.u32 %v4760_v5, %v4465_v9  ;;  %v4460_v8 = vor.u32 %v4759_v13, %v4457_v12  ;;  %v4449_v25 = vld [vmem:[#allocation8 + $0x8d8] sm:$0xf0]  ;;  %v4439_v28 = vld [vmem:[#allocation8 + $0x8c0] sm:$0xf] }
 0x12f   : > { %2687 = vmatpush.bf16.msrb.mxu1 %v4268_v3  ;;  %2390 = vmatmul.bf16.gmra.mxu2 %v2176_v6  ;;  %v4757_v31 = vld [vmem:[#allocation8 + $0x8cc] sm:$0xf0]  ;;  %v4755_v47 = vld [vmem:[#allocation8 + $0x8c4] sm:$0xf]  ;;  %v4431_v60 = vld [vmem:[#allocation8 + $0x8a8] sm:$0xf] }
 0x130   : > { %2706 = vmatpush.bf16.msrb.mxu2 %v4272_v1  ;;  %2725 = vmatpush.bf16.msrb.mxu3 %v4276_v53  ;;  %v2490_v1 = vshll.u32 %v5472_v24, 16  ;;  %v4463_v53 = vld [vmem:[#allocation8 + $0x8e8] sm:$0xf]  ;;  %v4754_v50 = vld [vmem:[#allocation8 + $0x8b4] sm:$0xf0] }
 0x131   : > { %2409 = vmatmul.bf16.gmra.mxu3 %v2176_v6 }
 0x132   : > { %2669 = vmatpush.bf16.msrb.mxu0 %v4248_v56  ;;  %v1186_v7 = vpop.f32.mrf.mxu2  ;;  %v1150_v3 = vpop.f32.mrf.mxu0  ;;  %v5489_v20 = vrot.slane %v2490_v1, 1  ;;  %v2435_v56 = vld [vmem:[#allocation2 + $0x18] sm:$0x1]  ;;  %v4753_v1 = vld [vmem:[#allocation8 + $0x8ac] sm:$0xf0] }
 0x133   : > { %2688 = vmatpush.bf16.msrb.mxu1 %v4252_v11  ;;  %v5478_v44 = vadd.f32 %v1186_v7, %v5417_v22  ;;  %v1169_v4 = vpop.f32.mrf.mxu1  ;;  %v5484_v6 = vadd.f32 %v1150_v3, %v5423_v26  ;;  %v4761_v22 = vld [vmem:[#allocation8 + $0x8ec] sm:$0xf0]  ;;  %v4756_v11 = vld [vmem:[#allocation8 + $0x8cc] sm:$0xf]  ;;  %v4750_v3 = vld [vmem:[#allocation8 + $0x894] sm:$0xf0] }
 0x134   : > { %2707 = vmatpush.bf16.msrb.mxu2 %v4256_v21  ;;  %2726 = vmatpush.bf16.msrb.mxu3 %v4260_v59  ;;  %v1205_v52 = vpop.f32.mrf.mxu3  ;;  %v5487_v42 = vadd.f32 %v1169_v4, %v5426_v27  ;;  %v4464_v21 = vor.u32 %v4762_v63, %v4463_v53  ;;  %v2488_v59 = vor.u32 %v2487_v0, %v2483_v51  ;;  %v4447_v27 = vld [vmem:[#allocation8 + $0x8c8] sm:$0xf]  ;;  %v4752_v7 = vld [vmem:[#allocation8 + $0x8ac] sm:$0xf]  ;;  %v4423_v0 = vld [vmem:[#allocation8 + $0x8a0] sm:$0xf] }
 0x135   : > { %v5481_v2 = vadd.f32 %v1205_v52, %v5420_v15  ;;  %v4216_v15 = vor.u32 %v4701_v54, %v4215_v48  ;;  %v4456_v26 = vor.u32 %v4761_v22, %v4455_v17  ;;  %v2478_v48 = vunpack.c.l.b16 %v2435_v56  ;;  %v4433_v52 = vld [vmem:[#allocation8 + $0x8b8] sm:$0xf0]  ;;  %v4751_v53 = vld [vmem:[#allocation8 + $0x8a4] sm:$0xf]  ;;  %v4425_v63 = vld [vmem:[#allocation8 + $0x8b0] sm:$0xf0] }
 0x136   : > { %2670 = vmatpush.bf16.msrb.mxu0 %v4232_v61  ;;  %v2493_v35 = vsel %vm432_vm0, %v2488_v59, %v5489_v20  ;;  %v4444_v51 = vor.u32 %v4755_v47, %v4441_v55  ;;  %v4432_v4 = vor.u32 %v4754_v50, %v4431_v60  ;;  %v4424_v5 = vor.u32 %v4753_v1, %v4423_v0  ;;  %v4748_v17 = vld [vmem:[#allocation8 + $0x88c] sm:$0xf]  ;;  %v4407_v22 = vld [vmem:[#allocation8 + $0x880] sm:$0xf]  ;;  %v4401_v47 = vld [vmem:[#allocation8 + $0x878] sm:$0xf0] }
 0x137   : > { %2689 = vmatpush.bf16.msrb.mxu1 %v4236_v49  ;;  %v4448_v49 = vor.u32 %v4758_v23, %v4447_v27  ;;  %v4428_v9 = vor.u32 %v4751_v53, %v4425_v63  ;;  %v2494_v23 = vshrl.u32 %v5472_v24, 16  ;;  %v4391_v55 = vld [vmem:[#allocation8 + $0x860] sm:$0xf]  ;;  %v4742_v60 = vld [vmem:[#allocation8 + $0x854] sm:$0xf0] }
 0x138   : > { %2708 = vmatpush.bf16.msrb.mxu2 %v4240_v41  ;;  %2727 = vmatpush.bf16.msrb.mxu3 %v4244_v57  ;;  %v4741_v53 = vld [vmem:[#allocation8 + $0x84c] sm:$0xf0]  ;;  %v4739_v63 = vld [vmem:[#allocation8 + $0x844] sm:$0xf] }
 0x13a   : > { %2671 = vmatpush.bf16.msrb.mxu0 %v4216_v15  ;;  %v1188_v29 = vpop.f32.mrf.mxu2  ;;  %v1435_v41 = vpop.f32.mrf.mxu0 }
 0x13b   : > { %2690 = vmatpush.bf16.msrb.mxu1 %v4220_v39  ;;  %v5492_v33 = vadd.f32 %v1188_v29, %v5429_v62  ;;  %v1454_v57 = vpop.f32.mrf.mxu1  ;;  %v5500_v54 = vadd.f32 %v1435_v41, %v5435_v38  ;;  %v4452_v62 = vor.u32 %v4756_v11, %v4449_v25  ;;  %v4415_v38 = vld [vmem:[#allocation8 + $0x888] sm:$0xf]  ;;  %v4749_v39 = vld [vmem:[#allocation8 + $0x88c] sm:$0xf0]  ;;  %v4746_v29 = vld [vmem:[#allocation8 + $0x874] sm:$0xf0] }
 0x13c   : > { %2709 = vmatpush.bf16.msrb.mxu2 %v4224_v16  ;;  %2728 = vmatpush.bf16.msrb.mxu3 %v4228_v46  ;;  %v1207_v45 = vpop.f32.mrf.mxu3  ;;  %v5503_v61 = vadd.f32 %v1454_v57, %v5438_v37  ;;  %v5505_v37 = vpack.c.b16 %v2478_v48, %v2478_v48  ;;  %v4436_v16 = vor.u32 %v4752_v7, %v4433_v52  ;;  %v4417_v46 = vld [vmem:[#allocation8 + $0x898] sm:$0xf0]  ;;  %v4745_v41 = vld [vmem:[#allocation8 + $0x86c] sm:$0xf0]  ;;  %v4743_v57 = vld [vmem:[#allocation8 + $0x864] sm:$0xf] }
 0x13d   : > { %v5495_v36 = vadd.f32 %v1207_v45, %v5432_v58  ;;  %v4440_v58 = vor.u32 %v4757_v31, %v4439_v28  ;;  %2672 = vmatmul.bf16.vlgmr.msrb.gmra.mxu0 %v2493_v35  ;;  %v4416_v15 = vor.u32 %v4750_v3, %v4415_v38  ;;  %v4420_v28 = vor.u32 %v4748_v17, %v4417_v46  ;;  %v4744_v31 = vld [vmem:[#allocation8 + $0x86c] sm:$0xf]  ;;  %v4385_v7 = vld [vmem:[#allocation8 + $0x858] sm:$0xf0]  ;;  %v4375_v52 = vld [vmem:[#allocation8 + $0x840] sm:$0xf] }
 0x13e   : > { %2960 = vmatpush.bf16.msra.mxu0 %v4456_v26  ;;  %2691 = vmatmul.bf16.vlgmr.msrb.gmra.mxu1 %v2493_v35  ;;  %v2498_v56 = vshll.u32 %v5505_v37, 16  ;;  %v4392_v50 = vor.u32 %v4745_v41, %v4391_v55  ;;  %v4377_v38 = vld [vmem:[#allocation8 + $0x850] sm:$0xf0] }
 0x13f   : > { %2979 = vmatpush.bf16.msra.mxu1 %v4460_v8  ;;  %2710 = vmatmul.bf16.vlgmr.msrb.gmra.mxu2 %v2493_v35 }
 0x140   : > { %2998 = vmatpush.bf16.msra.mxu2 %v4464_v21  ;;  %3017 = vmatpush.bf16.msra.mxu3 %v4468_v18  ;;  %v4747_v21 = vld [vmem:[#allocation8 + $0x884] sm:$0xf]  ;;  %v4409_v18 = vld [vmem:[#allocation8 + $0x890] sm:$0xf0]  ;;  %v2500_v48 = vrot.slane %v2498_v56, 1 }
 0x141   : > { %2729 = vmatmul.bf16.vlgmr.msrb.gmra.mxu3 %v2493_v35  ;;  %v4412_v45 = vor.u32 %v4747_v21, %v4409_v18  ;;  %v4393_v35 = vld [vmem:[#allocation8 + $0x870] sm:$0xf0]  ;;  %v4359_v21 = vld [vmem:[#allocation8 + $0x820] sm:$0xf]  ;;  %v4737_v18 = vld [vmem:[#allocation8 + $0x82c] sm:$0xf0] }
 0x142   : > { %2961 = vmatpush.bf16.msra.mxu0 %v4440_v58  ;;  %v1473_v13 = vpop.f32.mrf.mxu2  ;;  %v1437_v8 = vpop.f32.mrf.mxu0  ;;  %v4396_v58 = vor.u32 %v4743_v57, %v4393_v35  ;;  %v4734_v56 = vld [vmem:[#allocation8 + $0x814] sm:$0xf0]  ;;  %v4733_v57 = vld [vmem:[#allocation8 + $0x80c] sm:$0xf0]  ;;  %v4731_v35 = vld [vmem:[#allocation8 + $0x804] sm:$0xf] }
 0x143   : > { %2980 = vmatpush.bf16.msra.mxu1 %v4444_v51  ;;  %v5508_v59 = vadd.f32 %v1473_v13, %v5445_v32  ;;  %v1456_v27 = vpop.f32.mrf.mxu1  ;;  %v5516_v11 = vadd.f32 %v1437_v8, %v5451_v43  ;;  %v4399_v32 = vld [vmem:[#allocation8 + $0x868] sm:$0xf]  ;;  %v2496_v43 = vor.u32 %v2494_v23, %v5489_v20  ;;  %v4740_v51 = vld [vmem:[#allocation8 + $0x84c] sm:$0xf]  ;;  %v4361_v8 = vld [vmem:[#allocation8 + $0x830] sm:$0xf0] }
 0x144   : > { %2999 = vmatpush.bf16.msra.mxu2 %v4448_v49  ;;  %3018 = vmatpush.bf16.msra.mxu3 %v4452_v62  ;;  %v1492_v12 = vpop.f32.mrf.mxu3  ;;  %v5519_v25 = vadd.f32 %v1456_v27, %v5454_v34  ;;  %v4400_v34 = vor.u32 %v4746_v29, %v4399_v32  ;;  %v4404_v49 = vor.u32 %v4744_v31, %v4401_v47  ;;  %v4383_v62 = vld [vmem:[#allocation8 + $0x848] sm:$0xf]  ;;  %v4789_v32 = vld [vmem:[#allocation2 + $0x8] sm:$0xe]  ;;  %v4343_v47 = vld [vmem:[#allocation8 + $0x800] sm:$0xf] }
 0x145   : > { %v5511_v26 = vadd.f32 %v1492_v12, %v5448_v30  ;;  %v4408_v30 = vor.u32 %v4749_v39, %v4407_v22  ;;  %v4388_v22 = vor.u32 %v4740_v51, %v4385_v7  ;;  %v4367_v13 = vld [vmem:[#allocation8 + $0x828] sm:$0xf]  ;;  %v4380_v12 = vor.u32 %v4739_v63, %v4377_v38  ;;  %v4369_v39 = vld [vmem:[#allocation8 + $0x838] sm:$0xf0] }
 0x146   : > { %2962 = vmatpush.bf16.msra.mxu0 %v4424_v5  ;;  %v2501_v5 = vsel %vm432_vm0, %v2496_v43, %v2500_v48  ;;  %v4360_v29 = vor.u32 %v4737_v18, %v4359_v21  ;;  %v4353_v31 = vld [vmem:[#allocation8 + $0x818] sm:$0xf0]  ;;  %v4345_v43 = vld [vmem:[#allocation8 + $0x810] sm:$0xf0] }
 0x147   : > { %2981 = vmatpush.bf16.msra.mxu1 %v4428_v9  ;;  %v4384_v9 = vor.u32 %v4742_v60, %v4383_v62 }
 0x148   : > { %3000 = vmatpush.bf16.msra.mxu2 %v4432_v4  ;;  %3019 = vmatpush.bf16.msra.mxu3 %v4436_v16 }
 0x14a   : > { %2963 = vmatpush.bf16.msra.mxu0 %v4408_v30  ;;  %v1475_v0 = vpop.f32.mrf.mxu2  ;;  %v1440_v4 = vpop.f32.mrf.mxu0 }
 0x14b   : > { %2982 = vmatpush.bf16.msra.mxu1 %v4412_v45  ;;  %v5523_v20 = vadd.f32 %v1475_v0, %v5459_v14  ;;  %v1459_v16 = vpop.f32.mrf.mxu1  ;;  %v5530_v17 = vadd.f32 %v1440_v4, %v5467_v19  ;;  %v4738_v14 = vld [vmem:[#allocation8 + $0x834] sm:$0xf0]  ;;  %v4735_v19 = vld [vmem:[#allocation8 + $0x824] sm:$0xf]  ;;  %v4732_v45 = vld [vmem:[#allocation8 + $0x80c] sm:$0xf]  ;;  %v4348_v0 = vor.u32 %v4731_v35, %v4345_v43 }
 0x14c   : > { %3001 = vmatpush.bf16.msra.mxu2 %v4416_v15  ;;  %3020 = vmatpush.bf16.msra.mxu3 %v4420_v28  ;;  %v1494_v1 = vpop.f32.mrf.mxu3  ;;  %v5533_v46 = vadd.f32 %v1459_v16, %v5470_v40  ;;  %v4736_v15 = vld [vmem:[#allocation8 + $0x82c] sm:$0xf]  ;;  %v4351_v40 = vld [vmem:[#allocation8 + $0x808] sm:$0xf]  ;;  %v4368_v27 = vor.u32 %v4738_v14, %v4367_v13  ;;  %v4788_v28 = vld [vmem:[#allocation2 + $0x8] sm:$0xf0]  ;;  %v4364_v30 = vor.u32 %v4735_v19, %v4361_v8 }
 0x14d   : > { %v5526_v3 = vadd.f32 %v1494_v1, %v5462_v10  ;;  %v4376_v10 = vor.u32 %v4741_v53, %v4375_v52  ;;  %2677 = vmatmul.bf16.gmra.mxu0 %v2501_v5  ;;  %v4372_v23 = vor.u32 %v4736_v15, %v4369_v39  ;;  %v4352_v60 = vor.u32 %v4734_v56, %v4351_v40 }
 0x14e   : > { %2964 = vmatpush.bf16.msra.mxu0 %v4392_v50  ;;  %2696 = vmatmul.bf16.gmra.mxu1 %v2501_v5  ;;  %v4790_v50 = vor.u32 %v4789_v32, %v4788_v28  ;;  %v4356_v7 = vor.u32 %v4732_v45, %v4353_v31  ;;  %v4344_v52 = vor.u32 %v4733_v57, %v4343_v47 }
 0x14f   : > { %2983 = vmatpush.bf16.msra.mxu1 %v4396_v58  ;;  %2715 = vmatmul.bf16.gmra.mxu2 %v2501_v5 }
 0x150   : > { %3002 = vmatpush.bf16.msra.mxu2 %v4400_v34  ;;  %3021 = vmatpush.bf16.msra.mxu3 %v4404_v49  ;;  %v2793_v1 = vrot.slane %v4790_v50, 1 }
 0x151   : > { %2734 = vmatmul.bf16.gmra.mxu3 %v2501_v5 }
 0x152   : > { %2965 = vmatpush.bf16.msra.mxu0 %v4376_v10  ;;  %v1478_v55 = vpop.f32.mrf.mxu2  ;;  %v1442_v49 = vpop.f32.mrf.mxu0 }
 0x153   : > { %2984 = vmatpush.bf16.msra.mxu1 %v4380_v12  ;;  %v1512_v48 = vadd.f32 %v1478_v55, %v5478_v44  ;;  %v1461_v62 = vpop.f32.mrf.mxu1  ;;  %v1514_v58 = vadd.f32 %v1442_v49, %v5484_v6  ;;  %v2794_v44 = vrot.slane %v5472_v24, 1 }
 0x154   : > { %3003 = vmatpush.bf16.msra.mxu2 %v4384_v9  ;;  %3022 = vmatpush.bf16.msra.mxu3 %v4388_v22  ;;  %v1497_v41 = vpop.f32.mrf.mxu3  ;;  %v1515_v51 = vadd.f32 %v1461_v62, %v5487_v42 }
 0x155   : > { %v1513_v34 = vadd.f32 %v1497_v41, %v5481_v2  ;;  %v2795_v4 = vsel %vm966_vm1, %v2793_v1, %v2794_v44 }
 0x156   : > { %2966 = vmatpush.bf16.msra.mxu0 %v4360_v29 }
 0x157   : > { %2985 = vmatpush.bf16.msra.mxu1 %v4364_v30 }
 0x158   : > { %3004 = vmatpush.bf16.msra.mxu2 %v4368_v27  ;;  %3023 = vmatpush.bf16.msra.mxu3 %v4372_v23 }
 0x15a   : > { %2967 = vmatpush.bf16.msra.mxu0 %v4344_v52  ;;  %v1480_v2 = vpop.f32.mrf.mxu2  ;;  %v1760_v63 = vpop.f32.mrf.mxu0 }
 0x15b   : > { %2986 = vmatpush.bf16.msra.mxu1 %v4348_v0  ;;  %v1516_v6 = vadd.f32 %v1480_v2, %v5492_v33  ;;  %v1779_v38 = vpop.f32.mrf.mxu1  ;;  %v1827_v16 = vadd.f32 %v1760_v63, %v5500_v54  ;;  %v2796_v54 = vrot.slane %v5505_v37, 1 }
 0x15c   : > { %3005 = vmatpush.bf16.msra.mxu2 %v4352_v60  ;;  %3024 = vmatpush.bf16.msra.mxu3 %v4356_v7  ;;  %v1499_v53 = vpop.f32.mrf.mxu3  ;;  %v1828_v5 = vadd.f32 %v1779_v38, %v5503_v61 }
 0x15d   : > { %v1517_v42 = vadd.f32 %v1499_v53, %v5495_v36  ;;  %2968 = vmatmul.bf16.vlgmr.msra.gmra.mxu0 %v2795_v4 }
 0x15e   : > { %2987 = vmatmul.bf16.vlgmr.msra.gmra.mxu1 %v2795_v4 }
 0x15f   : > { %3006 = vmatmul.bf16.vlgmr.msra.gmra.mxu2 %v2795_v4 }
 0x161   : > { %3025 = vmatmul.bf16.vlgmr.msra.gmra.mxu3 %v2795_v4 }
 0x162   : > { %v1798_v24 = vpop.f32.mrf.mxu2  ;;  %v1762_v13 = vpop.f32.mrf.mxu0 }
 0x163   : > { %v1829_v22 = vadd.f32 %v1798_v24, %v5508_v59  ;;  %v1781_v36 = vpop.f32.mrf.mxu1  ;;  %v1831_v14 = vadd.f32 %v1762_v13, %v5516_v11  ;;  %v2797_v59 = vsel %vm966_vm1, %v2794_v44, %v2796_v54 }
 0x164   : > { %v1817_v9 = vpop.f32.mrf.mxu3  ;;  %v1832_v10 = vadd.f32 %v1781_v36, %v5519_v25 }
 0x165   : > { %v1830_v33 = vadd.f32 %v1817_v9, %v5511_v26 }
 0x16a   : > { %v1800_v12 = vpop.f32.mrf.mxu2  ;;  %v1765_v21 = vpop.f32.mrf.mxu0 }
 0x16b   : > { %v1833_v15 = vadd.f32 %v1800_v12, %v5523_v20  ;;  %v1784_v18 = vpop.f32.mrf.mxu1  ;;  %v1835_v26 = vadd.f32 %v1765_v21, %v5530_v17 }
 0x16c   : > { %v1819_v61 = vpop.f32.mrf.mxu3  ;;  %v1836_v19 = vadd.f32 %v1784_v18, %v5533_v46 }
 0x16d   : > { %v1834_v39 = vadd.f32 %v1819_v61, %v5526_v3  ;;  %2973 = vmatmul.bf16.gmra.mxu0 %v2797_v59 }
 0x16e   : > { %2992 = vmatmul.bf16.gmra.mxu1 %v2797_v59 }
 0x16f   : > { %3011 = vmatmul.bf16.gmra.mxu2 %v2797_v59 }
 0x171   : > { %3030 = vmatmul.bf16.gmra.mxu3 %v2797_v59 }
 0x172   : > { %v1803_v11 = vpop.f32.mrf.mxu2  ;;  %v1767_v40 = vpop.f32.mrf.mxu0 }
 0x173   : > { %v1837_v25 = vadd.f32 %v1803_v11, %v1512_v48  ;;  %v1786_v20 = vpop.f32.mrf.mxu1  ;;  %v1839_v27 = vadd.f32 %v1767_v40, %v1514_v58 }
 0x174   : > { %v1822_v37 = vpop.f32.mrf.mxu3  ;;  %v1840_v3 = vadd.f32 %v1786_v20, %v1515_v51 }
 0x175   : > { %v1838_v8 = vadd.f32 %v1822_v37, %v1513_v34 }
 0x17a   : > { %v1805_v23 = vpop.f32.mrf.mxu2  ;;  %v2056_v29 = vpop.f32.mrf.mxu0 }
 0x17b   : > { %v1841_v28 = vadd.f32 %v1805_v23, %v1516_v6  ;;  %v2075_v17 = vpop.f32.mrf.mxu1  ;;  %v2123_v30 = vadd.f32 %v2056_v29, %v1827_v16 }
 0x17c   : > { %v1824_v56 = vpop.f32.mrf.mxu3  ;;  %v2124_v46 = vadd.f32 %v2075_v17, %v1828_v5 }
 0x17d   : > { %v1842_v32 = vadd.f32 %v1824_v56, %v1517_v42 }
 0x182   : > { %v2094_v45 = vpop.f32.mrf.mxu2  ;;  %v2058_v41 = vpop.f32.mrf.mxu0 }
 0x183   : > { %v5555_v47 = vadd.f32 %v2094_v45, %v1829_v22  ;;  %v2077_v57 = vpop.f32.mrf.mxu1  ;;  %v5559_v35 = vadd.f32 %v2058_v41, %v1831_v14 }
 0x184   : > { %v2113_v31 = vpop.f32.mrf.mxu3  ;;  %v5561_v43 = vadd.f32 %v2077_v57, %v1832_v10 }
 0x185   : > { %v5557_v55 = vadd.f32 %v2113_v31, %v1830_v33 }
 0x18a   : > { %v2096_v48 = vpop.f32.mrf.mxu2  ;;  %v2061_v60 = vpop.f32.mrf.mxu0 }
 0x18b   : > { %v5563_v49 = vadd.f32 %v2096_v48, %v1833_v15  ;;  %v2080_v50 = vpop.f32.mrf.mxu1  ;;  %v5567_v58 = vadd.f32 %v2061_v60, %v1835_v26 }
 0x18c   : > { %v2115_v34 = vpop.f32.mrf.mxu3  ;;  %v5569_v51 = vadd.f32 %v2080_v50, %v1836_v19 }
 0x18d   : > { %v5565_v62 = vadd.f32 %v2115_v34, %v1834_v39 }
 0x192   : > { %v2099_v7 = vpop.f32.mrf.mxu2  ;;  %v2063_v44 = vpop.f32.mrf.mxu0 }
 0x193   : > { %v5571_v0 = vadd.f32 %v2099_v7, %v1837_v25  ;;  %v2082_v2 = vpop.f32.mrf.mxu1  ;;  %v5575_v53 = vadd.f32 %v2063_v44, %v1839_v27 }
 0x194   : > { %v2118_v52 = vpop.f32.mrf.mxu3  ;;  %v5577_v6 = vadd.f32 %v2082_v2, %v1840_v3 }
 0x195   : > { %v5573_v1 = vadd.f32 %v2118_v52, %v1838_v8 }
 0x19a   : > { %v2101_v42 = vpop.f32.mrf.mxu2  ;;  %v2348_v16 = vpop.f32.mrf.mxu0 }
 0x19b   : > { %v5579_v38 = vadd.f32 %v2101_v42, %v1841_v28  ;;  %v2367_v5 = vpop.f32.mrf.mxu1  ;;  %v3052_v28 = vld [vmem:[#allocation9] sm:$0xf] }
 0x19c   : > { %v2120_v63 = vpop.f32.mrf.mxu3  ;;  %v2416_v29 = vadd.f32 %v2367_v5, %v2124_v46  ;;  %v5607_v57 = vperm.slane %v3052_v28, 0  ;;  %v5609_v48 = vperm.slane %v3052_v28, 1 }
 0x19d   : > { %v5581_v4 = vadd.f32 %v2120_v63, %v1842_v32  ;;  %v2415_v32 = vadd.f32 %v2348_v16, %v2123_v30 }
 0x1a2   : > { %v2386_v24 = vpop.f32.mrf.mxu2  ;;  %v2350_v22 = vpop.f32.mrf.mxu0 }
 0x1a3   : > { %v2369_v33 = vpop.f32.mrf.mxu1  ;;  %v2417_v30 = vadd.f32 %v2386_v24, %v5555_v47  ;;  %v2419_v2 = vadd.f32 %v2350_v22, %v5559_v35 }
 0x1a4   : > { %v2405_v9 = vpop.f32.mrf.mxu3  ;;  %v2420_v42 = vadd.f32 %v2369_v33, %v5561_v43 }
 0x1a5   : > { %v2418_v46 = vadd.f32 %v2405_v9, %v5557_v55 }
 0x1aa   : > { %v2388_v13 = vpop.f32.mrf.mxu2  ;;  %v2353_v14 = vpop.f32.mrf.mxu0 }
 0x1ab   : > { %v2372_v10 = vpop.f32.mrf.mxu1  ;;  %v2421_v33 = vadd.f32 %v2388_v13, %v5563_v49 }
 0x1ac   : > { %v2407_v36 = vpop.f32.mrf.mxu3 }
 0x1b2   : > { %v5583_v54 = vpop.f32.mrf.mxu2  ;;  %v5587_v61 = vpop.f32.mrf.mxu0 }
 0x1b3   : > { %v5589_v15 = vpop.f32.mrf.mxu1 }
 0x1b4   : > { %v5585_v12 = vpop.f32.mrf.mxu3 }
 0x1ba   : > { %v5591_v39 = vpop.f32.mrf.mxu2  ;;  %v2673_v18 = vpop.f32.mrf.mxu0 }
 0x1bb   : > { %v2692_v59 = vpop.f32.mrf.mxu1  ;;  %v2740_v17 = vadd.f32 %v2673_v18, %v2415_v32  ;;  %v5617_v18 = vperm.slane %v3052_v28, 2 }
 0x1bc   : > { %v5593_v21 = vpop.f32.mrf.mxu3  ;;  %v2741_v45 = vadd.f32 %v2692_v59, %v2416_v29  ;;  %v5619_v59 = vperm.slane %v3052_v28, 3  ;;  %v2424_v28 = vadd.f32 %v2372_v10, %v5569_v51 }
 0x1c2   : > { %v2711_v26 = vpop.f32.mrf.mxu2  ;;  %v2675_v11 = vpop.f32.mrf.mxu0 }
 0x1c3   : > { %v2694_v37 = vpop.f32.mrf.mxu1  ;;  %v2742_v16 = vadd.f32 %v2711_v26, %v2417_v30  ;;  %v2744_v32 = vadd.f32 %v2675_v11, %v2419_v2  ;;  %v2422_v26 = vadd.f32 %v2407_v36, %v5565_v62 }
 0x1c4   : > { %v2730_v19 = vpop.f32.mrf.mxu3  ;;  %v2745_v29 = vadd.f32 %v2694_v37, %v2420_v42  ;;  %v2423_v37 = vadd.f32 %v2353_v14, %v5567_v58 }
 0x1c5   : > { %v2743_v5 = vadd.f32 %v2730_v19, %v2418_v46 }
 0x1ca   : > { %v2713_v25 = vpop.f32.mrf.mxu2  ;;  %v2678_v40 = vpop.f32.mrf.mxu0 }
 0x1cb   : > { %v2697_v20 = vpop.f32.mrf.mxu1  ;;  %v2748_v62 = vadd.f32 %v2678_v40, %v2423_v37  ;;  %v2429_v37 = vadd.f32 %v5591_v39, %v5579_v38 }
 0x1cc   : > { %v2732_v8 = vpop.f32.mrf.mxu3  ;;  %v2749_v13 = vadd.f32 %v2697_v20, %v2424_v28  ;;  %v2430_v28 = vadd.f32 %v5593_v21, %v5581_v4 }
 0x1d2   : > { %v5595_v27 = vpop.f32.mrf.mxu2  ;;  %v5599_v23 = vpop.f32.mrf.mxu0 }
 0x1d3   : > { %v5601_v56 = vpop.f32.mrf.mxu1 }
 0x1d4   : > { %v5597_v3 = vpop.f32.mrf.mxu3 }
 0x1da   : > { %v5603_v31 = vpop.f32.mrf.mxu2  ;;  %v2969_v34 = vpop.f32.mrf.mxu0 }
 0x1db   : > { %v2988_v60 = vpop.f32.mrf.mxu1  ;;  %v3036_v50 = vadd.f32 %v2969_v34, %v2740_v17 }
 0x1dc   : > { %v5605_v41 = vpop.f32.mrf.mxu3  ;;  %v3037_v7 = vadd.f32 %v2988_v60, %v2741_v45 }
 0x1dd   : > { %v3062_v52 = vadd.f32 %v5607_v57, %v3036_v50 }
 0x1de   : > { %v3063_v44 = vadd.f32 %v5609_v48, %v3037_v7  ;;  %v2746_v7 = vadd.f32 %v2713_v25, %v2421_v33 }
 0x1e0   : > { %v3078_v63 = vpack.c.bf16 %v3063_v44, %v3062_v52  ;;  %v2747_v44 = vadd.f32 %v2732_v8, %v2422_v26 }
 0x1e2   : > { %v3007_v17 = vpop.f32.mrf.mxu2  ;;  %v2971_v24 = vpop.f32.mrf.mxu0  ;;  %v3094_v60 = vrot.slane %v3078_v63, 2 }
 0x1e3   : > { %v3038_v34 = vadd.f32 %v3007_v17, %v2742_v16  ;;  %v2990_v55 = vpop.f32.mrf.mxu1  ;;  %v3040_v9 = vadd.f32 %v2971_v24, %v2744_v32  ;;  %v2425_v32 = vadd.f32 %v5583_v54, %v5571_v0 }
 0x1e4   : > { %v3026_v45 = vpop.f32.mrf.mxu3  ;;  %v3041_v35 = vadd.f32 %v2990_v55, %v2745_v29  ;;  %v3109_v2 = vsel %vm3106_vm2, %v3078_v63, %v3094_v60  ;;  %v2426_v29 = vadd.f32 %v5585_v12, %v5573_v1 }
 0x1e5   : > { %v3039_v47 = vadd.f32 %v3026_v45, %v2743_v5  ;;  %v3064_v43 = vadd.f32 %v5617_v18, %v3038_v34  ;;  %v3066_v19 = vadd.f32 %v5607_v57, %v3040_v9  ;;  %v2427_v34 = vadd.f32 %v5587_v61, %v5575_v53 }
 0x1e6   : > { %v3067_v11 = vadd.f32 %v5609_v48, %v3041_v35  ;;  %v2750_v55 = vadd.f32 %v5595_v27, %v2425_v32  ;;  %v2751_v9 = vadd.f32 %v5597_v3, %v2426_v29 }
 0x1e7   : > { %v3065_v22 = vadd.f32 %v5619_v59, %v3039_v47  ;;  %v2428_v47 = vadd.f32 %v5589_v15, %v5577_v6  ;;  %v2752_v0 = vadd.f32 %v5599_v23, %v2427_v34 }
 0x1e8   : > { %v3080_v52 = vpack.c.bf16 %v3067_v11, %v3066_v19 }
 0x1e9   : > { %v3079_v50 = vpack.c.bf16 %v3065_v22, %v3064_v43  ;;  %v2753_v1 = vadd.f32 %v5601_v56, %v2428_v47 }
 0x1ea   : > { %v3009_v36 = vpop.f32.mrf.mxu2  ;;  %v2974_v10 = vpop.f32.mrf.mxu0  ;;  %v3097_v17 = vrot.slane %v3080_v52, 2 }
 0x1eb   : > { %v3095_v30 = vrot.slane %v3079_v50, 4  ;;  %v3096_v49 = vrot.slane %v3079_v50, 6  ;;  %v3042_v51 = vadd.f32 %v3009_v36, %v2746_v7  ;;  %v2993_v42 = vpop.f32.mrf.mxu1  ;;  %v3044_v16 = vadd.f32 %v2974_v10, %v2748_v62 }
 0x1ec   : > { %v3028_v46 = vpop.f32.mrf.mxu3  ;;  %v3045_v5 = vadd.f32 %v2993_v42, %v2749_v13  ;;  %v3118_v22 = vsel %vm3106_vm2, %v3080_v52, %v3097_v17  ;;  %v2754_v52 = vadd.f32 %v5603_v31, %v2429_v37 }
 0x1ed   : > { %v3113_v58 = vsel %vm3110_vm3, %v3095_v30, %v3096_v49  ;;  %v3043_v14 = vadd.f32 %v3028_v46, %v2747_v44  ;;  %v3068_v8 = vadd.f32 %v5617_v18, %v3042_v51  ;;  %v3070_v20 = vadd.f32 %v5607_v57, %v3044_v16 }
 0x1ee   : > { %v3115_v25 = vsel %vm3114_vm4, %v3109_v2, %v3113_v58  ;;  %v3071_v63 = vadd.f32 %v5609_v48, %v3045_v5  ;;  %v2755_v44 = vadd.f32 %v5605_v41, %v2430_v28 }
 0x1ef   : > { %3141 = vst [vmem:[%s5633_s23] sm:$0xff] %v3115_v25  ;;  %v3069_v40 = vadd.f32 %v5619_v59, %v3043_v14 }
 0x1f0   : > { %v3082_v24 = vpack.c.bf16 %v3071_v63, %v3070_v20 }
 0x1f1   : > { %v3081_v45 = vpack.c.bf16 %v3069_v40, %v3068_v8 }
 0x1f2   : > { %v3012_v54 = vpop.f32.mrf.mxu2  ;;  %v2976_v15 = vpop.f32.mrf.mxu0  ;;  %v3100_v60 = vrot.slane %v3082_v24, 2 }
 0x1f3   : > { %v3098_v35 = vrot.slane %v3081_v45, 4  ;;  %v3099_v43 = vrot.slane %v3081_v45, 6  ;;  %v3046_v61 = vadd.f32 %v3012_v54, %v2750_v55  ;;  %v2995_v33 = vpop.f32.mrf.mxu1  ;;  %v3048_v3 = vadd.f32 %v2976_v15, %v2752_v0 }
 0x1f4   : > { %v3031_v12 = vpop.f32.mrf.mxu3  ;;  %v3049_v26 = vadd.f32 %v2995_v33, %v2753_v1  ;;  %v3125_v62 = vsel %vm3106_vm2, %v3082_v24, %v3100_v60 }
 0x1f5   : > { %v3121_v53 = vsel %vm3110_vm3, %v3098_v35, %v3099_v43  ;;  %v3047_v6 = vadd.f32 %v3031_v12, %v2751_v9  ;;  %v3072_v23 = vadd.f32 %v5617_v18, %v3046_v61  ;;  %v3074_v19 = vadd.f32 %v5607_v57, %v3048_v3 }
 0x1f6   : > { %v3122_v27 = vsel %vm3114_vm4, %v3118_v22, %v3121_v53  ;;  %v3075_v11 = vadd.f32 %v5609_v48, %v3049_v26 }
 0x1f7   : > { %3142 = vst [vmem:[%s5633_s23 + $0x8] sm:$0xff] %v3122_v27  ;;  %v3073_v56 = vadd.f32 %v5619_v59, %v3047_v6 }
 0x1f8   : > { %v3084_v7 = vpack.c.bf16 %v3075_v11, %v3074_v19 }
 0x1f9   : > { %v3083_v50 = vpack.c.bf16 %v3073_v56, %v3072_v23 }
 0x1fa   : > { %v3014_v57 = vpop.f32.mrf.mxu2  ;;  %v3103_v13 = vrot.slane %v3084_v7, 2 }
 0x1fb   : > { %v3101_v30 = vrot.slane %v3083_v50, 4  ;;  %v3102_v49 = vrot.slane %v3083_v50, 6  ;;  %v3050_v39 = vadd.f32 %v3014_v57, %v2754_v52 }
 0x1fc   : > { %v3033_v48 = vpop.f32.mrf.mxu3  ;;  %v3132_v58 = vsel %vm3106_vm2, %v3084_v7, %v3103_v13 }
 0x1fd   : > { %v3128_v38 = vsel %vm3110_vm3, %v3101_v30, %v3102_v49  ;;  %v3051_v4 = vadd.f32 %v3033_v48, %v2755_v44  ;;  %v3076_v31 = vadd.f32 %v5617_v18, %v3050_v39 }
 0x1fe   : > { %v3129_v21 = vsel %vm3114_vm4, %v3125_v62, %v3128_v38 }
 0x1ff   : > { %3143 = vst [vmem:[%s5633_s23 + $0x10] sm:$0xff] %v3129_v21  ;;  %v3077_v41 = vadd.f32 %v5619_v59, %v3051_v4 }
 0x201   : > { %v3085_v36 = vpack.c.bf16 %v3077_v41, %v3076_v31 }
 0x203   : > { %v3104_v46 = vrot.slane %v3085_v36, 4  ;;  %v3105_v2 = vrot.slane %v3085_v36, 6 }
 0x205   : > { %v3135_v51 = vsel %vm3110_vm3, %v3104_v46, %v3105_v2 }
 0x206   : > { %v3136_v14 = vsel %vm3114_vm4, %v3132_v58, %v3135_v51 }
 0x207   : > { %3144 = vst [vmem:[%s5633_s23 + $0x18] sm:$0xff] %v3136_v14 }
 0x208   : > { %5036 = shalt.err (!%p5033_p0)
}
 0x209   : > { %s5112_s8 = smov 128   ;;  %s5113_s10 = smov 8  }
 0x20a   : > { %4806 = dma.vmem_to_hbm [thread:$0]  (%p5218_p7), %s3162_s18, 512, %s3164_s13, %s3146_s5, %s5112_s8, %s5112_s8, %s5113_s10  }
 0x20b PF: > { %s3178_s0 = sand.u32 1, %s5083_s15   ;;  %p4823_p3 = pnand %p3302_p11, %p5184_p6 }
 0x20c   : > { %s3179_s2 = scalar_lea.sflag [#allocation5], %s3178_s0 }
 0x20d   : > { %p4824_p5 = pneg %p4823_p3 }
 0x20f   : > { %5078 = dma.done.wait (%p4824_p5), %s3179_s2, 512  }
 0x210   : > { %5080 = vsyncadd (%p4824_p5), %s3179_s2, 4294966784  ;;  %s24_s20 = sadd.s32 1, %s5103_s20   ;;  %s5736_s18 = sld [smem:[#allocation17_spill]] }
 0x211   : > { %p21_p9 = scmp.ge.s32.totalorder %s24_s20, 4   ;;  %s5737_s19 = sld [smem:[#allocation18_spill]] }
 0x212   : > { %s5738_s15 = smov %s5087_s16  ;;  %s5739_s16 = smov %s5091_s17 }
 0x213   : > { %s5740_s17 = smov %s5227_s30  ;;  %23 = sbr.rel (!%p21_p9) target bundleno = 13 (0xd), region = 110 }
 0x218   :  { %3185 = vsyncpa [#allocation4], 1 }
 0x219   :  { %3187 = vsyncpa [#allocation4 + $0x1], 1 }
 0x21a   :  { %3188 = vsyncpa [#allocation7], 1 }
 0x21b   :  { %3190 = vsyncpa [#allocation7 + $0x1], 1 }
 0x21c   :  { %3191 = vsyncpa [#allocation10], 1 }
 0x21d   :  { %3192 = vsyncpa [#allocation5], 1 }
 0x21e   :  { %3194 = vsyncpa [#allocation5 + $0x1], 1 }

</bundles_post_ra>
